<compile_context>
chip_gen: v7x
topology: tpu7x:2x2x1
jax: 0.10.0
libtpu: 0.0.40
codegen_flags: <defaults>
</compile_context>

<pallas_src>
import functools

import jax
import jax.numpy as jnp
from jax.experimental import pallas as pl
from jax.experimental.pallas import tpu as pltpu

# Above the 16 MiB v5e scoped default, only half of v7x's 64 MiB physical VMEM.
VMEM_LIMIT_BYTES = 32 * 1024 * 1024

LANE = 128   # mid channels (64) are carried zero-padded to a full vreg width
PAD_L = 8    # left halo width inside VMEM scratch -> interior stores stay
             # sublane-aligned; only the +/-1 halo *reads* are shifted.


def _round_up(x, m):
    return (x + m - 1) // m * m


# ---------------------------------------------------------------------------
# Kernel 1: fused matmul + shift (+ReLU).  bf16 operands, f32 accumulation,
# lane-dense (N % 128 == 0) output.  Used for conv1 (wrapper im2col of the
# tiny 3-channel input) and proj (reshape-only im2col).
# ---------------------------------------------------------------------------
def _matmul_shift_kernel(a_ref, b_ref, s_ref, o_ref, *, relu):
    y = jnp.dot(a_ref[...], b_ref[...], preferred_element_type=jnp.float32)
    y = y + s_ref[...]
    if relu:
        y = jnp.maximum(y, 0.0)
    o_ref[...] = y.astype(o_ref.dtype)


def matmul_shift(a, b, shift, *, relu, out_dtype):
    """a:(M,K), b:(K,N) with BN scale folded (K,N multiples of 128), shift:(1,N)."""
    M, K = a.shape
    K2, N = b.shape
    assert K == K2 and K % LANE == 0 and N % LANE == 0
    a = a.astype(jnp.bfloat16)
    b = b.astype(jnp.bfloat16)
    tm = min(512, _round_up(M, 8))
    kernel = functools.partial(_matmul_shift_kernel, relu=relu)
    return pl.pallas_call(
        kernel,
        out_shape=jax.ShapeDtypeStruct((M, N), out_dtype),
        grid_spec=pltpu.PrefetchScalarGridSpec(
            num_scalar_prefetch=0,
            grid=(pl.cdiv(M, tm),),          # ragged tail handled by Pallas
            in_specs=[
                pl.BlockSpec((tm, K), lambda i: (i, 0)),
                pl.BlockSpec((K, N), lambda i: (0, 0)),
                pl.BlockSpec((1, N), lambda i: (0, 0)),
            ],
            out_specs=pl.BlockSpec((tm, N), lambda i: (i, 0)),
        ),
        compiler_params=pltpu.CompilerParams(
            dimension_semantics=("parallel",),
            vmem_limit_bytes=VMEM_LIMIT_BYTES,
        ),
    )(a, b, shift)


# ---------------------------------------------------------------------------
# Kernel 2: fused conv2 -> conv3 (3x3 s1 p1 + BN + ReLU, twice) per image.
# The conv1 activation block is auto-pipelined by BlockSpec; padding, im2col
# and the conv2 intermediate all live in VMEM.
# ---------------------------------------------------------------------------
def _fused_conv3x3x2_kernel(x_ref, w2_ref, s2_ref, w3_ref, s3_ref, o_ref,
                            xpad, y2pad, patches, *, H, W, C, band):
    nb = H // band

    # Zero the halo scratches (interiors are overwritten below; borders must
    # be zero every step).  Cheap relative to the 9x larger im2col traffic.
    xpad[...] = jnp.zeros_like(xpad)
    y2pad[...] = jnp.zeros_like(y2pad)
    # Sublane-aligned interior copy of the conv1 activation.
    xpad[1:H + 1, PAD_L:PAD_L + W, :] = x_ref[0]

    def conv_pass(src, w_ref, s_ref, emit):
        for r in range(nb):                      # static row-band loop
            r0 = r * band
            # Collapsed im2col: 9 lane-aligned (band, W, 128) slice stores.
            for i in range(3):
                for j in range(3):
                    t = 3 * i + j
                    patches[:, :, t * C:(t + 1) * C] = (
                        src[r0 + i:r0 + i + band,
                            (PAD_L - 1) + j:(PAD_L - 1) + j + W, :])
            a = patches[...].reshape(band * W, 9 * C)
            y = jnp.dot(a, w_ref[...], preferred_element_type=jnp.float32)
            y = jnp.maximum(y + s_ref[...], 0.0)
            emit(r0, y.reshape(band, W, C))

    # conv2 + BN2 + ReLU -> stays in VMEM (y2pad interior).
    def emit_y2(r0, y):
        y2pad[1 + r0:1 + r0 + band, PAD_L:PAD_L + W, :] = y.astype(jnp.bfloat16)

    conv_pass(xpad, w2_ref, s2_ref, emit_y2)

    # conv3 + BN3 + ReLU -> lane-dense output block.
    def emit_y3(r0, y):
        o_ref[0, r0:r0 + band, :, :] = y.astype(o_ref.dtype)

    conv_pass(y2pad, w3_ref, s3_ref, emit_y3)


def _pick_band(H, W, C, limit_bytes=2 * 1024 * 1024):
    """Largest divisor of H whose (band, W, 9*C) bf16 im2col tile fits the
    limit (bigger bands -> M = band*W >= 256 fills the 256-wide MXU)."""
    if W % 8 != 0:
        return 1
    best = 1
    for band in range(1, H + 1):
        if H % band == 0 and band * W * 9 * C * 2 <= limit_bytes:
            best = band
    return best


def fused_conv3x3_bn_relu_x2(x, w2, s2, w3, s3):
    """x: (B, H, W, 128) bf16 -> two 3x3 conv+BN+ReLU, channels stay 128-padded."""
    B, H, W, C = x.shape
    band = _pick_band(H, W, C)
    wp = PAD_L + W + 1
    kernel = functools.partial(_fused_conv3x3x2_kernel,
                               H=H, W=W, C=C, band=band)
    return pl.pallas_call(
        kernel,
        out_shape=jax.ShapeDtypeStruct((B, H, W, C), jnp.bfloat16),
        grid_spec=pltpu.PrefetchScalarGridSpec(
            num_scalar_prefetch=0,
            grid=(B,),
            in_specs=[
                pl.BlockSpec((1, H, W, C), lambda b: (b, 0, 0, 0)),
                pl.BlockSpec((9 * C, C), lambda b: (0, 0)),
                pl.BlockSpec((1, C), lambda b: (0, 0)),
                pl.BlockSpec((9 * C, C), lambda b: (0, 0)),
                pl.BlockSpec((1, C), lambda b: (0, 0)),
            ],
            out_specs=pl.BlockSpec((1, H, W, C), lambda b: (b, 0, 0, 0)),
            scratch_shapes=[
                pltpu.VMEM((H + 2, wp, C), jnp.bfloat16),     # x + halo
                pltpu.VMEM((H + 2, wp, C), jnp.bfloat16),     # conv2 out + halo
                pltpu.VMEM((band, W, 9 * C), jnp.bfloat16),   # im2col tile
            ],
        ),
        compiler_params=pltpu.CompilerParams(
            dimension_semantics=("parallel",),
            vmem_limit_bytes=VMEM_LIMIT_BYTES,
        ),
    )(x, w2, s2, w3, s3)


# ---------------------------------------------------------------------------
# Glue: conv1 wrapper im2col, weight reshape/padding, BN folding
# ---------------------------------------------------------------------------
def fold_bn(gamma, beta, mean, var, eps=1e-5):
    scale = gamma / jnp.sqrt(var + eps)
    return scale, beta - mean * scale


def _conv_w_to_mat(w_oihw, scale, c_pad, o_pad):
    """(O, C, kh, kw) -> (kh*kw*c_pad, o_pad), BN scale folded, zero-padded."""
    O, C, kh, kw = w_oihw.shape
    m = jnp.transpose(w_oihw, (2, 3, 1, 0))                 # (kh, kw, C, O)
    if scale is not None:
        m = m * scale[None, None, None, :]
    m = jnp.pad(m, ((0, 0), (0, 0), (0, c_pad - C), (0, o_pad - O)))
    return m.reshape(kh * kw * c_pad, o_pad).astype(jnp.bfloat16)


def conv1_weight_matrix(w, scale, k_pad, o_pad):
    m = _conv_w_to_mat(w, scale, w.shape[1], o_pad)         # (kh*kw*C, o_pad)
    return jnp.pad(m, ((0, k_pad - m.shape[0]), (0, 0)))


def _shift_row(shift, n_pad):
    return jnp.pad(shift, (0, n_pad - shift.shape[0])).reshape(1, n_pad).astype(
        jnp.float32)


def conv1_im2col(x_nhwc_bf16, kh, kw, stride, pad, k_pad):
    """Built directly at the lane-padded K (zeros concatenated in the same op)."""
    B, H, W, C = x_nhwc_bf16.shape
    OH = (H + 2 * pad - kh) // stride + 1
    OW = (W + 2 * pad - kw) // stride + 1
    xp = jnp.pad(x_nhwc_bf16, ((0, 0), (pad, pad), (pad, pad), (0, 0)))
    cols = [xp[:, i:i + stride * OH:stride, j:j + stride * OW:stride, :]
            for i in range(kh) for j in range(kw)]
    k = kh * kw * C
    if k_pad > k:
        cols.append(jnp.zeros((B, OH, OW, k_pad - k), x_nhwc_bf16.dtype))
    col = jnp.concatenate(cols, axis=-1)
    return col.reshape(B * OH * OW, k_pad), OH, OW


# ---------------------------------------------------------------------------
# PatchEmbed4_2 forward (inference-mode BatchNorm)
# ---------------------------------------------------------------------------
def patch_embed4_2_forward(x_nchw, params):
    x = jnp.transpose(x_nchw, (0, 2, 3, 1)).astype(jnp.bfloat16)   # NHWC bf16
    B = x.shape[0]
    mid = params["conv1_w"].shape[0]
    CP = _round_up(mid, LANE)                                      # 64 -> 128

    # conv1 (7x7 s2 p3) + BN1 + ReLU: 3-channel input -> wrapper im2col is
    # cheap; one lane-dense matmul kernel; output channels padded to 128.
    s1, b1 = fold_bn(*params["bn1"])
    kh, kw = params["conv1_w"].shape[2:]
    K1 = _round_up(kh * kw * x.shape[-1], LANE)
    a1, OH, OW = conv1_im2col(x, kh, kw, 2, 3, K1)
    w1 = conv1_weight_matrix(params["conv1_w"], s1, K1, CP)
    y1 = matmul_shift(a1, w1, _shift_row(b1, CP), relu=True,
                      out_dtype=jnp.bfloat16)
    y1 = y1.reshape(B, OH, OW, CP)

    # conv2 -> conv3 (3x3 s1 p1 + BN + ReLU), fused; conv2 output stays in VMEM.
    s2, b2 = fold_bn(*params["bn2"])
    s3, b3 = fold_bn(*params["bn3"])
    w2 = _conv_w_to_mat(params["conv2_w"], s2, CP, CP)
    w3 = _conv_w_to_mat(params["conv3_w"], s3, CP, CP)
    y3 = fused_conv3x3_bn_relu_x2(y1, w2, _shift_row(b2, CP),
                                  w3, _shift_row(b3, CP))

    # proj: kernel == stride -> im2col is a pure reshape/transpose (no byte
    # expansion), then one lane-dense matmul + bias.
    E = params["proj_w"].shape[0]
    nps = params["proj_w"].shape[-1]
    EP = _round_up(E, LANE)
    oh, ow = OH // nps, OW // nps
    a_p = (y3.reshape(B, oh, nps, ow, nps, CP)
              .transpose(0, 1, 3, 2, 4, 5)
              .reshape(B * oh * ow, nps * nps * CP))
    wp = _conv_w_to_mat(params["proj_w"], None, CP, EP)
    yp = matmul_shift(a_p, wp, _shift_row(params["proj_b"], EP), relu=False,
                      out_dtype=jnp.float32)
    yp = yp[:, :E].reshape(B, oh, ow, E)
    return jnp.transpose(yp, (0, 3, 1, 2))                         # NCHW


# ---------------------------------------------------------------------------
# Pure-JAX f32 reference (lax conv) for correctness check
# ---------------------------------------------------------------------------
def _ref_forward(x_nchw, params):
    def conv(x, w, stride, pad):
        return jax.lax.conv_general_dilated(
            x, w, (stride, stride), [(pad, pad), (pad, pad)],
            dimension_numbers=("NCHW", "OIHW", "NCHW"))

    def bn_relu(x, bn, relu=True):
        gamma, beta, mean, var = bn
        s, b = fold_bn(gamma, beta, mean, var)
        y = x * s[None, :, None, None] + b[None, :, None, None]
        return jnp.maximum(y, 0.0) if relu else y

    x = bn_relu(conv(x_nchw, params["conv1_w"], 2, 3), params["bn1"])
    x = bn_relu(conv(x, params["conv2_w"], 1, 1), params["bn2"])
    x = bn_relu(conv(x, params["conv3_w"], 1, 1), params["bn3"])
    nps = params["proj_w"].shape[-1]
    x = conv(x, params["proj_w"], nps, 0) + params["proj_b"][None, :, None, None]
    return x


# ---------------------------------------------------------------------------
# Main
# ---------------------------------------------------------------------------
if __name__ == "__main__":
    # Small config consistent with the module: img 16, patch 8 -> new_patch 4,
    # in_chans 3, mid channels 64 (hardcoded in the module), embed_dim 32.
    B, C_IN, IMG, PATCH, EMBED = 2, 3, 16, 8, 32
    NEW_PATCH = PATCH // 2
    MID = 64

    key = jax.random.PRNGKey(0)
    ks = jax.random.split(key, 13)

    def rnd(k, shape, scale=0.1):
        return (scale * jax.random.normal(k, shape)).astype(jnp.float32)

    params = {
        "conv1_w": rnd(ks[0], (MID, C_IN, 7, 7)),
        "bn1": (1.0 + rnd(ks[1], (MID,)), rnd(ks[2], (MID,)),
                rnd(ks[3], (MID,)), 1.0 + jnp.abs(rnd(ks[4], (MID,)))),
        "conv2_w": rnd(ks[5], (MID, MID, 3, 3)),
        "bn2": (1.0 + rnd(ks[6], (MID,)), rnd(ks[7], (MID,)),
                rnd(ks[8], (MID,)), 1.0 + jnp.abs(rnd(ks[9], (MID,)))),
        "conv3_w": rnd(ks[10], (MID, MID, 3, 3)),
        "bn3": (jnp.ones((MID,), jnp.float32), jnp.zeros((MID,), jnp.float32),
                jnp.zeros((MID,), jnp.float32), jnp.ones((MID,), jnp.float32)),
        "proj_w": rnd(ks[11], (EMBED, MID, NEW_PATCH, NEW_PATCH)),
        "proj_b": jnp.linspace(-0.05, 0.05, EMBED).astype(jnp.float32),
    }

    x = jax.random.normal(ks[12], (B, C_IN, IMG, IMG), dtype=jnp.float32)

    out = jax.block_until_ready(jax.jit(patch_embed4_2_forward)(x, params))
    assert out.shape == (B, EMBED, IMG // PATCH, IMG // PATCH), out.shape

    ref = jax.block_until_ready(_ref_forward(x, params))
    # bf16 operands / intermediates -> compare with a relative tolerance.
    rel_err = float(jnp.max(jnp.abs(out - ref)) / (jnp.max(jnp.abs(ref)) + 1e-6))
    assert rel_err < 5e-2, f"mismatch vs reference (rel_err={rel_err})"

    print("KERNEL_OK")
</pallas_src>

<mosaic_0001>
module attributes {stable_mosaic.version = 11 : i64} {
  func.func @_matmul_shift_kernel(%arg0: i32, %arg1: memref<128x256xbf16, #tpu.memory_space<vmem>>, %arg2: memref<256x128xbf16, #tpu.memory_space<vmem>>, %arg3: memref<1x128xf32, #tpu.memory_space<vmem>>, %arg4: memref<128x128xbf16, #tpu.memory_space<vmem>>) attributes {dimension_semantics = [#tpu.dimension_semantics<parallel>], iteration_bounds = array<i64: 1>, scalar_prefetch = 0 : i64, scratch_operands = 0 : i64, tpu.core_type = #tpu.core_type<tc>, window_params = [{transform_indices = @transform_0, window_bounds = array<i64: 128, 256>}, {pipeline_mode = #tpu.pipeline_mode<synchronous>, transform_indices = @transform_1, window_bounds = array<i64: 256, 128>}, {pipeline_mode = #tpu.pipeline_mode<synchronous>, transform_indices = @transform_2, window_bounds = array<i64: 1, 128>}, {transform_indices = @transform_3, window_bounds = array<i64: 128, 128>}]} {
    %c0 = arith.constant 0 : index
    %c0_0 = arith.constant 0 : index
    %0 = vector.load %arg1[%c0, %c0_0] : memref<128x256xbf16, #tpu.memory_space<vmem>>, vector<128x256xbf16>
    %c0_1 = arith.constant 0 : index
    %c0_2 = arith.constant 0 : index
    %1 = vector.load %arg2[%c0_1, %c0_2] : memref<256x128xbf16, #tpu.memory_space<vmem>>, vector<256x128xbf16>
    %cst = arith.constant dense<0.000000e+00> : vector<128x128xf32>
    %2 = tpu.matmul %0, %1, %cst {dimension_numbers = #tpu.dot_dimension_numbers<[1], [0], [0], [1], [0, 0, 1, 1], [], []>} : vector<128x256xbf16>, vector<256x128xbf16>, vector<128x128xf32> -> vector<128x128xf32>
    %c0_3 = arith.constant 0 : index
    %c0_4 = arith.constant 0 : index
    %3 = vector.load %arg3[%c0_3, %c0_4] : memref<1x128xf32, #tpu.memory_space<vmem>>, vector<1x128xf32>
    %4 = vector.broadcast %3 : vector<1x128xf32> to vector<128x128xf32>
    %5 = arith.addf %2, %4 : vector<128x128xf32>
    %cst_5 = arith.constant 0.000000e+00 : f32
    %6 = vector.broadcast %cst_5 : f32 to vector<128x128xf32>
    %7 = arith.maximumf %5, %6 : vector<128x128xf32>
    %8 = arith.truncf %7 : vector<128x128xf32> to vector<128x128xbf16>
    %c0_6 = arith.constant 0 : index
    %c0_7 = arith.constant 0 : index
    %9 = vector.load %arg4[%c0_6, %c0_7] : memref<128x128xbf16, #tpu.memory_space<vmem>>, vector<128x128xbf16>
    tpu.vector_store %arg4[%c0_6, %c0_7], %8 {strides = array<i32>} : memref<128x128xbf16, #tpu.memory_space<vmem>>, vector<128x128xbf16>,
    return
  }
  func.func @transform_0(%arg0: i32) -> (i32, i32) {
    %c0_i32 = arith.constant 0 : i32
    %c0_i32_0 = arith.constant 0 : i32
    return %arg0, %c0_i32 : i32, i32
  }
  func.func @transform_1(%arg0: i32) -> (i32, i32) {
    %c0_i32 = arith.constant 0 : i32
    %c0_i32_0 = arith.constant 0 : i32
    %c0_i32_1 = arith.constant 0 : i32
    return %c0_i32, %c0_i32_0 : i32, i32
  }
  func.func @transform_2(%arg0: i32) -> (i32, i32) {
    %c0_i32 = arith.constant 0 : i32
    %c0_i32_0 = arith.constant 0 : i32
    %c0_i32_1 = arith.constant 0 : i32
    return %c0_i32, %c0_i32_0 : i32, i32
  }
  func.func @transform_3(%arg0: i32) -> (i32, i32) {
    %c0_i32 = arith.constant 0 : i32
    %c0_i32_0 = arith.constant 0 : i32
    return %arg0, %c0_i32 : i32, i32
  }
}

module attributes {stable_mosaic.version = 11 : i64} {
  func.func @_fused_conv3x3x2_kernel(%arg0: i32, %arg1: memref<1x8x8x128xbf16, #tpu.memory_space<vmem>>, %arg2: memref<1152x128xbf16, #tpu.memory_space<vmem>>, %arg3: memref<1x128xf32, #tpu.memory_space<vmem>>, %arg4: memref<1152x128xbf16, #tpu.memory_space<vmem>>, %arg5: memref<1x128xf32, #tpu.memory_space<vmem>>, %arg6: memref<1x8x8x128xbf16, #tpu.memory_space<vmem>>, %arg7: memref<10x17x128xbf16, #tpu.memory_space<vmem>>, %arg8: memref<10x17x128xbf16, #tpu.memory_space<vmem>>, %arg9: memref<8x8x1152xbf16, #tpu.memory_space<vmem>>) attributes {dimension_semantics = [#tpu.dimension_semantics<parallel>], iteration_bounds = array<i64: 2>, scalar_prefetch = 0 : i64, scratch_operands = 3 : i64, tpu.core_type = #tpu.core_type<tc>, window_params = [{transform_indices = @transform_0, window_bounds = array<i64: 1, 8, 8, 128>}, {pipeline_mode = #tpu.pipeline_mode<synchronous>, transform_indices = @transform_1, window_bounds = array<i64: 1152, 128>}, {pipeline_mode = #tpu.pipeline_mode<synchronous>, transform_indices = @transform_2, window_bounds = array<i64: 1, 128>}, {pipeline_mode = #tpu.pipeline_mode<synchronous>, transform_indices = @transform_3, window_bounds = array<i64: 1152, 128>}, {pipeline_mode = #tpu.pipeline_mode<synchronous>, transform_indices = @transform_4, window_bounds = array<i64: 1, 128>}, {transform_indices = @transform_5, window_bounds = array<i64: 1, 8, 8, 128>}]} {
    %cst = arith.constant 0.000000e+00 : bf16
    %0 = vector.broadcast %cst : bf16 to vector<10x17x128xbf16>
    %c0 = arith.constant 0 : index
    %c0_0 = arith.constant 0 : index
    %c0_1 = arith.constant 0 : index
    %1 = vector.load %arg7[%c0, %c0_0, %c0_1] : memref<10x17x128xbf16, #tpu.memory_space<vmem>>, vector<10x17x128xbf16>
    tpu.vector_store %arg7[%c0, %c0_0, %c0_1], %0 {strides = array<i32>} : memref<10x17x128xbf16, #tpu.memory_space<vmem>>, vector<10x17x128xbf16>,
    %cst_2 = arith.constant 0.000000e+00 : bf16
    %2 = vector.broadcast %cst_2 : bf16 to vector<10x17x128xbf16>
    %c0_3 = arith.constant 0 : index
    %c0_4 = arith.constant 0 : index
    %c0_5 = arith.constant 0 : index
    %3 = vector.load %arg8[%c0_3, %c0_4, %c0_5] : memref<10x17x128xbf16, #tpu.memory_space<vmem>>, vector<10x17x128xbf16>
    tpu.vector_store %arg8[%c0_3, %c0_4, %c0_5], %2 {strides = array<i32>} : memref<10x17x128xbf16, #tpu.memory_space<vmem>>, vector<10x17x128xbf16>,
    %c0_6 = arith.constant 0 : index
    %c0_7 = arith.constant 0 : index
    %c0_8 = arith.constant 0 : index
    %c0_9 = arith.constant 0 : index
    %4 = vector.load %arg1[%c0_6, %c0_7, %c0_8, %c0_9] : memref<1x8x8x128xbf16, #tpu.memory_space<vmem>>, vector<1x8x8x128xbf16>
    %5 = vector.shape_cast %4 : vector<1x8x8x128xbf16> to vector<8x8x128xbf16>
    %c1 = arith.constant 1 : index
    %c8 = arith.constant 8 : index
    %c0_10 = arith.constant 0 : index
    %6 = vector.load %arg7[%c1, %c8, %c0_10] : memref<10x17x128xbf16, #tpu.memory_space<vmem>>, vector<8x8x128xbf16>
    tpu.vector_store %arg7[%c1, %c8, %c0_10], %5 {strides = array<i32>} : memref<10x17x128xbf16, #tpu.memory_space<vmem>>, vector<8x8x128xbf16>,
    %c0_11 = arith.constant 0 : index
    %c7 = arith.constant 7 : index
    %c0_12 = arith.constant 0 : index
    %7 = vector.load %arg7[%c0_11, %c7, %c0_12] : memref<10x17x128xbf16, #tpu.memory_space<vmem>>, vector<8x8x128xbf16>
    %c0_13 = arith.constant 0 : index
    %c0_14 = arith.constant 0 : index
    %c0_15 = arith.constant 0 : index
    %8 = vector.load %arg9[%c0_13, %c0_14, %c0_15] : memref<8x8x1152xbf16, #tpu.memory_space<vmem>>, vector<8x8x128xbf16>
    tpu.vector_store %arg9[%c0_13, %c0_14, %c0_15], %7 {strides = array<i32>} : memref<8x8x1152xbf16, #tpu.memory_space<vmem>>, vector<8x8x128xbf16>,
    %c0_16 = arith.constant 0 : index
    %c8_17 = arith.constant 8 : index
    %c0_18 = arith.constant 0 : index
    %9 = vector.load %arg7[%c0_16, %c8_17, %c0_18] : memref<10x17x128xbf16, #tpu.memory_space<vmem>>, vector<8x8x128xbf16>
    %c0_19 = arith.constant 0 : index
    %c0_20 = arith.constant 0 : index
    %c128 = arith.constant 128 : index
    %10 = vector.load %arg9[%c0_19, %c0_20, %c128] : memref<8x8x1152xbf16, #tpu.memory_space<vmem>>, vector<8x8x128xbf16>
    tpu.vector_store %arg9[%c0_19, %c0_20, %c128], %9 {strides = array<i32>} : memref<8x8x1152xbf16, #tpu.memory_space<vmem>>, vector<8x8x128xbf16>,
    %c0_21 = arith.constant 0 : index
    %c9 = arith.constant 9 : index
    %c0_22 = arith.constant 0 : index
    %11 = vector.load %arg7[%c0_21, %c9, %c0_22] : memref<10x17x128xbf16, #tpu.memory_space<vmem>>, vector<8x8x128xbf16>
    %c0_23 = arith.constant 0 : index
    %c0_24 = arith.constant 0 : index
    %c256 = arith.constant 256 : index
    %12 = vector.load %arg9[%c0_23, %c0_24, %c256] : memref<8x8x1152xbf16, #tpu.memory_space<vmem>>, vector<8x8x128xbf16>
    tpu.vector_store %arg9[%c0_23, %c0_24, %c256], %11 {strides = array<i32>} : memref<8x8x1152xbf16, #tpu.memory_space<vmem>>, vector<8x8x128xbf16>,
    %c1_25 = arith.constant 1 : index
    %c7_26 = arith.constant 7 : index
    %c0_27 = arith.constant 0 : index
    %13 = vector.load %arg7[%c1_25, %c7_26, %c0_27] : memref<10x17x128xbf16, #tpu.memory_space<vmem>>, vector<8x8x128xbf16>
    %c0_28 = arith.constant 0 : index
    %c0_29 = arith.constant 0 : index
    %c384 = arith.constant 384 : index
    %14 = vector.load %arg9[%c0_28, %c0_29, %c384] : memref<8x8x1152xbf16, #tpu.memory_space<vmem>>, vector<8x8x128xbf16>
    tpu.vector_store %arg9[%c0_28, %c0_29, %c384], %13 {strides = array<i32>} : memref<8x8x1152xbf16, #tpu.memory_space<vmem>>, vector<8x8x128xbf16>,
    %c1_30 = arith.constant 1 : index
    %c8_31 = arith.constant 8 : index
    %c0_32 = arith.constant 0 : index
    %15 = vector.load %arg7[%c1_30, %c8_31, %c0_32] : memref<10x17x128xbf16, #tpu.memory_space<vmem>>, vector<8x8x128xbf16>
    %c0_33 = arith.constant 0 : index
    %c0_34 = arith.constant 0 : index
    %c512 = arith.constant 512 : index
    %16 = vector.load %arg9[%c0_33, %c0_34, %c512] : memref<8x8x1152xbf16, #tpu.memory_space<vmem>>, vector<8x8x128xbf16>
    tpu.vector_store %arg9[%c0_33, %c0_34, %c512], %15 {strides = array<i32>} : memref<8x8x1152xbf16, #tpu.memory_space<vmem>>, vector<8x8x128xbf16>,
    %c1_35 = arith.constant 1 : index
    %c9_36 = arith.constant 9 : index
    %c0_37 = arith.constant 0 : index
    %17 = vector.load %arg7[%c1_35, %c9_36, %c0_37] : memref<10x17x128xbf16, #tpu.memory_space<vmem>>, vector<8x8x128xbf16>
    %c0_38 = arith.constant 0 : index
    %c0_39 = arith.constant 0 : index
    %c640 = arith.constant 640 : index
    %18 = vector.load %arg9[%c0_38, %c0_39, %c640] : memref<8x8x1152xbf16, #tpu.memory_space<vmem>>, vector<8x8x128xbf16>
    tpu.vector_store %arg9[%c0_38, %c0_39, %c640], %17 {strides = array<i32>} : memref<8x8x1152xbf16, #tpu.memory_space<vmem>>, vector<8x8x128xbf16>,
    %c2 = arith.constant 2 : index
    %c7_40 = arith.constant 7 : index
    %c0_41 = arith.constant 0 : index
    %19 = vector.load %arg7[%c2, %c7_40, %c0_41] : memref<10x17x128xbf16, #tpu.memory_space<vmem>>, vector<8x8x128xbf16>
    %c0_42 = arith.constant 0 : index
    %c0_43 = arith.constant 0 : index
    %c768 = arith.constant 768 : index
    %20 = vector.load %arg9[%c0_42, %c0_43, %c768] : memref<8x8x1152xbf16, #tpu.memory_space<vmem>>, vector<8x8x128xbf16>
    tpu.vector_store %arg9[%c0_42, %c0_43, %c768], %19 {strides = array<i32>} : memref<8x8x1152xbf16, #tpu.memory_space<vmem>>, vector<8x8x128xbf16>,
    %c2_44 = arith.constant 2 : index
    %c8_45 = arith.constant 8 : index
    %c0_46 = arith.constant 0 : index
    %21 = vector.load %arg7[%c2_44, %c8_45, %c0_46] : memref<10x17x128xbf16, #tpu.memory_space<vmem>>, vector<8x8x128xbf16>
    %c0_47 = arith.constant 0 : index
    %c0_48 = arith.constant 0 : index
    %c896 = arith.constant 896 : index
    %22 = vector.load %arg9[%c0_47, %c0_48, %c896] : memref<8x8x1152xbf16, #tpu.memory_space<vmem>>, vector<8x8x128xbf16>
    tpu.vector_store %arg9[%c0_47, %c0_48, %c896], %21 {strides = array<i32>} : memref<8x8x1152xbf16, #tpu.memory_space<vmem>>, vector<8x8x128xbf16>,
    %c2_49 = arith.constant 2 : index
    %c9_50 = arith.constant 9 : index
    %c0_51 = arith.constant 0 : index
    %23 = vector.load %arg7[%c2_49, %c9_50, %c0_51] : memref<10x17x128xbf16, #tpu.memory_space<vmem>>, vector<8x8x128xbf16>
    %c0_52 = arith.constant 0 : index
    %c0_53 = arith.constant 0 : index
    %c1024 = arith.constant 1024 : index
    %24 = vector.load %arg9[%c0_52, %c0_53, %c1024] : memref<8x8x1152xbf16, #tpu.memory_space<vmem>>, vector<8x8x128xbf16>
    tpu.vector_store %arg9[%c0_52, %c0_53, %c1024], %23 {strides = array<i32>} : memref<8x8x1152xbf16, #tpu.memory_space<vmem>>, vector<8x8x128xbf16>,
    %c0_54 = arith.constant 0 : index
    %c0_55 = arith.constant 0 : index
    %c0_56 = arith.constant 0 : index
    %25 = vector.load %arg9[%c0_54, %c0_55, %c0_56] : memref<8x8x1152xbf16, #tpu.memory_space<vmem>>, vector<8x8x1152xbf16>
    %26 = vector.shape_cast %25 : vector<8x8x1152xbf16> to vector<64x1152xbf16>
    %c0_57 = arith.constant 0 : index
    %c0_58 = arith.constant 0 : index
    %27 = vector.load %arg2[%c0_57, %c0_58] : memref<1152x128xbf16, #tpu.memory_space<vmem>>, vector<1152x128xbf16>
    %cst_59 = arith.constant dense<0.000000e+00> : vector<64x128xf32>
    %28 = tpu.matmul %26, %27, %cst_59 {dimension_numbers = #tpu.dot_dimension_numbers<[1], [0], [0], [1], [0, 0, 1, 1], [], []>} : vector<64x1152xbf16>, vector<1152x128xbf16>, vector<64x128xf32> -> vector<64x128xf32>
    %c0_60 = arith.constant 0 : index
    %c0_61 = arith.constant 0 : index
    %29 = vector.load %arg3[%c0_60, %c0_61] : memref<1x128xf32, #tpu.memory_space<vmem>>, vector<1x128xf32>
    %30 = vector.broadcast %29 : vector<1x128xf32> to vector<64x128xf32>
    %31 = arith.addf %28, %30 : vector<64x128xf32>
    %cst_62 = arith.constant 0.000000e+00 : f32
    %32 = vector.broadcast %cst_62 : f32 to vector<64x128xf32>
    %33 = arith.maximumf %31, %32 : vector<64x128xf32>
    %34 = vector.shape_cast %33 : vector<64x128xf32> to vector<8x8x128xf32>
    %35 = arith.truncf %34 : vector<8x8x128xf32> to vector<8x8x128xbf16>
    %c1_63 = arith.constant 1 : index
    %c8_64 = arith.constant 8 : index
    %c0_65 = arith.constant 0 : index
    %36 = vector.load %arg8[%c1_63, %c8_64, %c0_65] : memref<10x17x128xbf16, #tpu.memory_space<vmem>>, vector<8x8x128xbf16>
    tpu.vector_store %arg8[%c1_63, %c8_64, %c0_65], %35 {strides = array<i32>} : memref<10x17x128xbf16, #tpu.memory_space<vmem>>, vector<8x8x128xbf16>,
    %c0_66 = arith.constant 0 : index
    %c7_67 = arith.constant 7 : index
    %c0_68 = arith.constant 0 : index
    %37 = vector.load %arg8[%c0_66, %c7_67, %c0_68] : memref<10x17x128xbf16, #tpu.memory_space<vmem>>, vector<8x8x128xbf16>
    %c0_69 = arith.constant 0 : index
    %c0_70 = arith.constant 0 : index
    %c0_71 = arith.constant 0 : index
    %38 = vector.load %arg9[%c0_69, %c0_70, %c0_71] : memref<8x8x1152xbf16, #tpu.memory_space<vmem>>, vector<8x8x128xbf16>
    tpu.vector_store %arg9[%c0_69, %c0_70, %c0_71], %37 {strides = array<i32>} : memref<8x8x1152xbf16, #tpu.memory_space<vmem>>, vector<8x8x128xbf16>,
    %c0_72 = arith.constant 0 : index
    %c8_73 = arith.constant 8 : index
    %c0_74 = arith.constant 0 : index
    %39 = vector.load %arg8[%c0_72, %c8_73, %c0_74] : memref<10x17x128xbf16, #tpu.memory_space<vmem>>, vector<8x8x128xbf16>
    %c0_75 = arith.constant 0 : index
    %c0_76 = arith.constant 0 : index
    %c128_77 = arith.constant 128 : index
    %40 = vector.load %arg9[%c0_75, %c0_76, %c128_77] : memref<8x8x1152xbf16, #tpu.memory_space<vmem>>, vector<8x8x128xbf16>
    tpu.vector_store %arg9[%c0_75, %c0_76, %c128_77], %39 {strides = array<i32>} : memref<8x8x1152xbf16, #tpu.memory_space<vmem>>, vector<8x8x128xbf16>,
    %c0_78 = arith.constant 0 : index
    %c9_79 = arith.constant 9 : index
    %c0_80 = arith.constant 0 : index
    %41 = vector.load %arg8[%c0_78, %c9_79, %c0_80] : memref<10x17x128xbf16, #tpu.memory_space<vmem>>, vector<8x8x128xbf16>
    %c0_81 = arith.constant 0 : index
    %c0_82 = arith.constant 0 : index
    %c256_83 = arith.constant 256 : index
    %42 = vector.load %arg9[%c0_81, %c0_82, %c256_83] : memref<8x8x1152xbf16, #tpu.memory_space<vmem>>, vector<8x8x128xbf16>
    tpu.vector_store %arg9[%c0_81, %c0_82, %c256_83], %41 {strides = array<i32>} : memref<8x8x1152xbf16, #tpu.memory_space<vmem>>, vector<8x8x128xbf16>,
    %c1_84 = arith.constant 1 : index
    %c7_85 = arith.constant 7 : index
    %c0_86 = arith.constant 0 : index
    %43 = vector.load %arg8[%c1_84, %c7_85, %c0_86] : memref<10x17x128xbf16, #tpu.memory_space<vmem>>, vector<8x8x128xbf16>
    %c0_87 = arith.constant 0 : index
    %c0_88 = arith.constant 0 : index
    %c384_89 = arith.constant 384 : index
    %44 = vector.load %arg9[%c0_87, %c0_88, %c384_89] : memref<8x8x1152xbf16, #tpu.memory_space<vmem>>, vector<8x8x128xbf16>
    tpu.vector_store %arg9[%c0_87, %c0_88, %c384_89], %43 {strides = array<i32>} : memref<8x8x1152xbf16, #tpu.memory_space<vmem>>, vector<8x8x128xbf16>,
    %c1_90 = arith.constant 1 : index
    %c8_91 = arith.constant 8 : index
    %c0_92 = arith.constant 0 : index
    %45 = vector.load %arg8[%c1_90, %c8_91, %c0_92] : memref<10x17x128xbf16, #tpu.memory_space<vmem>>, vector<8x8x128xbf16>
    %c0_93 = arith.constant 0 : index
    %c0_94 = arith.constant 0 : index
    %c512_95 = arith.constant 512 : index
    %46 = vector.load %arg9[%c0_93, %c0_94, %c512_95] : memref<8x8x1152xbf16, #tpu.memory_space<vmem>>, vector<8x8x128xbf16>
    tpu.vector_store %arg9[%c0_93, %c0_94, %c512_95], %45 {strides = array<i32>} : memref<8x8x1152xbf16, #tpu.memory_space<vmem>>, vector<8x8x128xbf16>,
    %c1_96 = arith.constant 1 : index
    %c9_97 = arith.constant 9 : index
    %c0_98 = arith.constant 0 : index
    %47 = vector.load %arg8[%c1_96, %c9_97, %c0_98] : memref<10x17x128xbf16, #tpu.memory_space<vmem>>, vector<8x8x128xbf16>
    %c0_99 = arith.constant 0 : index
    %c0_100 = arith.constant 0 : index
    %c640_101 = arith.constant 640 : index
    %48 = vector.load %arg9[%c0_99, %c0_100, %c640_101] : memref<8x8x1152xbf16, #tpu.memory_space<vmem>>, vector<8x8x128xbf16>
    tpu.vector_store %arg9[%c0_99, %c0_100, %c640_101], %47 {strides = array<i32>} : memref<8x8x1152xbf16, #tpu.memory_space<vmem>>, vector<8x8x128xbf16>,
    %c2_102 = arith.constant 2 : index
    %c7_103 = arith.constant 7 : index
    %c0_104 = arith.constant 0 : index
    %49 = vector.load %arg8[%c2_102, %c7_103, %c0_104] : memref<10x17x128xbf16, #tpu.memory_space<vmem>>, vector<8x8x128xbf16>
    %c0_105 = arith.constant 0 : index
    %c0_106 = arith.constant 0 : index
    %c768_107 = arith.constant 768 : index
    %50 = vector.load %arg9[%c0_105, %c0_106, %c768_107] : memref<8x8x1152xbf16, #tpu.memory_space<vmem>>, vector<8x8x128xbf16>
    tpu.vector_store %arg9[%c0_105, %c0_106, %c768_107], %49 {strides = array<i32>} : memref<8x8x1152xbf16, #tpu.memory_space<vmem>>, vector<8x8x128xbf16>,
    %c2_108 = arith.constant 2 : index
    %c8_109 = arith.constant 8 : index
    %c0_110 = arith.constant 0 : index
    %51 = vector.load %arg8[%c2_108, %c8_109, %c0_110] : memref<10x17x128xbf16, #tpu.memory_space<vmem>>, vector<8x8x128xbf16>
    %c0_111 = arith.constant 0 : index
    %c0_112 = arith.constant 0 : index
    %c896_113 = arith.constant 896 : index
    %52 = vector.load %arg9[%c0_111, %c0_112, %c896_113] : memref<8x8x1152xbf16, #tpu.memory_space<vmem>>, vector<8x8x128xbf16>
    tpu.vector_store %arg9[%c0_111, %c0_112, %c896_113], %51 {strides = array<i32>} : memref<8x8x1152xbf16, #tpu.memory_space<vmem>>, vector<8x8x128xbf16>,
    %c2_114 = arith.constant 2 : index
    %c9_115 = arith.constant 9 : index
    %c0_116 = arith.constant 0 : index
    %53 = vector.load %arg8[%c2_114, %c9_115, %c0_116] : memref<10x17x128xbf16, #tpu.memory_space<vmem>>, vector<8x8x128xbf16>
    %c0_117 = arith.constant 0 : index
    %c0_118 = arith.constant 0 : index
    %c1024_119 = arith.constant 1024 : index
    %54 = vector.load %arg9[%c0_117, %c0_118, %c1024_119] : memref<8x8x1152xbf16, #tpu.memory_space<vmem>>, vector<8x8x128xbf16>
    tpu.vector_store %arg9[%c0_117, %c0_118, %c1024_119], %53 {strides = array<i32>} : memref<8x8x1152xbf16, #tpu.memory_space<vmem>>, vector<8x8x128xbf16>,
    %c0_120 = arith.constant 0 : index
    %c0_121 = arith.constant 0 : index
    %c0_122 = arith.constant 0 : index
    %55 = vector.load %arg9[%c0_120, %c0_121, %c0_122] : memref<8x8x1152xbf16, #tpu.memory_space<vmem>>, vector<8x8x1152xbf16>
    %56 = vector.shape_cast %55 : vector<8x8x1152xbf16> to vector<64x1152xbf16>
    %c0_123 = arith.constant 0 : index
    %c0_124 = arith.constant 0 : index
    %57 = vector.load %arg4[%c0_123, %c0_124] : memref<1152x128xbf16, #tpu.memory_space<vmem>>, vector<1152x128xbf16>
    %cst_125 = arith.constant dense<0.000000e+00> : vector<64x128xf32>
    %58 = tpu.matmul %56, %57, %cst_125 {dimension_numbers = #tpu.dot_dimension_numbers<[1], [0], [0], [1], [0, 0, 1, 1], [], []>} : vector<64x1152xbf16>, vector<1152x128xbf16>, vector<64x128xf32> -> vector<64x128xf32>
    %c0_126 = arith.constant 0 : index
    %c0_127 = arith.constant 0 : index
    %59 = vector.load %arg5[%c0_126, %c0_127] : memref<1x128xf32, #tpu.memory_space<vmem>>, vector<1x128xf32>
    %60 = vector.broadcast %59 : vector<1x128xf32> to vector<64x128xf32>
    %61 = arith.addf %58, %60 : vector<64x128xf32>
    %cst_128 = arith.constant 0.000000e+00 : f32
    %62 = vector.broadcast %cst_128 : f32 to vector<64x128xf32>
    %63 = arith.maximumf %61, %62 : vector<64x128xf32>
    %64 = vector.shape_cast %63 : vector<64x128xf32> to vector<8x8x128xf32>
    %65 = arith.truncf %64 : vector<8x8x128xf32> to vector<8x8x128xbf16>
    %c0_129 = arith.constant 0 : index
    %c0_130 = arith.constant 0 : index
    %c0_131 = arith.constant 0 : index
    %c0_132 = arith.constant 0 : index
    %66 = vector.load %arg6[%c0_129, %c0_130, %c0_131, %c0_132] : memref<1x8x8x128xbf16, #tpu.memory_space<vmem>>, vector<1x8x8x128xbf16>
    %67 = vector.shape_cast %66 : vector<1x8x8x128xbf16> to vector<8x8x128xbf16>
    %68 = vector.shape_cast %65 : vector<8x8x128xbf16> to vector<1x8x8x128xbf16>
    tpu.vector_store %arg6[%c0_129, %c0_130, %c0_131, %c0_132], %68 {strides = array<i32>} : memref<1x8x8x128xbf16, #tpu.memory_space<vmem>>, vector<1x8x8x128xbf16>,
    return
  }
  func.func @transform_0(%arg0: i32) -> (i32, i32, i32, i32) {
    %c0_i32 = arith.constant 0 : i32
    %c0_i32_0 = arith.constant 0 : i32
    %c0_i32_1 = arith.constant 0 : i32
    %c0_i32_2 = arith.constant 0 : i32
    return %arg0, %c0_i32, %c0_i32_0, %c0_i32_1 : i32, i32, i32, i32
  }
  func.func @transform_1(%arg0: i32) -> (i32, i32) {
    %c0_i32 = arith.constant 0 : i32
    %c0_i32_0 = arith.constant 0 : i32
    %c0_i32_1 = arith.constant 0 : i32
    return %c0_i32, %c0_i32_0 : i32, i32
  }
  func.func @transform_2(%arg0: i32) -> (i32, i32) {
    %c0_i32 = arith.constant 0 : i32
    %c0_i32_0 = arith.constant 0 : i32
    %c0_i32_1 = arith.constant 0 : i32
    return %c0_i32, %c0_i32_0 : i32, i32
  }
  func.func @transform_3(%arg0: i32) -> (i32, i32) {
    %c0_i32 = arith.constant 0 : i32
    %c0_i32_0 = arith.constant 0 : i32
    %c0_i32_1 = arith.constant 0 : i32
    return %c0_i32, %c0_i32_0 : i32, i32
  }
  func.func @transform_4(%arg0: i32) -> (i32, i32) {
    %c0_i32 = arith.constant 0 : i32
    %c0_i32_0 = arith.constant 0 : i32
    %c0_i32_1 = arith.constant 0 : i32
    return %c0_i32, %c0_i32_0 : i32, i32
  }
  func.func @transform_5(%arg0: i32) -> (i32, i32, i32, i32) {
    %c0_i32 = arith.constant 0 : i32
    %c0_i32_0 = arith.constant 0 : i32
    %c0_i32_1 = arith.constant 0 : i32
    %c0_i32_2 = arith.constant 0 : i32
    return %arg0, %c0_i32, %c0_i32_0, %c0_i32_1 : i32, i32, i32, i32
  }
}

module attributes {stable_mosaic.version = 11 : i64} {
  func.func @_matmul_shift_kernel(%arg0: i32, %arg1: memref<8x2048xbf16, #tpu.memory_space<vmem>>, %arg2: memref<2048x128xbf16, #tpu.memory_space<vmem>>, %arg3: memref<1x128xf32, #tpu.memory_space<vmem>>, %arg4: memref<8x128xf32, #tpu.memory_space<vmem>>) attributes {dimension_semantics = [#tpu.dimension_semantics<parallel>], iteration_bounds = array<i64: 1>, scalar_prefetch = 0 : i64, scratch_operands = 0 : i64, tpu.core_type = #tpu.core_type<tc>, window_params = [{transform_indices = @transform_0, window_bounds = array<i64: 8, 2048>}, {pipeline_mode = #tpu.pipeline_mode<synchronous>, transform_indices = @transform_1, window_bounds = array<i64: 2048, 128>}, {pipeline_mode = #tpu.pipeline_mode<synchronous>, transform_indices = @transform_2, window_bounds = array<i64: 1, 128>}, {transform_indices = @transform_3, window_bounds = array<i64: 8, 128>}]} {
    %c0 = arith.constant 0 : index
    %c0_0 = arith.constant 0 : index
    %0 = vector.load %arg1[%c0, %c0_0] : memref<8x2048xbf16, #tpu.memory_space<vmem>>, vector<8x2048xbf16>
    %c0_1 = arith.constant 0 : index
    %c0_2 = arith.constant 0 : index
    %1 = vector.load %arg2[%c0_1, %c0_2] : memref<2048x128xbf16, #tpu.memory_space<vmem>>, vector<2048x128xbf16>
    %cst = arith.constant dense<0.000000e+00> : vector<8x128xf32>
    %2 = tpu.matmul %0, %1, %cst {dimension_numbers = #tpu.dot_dimension_numbers<[1], [0], [0], [1], [0, 0, 1, 1], [], []>} : vector<8x2048xbf16>, vector<2048x128xbf16>, vector<8x128xf32> -> vector<8x128xf32>
    %c0_3 = arith.constant 0 : index
    %c0_4 = arith.constant 0 : index
    %3 = vector.load %arg3[%c0_3, %c0_4] : memref<1x128xf32, #tpu.memory_space<vmem>>, vector<1x128xf32>
    %4 = vector.broadcast %3 : vector<1x128xf32> to vector<8x128xf32>
    %5 = arith.addf %2, %4 : vector<8x128xf32>
    %c0_5 = arith.constant 0 : index
    %c0_6 = arith.constant 0 : index
    %6 = vector.load %arg4[%c0_5, %c0_6] : memref<8x128xf32, #tpu.memory_space<vmem>>, vector<8x128xf32>
    tpu.vector_store %arg4[%c0_5, %c0_6], %5 {strides = array<i32>} : memref<8x128xf32, #tpu.memory_space<vmem>>, vector<8x128xf32>,
    return
  }
  func.func @transform_0(%arg0: i32) -> (i32, i32) {
    %c0_i32 = arith.constant 0 : i32
    %c0_i32_0 = arith.constant 0 : i32
    return %arg0, %c0_i32 : i32, i32
  }
  func.func @transform_1(%arg0: i32) -> (i32, i32) {
    %c0_i32 = arith.constant 0 : i32
    %c0_i32_0 = arith.constant 0 : i32
    %c0_i32_1 = arith.constant 0 : i32
    return %c0_i32, %c0_i32_0 : i32, i32
  }
  func.func @transform_2(%arg0: i32) -> (i32, i32) {
    %c0_i32 = arith.constant 0 : i32
    %c0_i32_0 = arith.constant 0 : i32
    %c0_i32_1 = arith.constant 0 : i32
    return %c0_i32, %c0_i32_0 : i32, i32
  }
  func.func @transform_3(%arg0: i32) -> (i32, i32) {
    %c0_i32 = arith.constant 0 : i32
    %c0_i32_0 = arith.constant 0 : i32
    return %arg0, %c0_i32 : i32, i32
  }
}

</mosaic_0001>

<bundles_post_ra>
// kernel: patch_embed4_2_forward.3
= control target key start
LH: loop header
LB: loop body
LE: loop exit
PB: predicated region body
PF: predicated region fallthrough
CT: control target
= control target key end

     0   :  { %s836_s1 = inlined_call_operand.vmem [shape: bf16[256,128], index: 1, kind: input, shape index: {}]   ;;  %s837_s0 = inlined_call_operand.vmem [shape: bf16[128,256], index: 0, kind: input, shape index: {}]   ;;  %s838_s2 = inlined_call_operand.vmem [shape: f32[1,128], index: 2, kind: input, shape index: {}]   ;;  %s839_s3 = inlined_call_operand.vmem [shape: bf16[128,128], index: 3, kind: output, shape index: {}]  }
   0x1   :  { %v635_v0 = vld [vmem:[%s836_s1 + $0x40] sm:$0xff]   ;;  %v637_v2 = vld [vmem:[%s836_s1 + $0x48] sm:$0xff]   ;;  %v639_v4 = vld [vmem:[%s836_s1 + $0x50] sm:$0xff]  }
   0x2   :  { %v636_v1 = vld [vmem:[%s836_s1] sm:$0xff]   ;;  %555 = vmatprep.subr.bf16.mxu0 %v635_v0  ;;  %619 = vmatprep.subr.bf16.mxu1 %v635_v0  ;;  %v638_v3 = vld [vmem:[%s836_s1 + $0x8] sm:$0xff]   ;;  %v640_v5 = vld [vmem:[%s836_s1 + $0x10] sm:$0xff]  }
   0x3   :  { %556 = vmatpush3.bf16.msra.mxu0 %v636_v1  ;;  %627 = vmatpush3.bf16.msra.mxu1 %v636_v1  ;;  %v641_v6 = vld [vmem:[%s836_s1 + $0x58] sm:$0xff]   ;;  %v643_v8 = vld [vmem:[%s836_s1 + $0x60] sm:$0xff]   ;;  %v645_v10 = vld [vmem:[%s836_s1 + $0x68] sm:$0xff]  }
   0x4   :  { %557 = vmatprep.subr.bf16.mxu0 %v637_v2  ;;  %620 = vmatprep.subr.bf16.mxu1 %v637_v2  ;;  %v642_v7 = vld [vmem:[%s836_s1 + $0x18] sm:$0xff]   ;;  %v644_v9 = vld [vmem:[%s836_s1 + $0x20] sm:$0xff]   ;;  %v646_v13 = vld [vmem:[%s836_s1 + $0x28] sm:$0xff]  }
   0x5   :  { %v653_v11 = vld [vmem:[%s837_s0 + $0x4] ss:$8 sps:$4 sm:$0xff]   ;;  %v647_v14 = vld [vmem:[%s836_s1 + $0x70] sm:$0xff]   ;;  %v649_v16 = vld [vmem:[%s836_s1 + $0x78] sm:$0xff]  }
   0x6   :  { %v656_v12 = vld [vmem:[%s837_s0 + $0x44] ss:$8 sps:$4 sm:$0xff]   ;;  %278 = vmatprep.mubr.bf16.mxu0 %v653_v11  ;;  %v648_v15 = vld [vmem:[%s836_s1 + $0x30] sm:$0xff]   ;;  %v650_v17 = vld [vmem:[%s836_s1 + $0x38] sm:$0xff]  }
   0x7   :  { %558 = vmatpush3.bf16.msra.mxu0 %v638_v3  ;;  %628 = vmatpush3.bf16.msra.mxu1 %v638_v3  ;;  %v651_v18 = vld [vmem:[%s837_s0] ss:$8 sps:$4 sm:$0xff]   ;;  %v657_v20 = vld [vmem:[%s837_s0 + $0x14] ss:$8 sps:$4 sm:$0xff]   ;;  %v661_v22 = vld [vmem:[%s837_s0 + $0x10] ss:$8 sps:$4 sm:$0xff]  }
   0x8   :  { %559 = vmatprep.subr.bf16.mxu0 %v639_v4  ;;  %621 = vmatprep.subr.bf16.mxu1 %v639_v4  ;;  %v654_v19 = vld [vmem:[%s837_s0 + $0x40] ss:$8 sps:$4 sm:$0xff]   ;;  %v659_v21 = vld [vmem:[%s837_s0 + $0x54] ss:$8 sps:$4 sm:$0xff]   ;;  %v662_v23 = vld [vmem:[%s837_s0 + $0x50] ss:$8 sps:$4 sm:$0xff]  }
   0x9   :  { %310 = vmatprep.mubr.bf16.mxu1 %v656_v12  ;;  %v663_v24 = vld [vmem:[%s837_s0 + $0x24] ss:$8 sps:$4 sm:$0xff]   ;;  %v667_v26 = vld [vmem:[%s837_s0 + $0x20] ss:$8 sps:$4 sm:$0xff]   ;;  %v669_v28 = vld [vmem:[%s837_s0 + $0x34] ss:$8 sps:$4 sm:$0xff]  }
   0xa   :  { %v665_v25 = vld [vmem:[%s837_s0 + $0x64] ss:$8 sps:$4 sm:$0xff]   ;;  %v668_v27 = vld [vmem:[%s837_s0 + $0x60] ss:$8 sps:$4 sm:$0xff]   ;;  %v671_v29 = vld [vmem:[%s837_s0 + $0x74] ss:$8 sps:$4 sm:$0xff]  }
   0xb   :  { %560 = vmatpush3.bf16.msra.mxu0 %v640_v5  ;;  %629 = vmatpush3.bf16.msra.mxu1 %v640_v5  ;;  %v673_v30 = vld [vmem:[%s837_s0 + $0x30] ss:$8 sps:$4 sm:$0xff]   ;;  %v794_v34 = vld [vmem:[%s838_s2] ss:$0 sm:$0xff] }
   0xc   :  { %561 = vmatprep.subr.bf16.mxu0 %v641_v6  ;;  %622 = vmatprep.subr.bf16.mxu1 %v641_v6  ;;  %v674_v31 = vld [vmem:[%s837_s0 + $0x70] ss:$8 sps:$4 sm:$0xff]  }
   0xf   :  { %562 = vmatpush3.bf16.msra.mxu0 %v642_v7  ;;  %630 = vmatpush3.bf16.msra.mxu1 %v642_v7 }
  0x10   :  { %563 = vmatprep.subr.bf16.mxu0 %v643_v8  ;;  %623 = vmatprep.subr.bf16.mxu1 %v643_v8 }
  0x13   :  { %564 = vmatpush3.bf16.msra.mxu0 %v644_v9  ;;  %631 = vmatpush3.bf16.msra.mxu1 %v644_v9 }
  0x14   :  { %565 = vmatprep.subr.bf16.mxu0 %v645_v10  ;;  %624 = vmatprep.subr.bf16.mxu1 %v645_v10 }
  0x17   :  { %566 = vmatpush3.bf16.msra.mxu0 %v646_v13  ;;  %632 = vmatpush3.bf16.msra.mxu1 %v646_v13 }
  0x18   :  { %567 = vmatprep.subr.bf16.mxu0 %v647_v14  ;;  %625 = vmatprep.subr.bf16.mxu1 %v647_v14 }
  0x1b   :  { %568 = vmatpush3.bf16.msra.mxu0 %v648_v15  ;;  %633 = vmatpush3.bf16.msra.mxu1 %v648_v15 }
  0x1c   :  { %569 = vmatprep.subr.bf16.mxu0 %v649_v16  ;;  %626 = vmatprep.subr.bf16.mxu1 %v649_v16 }
  0x1f   :  { %570 = vmatpush3.bf16.msra.mxu0 %v650_v17  ;;  %634 = vmatpush3.bf16.msra.mxu1 %v650_v17 }
  0x22   :  { %279 = vmatmul.mubr.bf16.vlgmr.msra.gmra.mrb[0].mxu0 %v651_v18  ;;  %311 = vmatmul.mubr.bf16.vlgmr.msra.gmra.mrb[0].mxu1 %v654_v19 }
  0x23   :  { %286 = vmatprep.mubr.bf16.mxu0 %v657_v20  ;;  %318 = vmatprep.mubr.bf16.mxu1 %v659_v21 }
  0x2a   :  { %287 = vmatmul.mubr.bf16.gmra.mrb[4].mxu0 %v661_v22  ;;  %319 = vmatmul.mubr.bf16.gmra.mrb[4].mxu1 %v662_v23 }
  0x2b   :  { %294 = vmatprep.mubr.bf16.mxu0 %v663_v24  ;;  %326 = vmatprep.mubr.bf16.mxu1 %v665_v25 }
  0x32   :  { %295 = vmatmul.mubr.bf16.gmra.mrb[8].mxu0 %v667_v26  ;;  %327 = vmatmul.mubr.bf16.gmra.mrb[8].mxu1 %v668_v27 }
  0x33   :  { %302 = vmatprep.mubr.bf16.mxu0 %v669_v28  ;;  %334 = vmatprep.mubr.bf16.mxu1 %v671_v29 }
  0x3a   :  { %303 = vmatmul.mubr.bf16.gmra.mrb[12].mxu0 %v673_v30  ;;  %335 = vmatmul.mubr.bf16.gmra.mrb[12].mxu1 %v674_v31 }
  0xf5   :  { %v571_v32 = vpop.f32.mrb[0].mxu0  ;;  %v595_v33 = vpop.f32.mrb[0].mxu1 }
  0xf6   :  { %v572_v35 = vpop.f32.mrb[1].mxu0  ;;  %v596_v36 = vpop.f32.mrb[1].mxu1 }
  0xf7   :  { %v573_v37 = vadd.f32 %v572_v35, %v571_v32  ;;  %v597_v38 = vadd.f32 %v596_v36, %v595_v33  ;;  %v574_v39 = vpop.f32.mrb[2].mxu0  ;;  %v598_v40 = vpop.f32.mrb[2].mxu1 }
  0xf8   :  { %v575_v41 = vpop.f32.mrb[3].mxu0  ;;  %v599_v42 = vpop.f32.mrb[3].mxu1 }
  0xf9   :  { %v281_v43 = vadd.f32 %v573_v37, %v794_v34  ;;  %v313_v44 = vadd.f32 %v597_v38, %v794_v34  ;;  %v576_v45 = vadd.f32 %v575_v41, %v574_v39  ;;  %v600_v46 = vadd.f32 %v599_v42, %v598_v40 }
  0xfb   :  { %v284_v47 = vadd.f32 %v576_v45, %v794_v34  ;;  %v316_v48 = vadd.f32 %v600_v46, %v794_v34  ;;  %v343_v49 = vmax.f32 %v281_v43, 0.0  ;;  %v351_v50 = vmax.f32 %v313_v44, 0.0 }
  0xfd   :  { %v344_v51 = vmax.f32 %v284_v47, 0.0  ;;  %v352_v52 = vmax.f32 %v316_v48, 0.0  ;;  %v577_v53 = vpop.f32.mrb[4].mxu0  ;;  %v601_v54 = vpop.f32.mrb[4].mxu1 }
  0xfe   :  { %v578_v55 = vpop.f32.mrb[5].mxu0  ;;  %v602_v56 = vpop.f32.mrb[5].mxu1 }
  0xff   :  { %v511_v57 = vpack.c.bf16 %v344_v51, %v343_v49  ;;  %v531_v58 = vpack.c.bf16 %v352_v52, %v351_v50  ;;  %v579_v59 = vadd.f32 %v578_v55, %v577_v53  ;;  %v603_v60 = vadd.f32 %v602_v56, %v601_v54  ;;  %v580_v61 = vpop.f32.mrb[6].mxu0  ;;  %v604_v62 = vpop.f32.mrb[6].mxu1 }
 0x100   :  { %v581_v63 = vpop.f32.mrb[7].mxu0  ;;  %v605_v0 = vpop.f32.mrb[7].mxu1 }
 0x101   :  { %512 = vst [vmem:[%s839_s3] sm:$0xff] %v511_v57   ;;  %551 = vst [vmem:[%s839_s3 + $0x20] sm:$0xff] %v531_v58   ;;  %v289_v1 = vadd.f32 %v579_v59, %v794_v34  ;;  %v321_v2 = vadd.f32 %v603_v60, %v794_v34  ;;  %v582_v3 = vadd.f32 %v581_v63, %v580_v61 }
 0x102   :  { %v606_v4 = vadd.f32 %v605_v0, %v604_v62 }
 0x103   :  { %v292_v5 = vadd.f32 %v582_v3, %v794_v34  ;;  %v345_v7 = vmax.f32 %v289_v1, 0.0  ;;  %v353_v8 = vmax.f32 %v321_v2, 0.0 }
 0x104   :  { %v324_v6 = vadd.f32 %v606_v4, %v794_v34 }
 0x105   :  { %v346_v9 = vmax.f32 %v292_v5, 0.0  ;;  %v583_v11 = vpop.f32.mrb[8].mxu0  ;;  %v607_v12 = vpop.f32.mrb[8].mxu1 }
 0x106   :  { %v354_v10 = vmax.f32 %v324_v6, 0.0  ;;  %v584_v13 = vpop.f32.mrb[9].mxu0  ;;  %v608_v14 = vpop.f32.mrb[9].mxu1 }
 0x107   :  { %v516_v15 = vpack.c.bf16 %v346_v9, %v345_v7  ;;  %v585_v17 = vadd.f32 %v584_v13, %v583_v11  ;;  %v609_v18 = vadd.f32 %v608_v14, %v607_v12  ;;  %v586_v19 = vpop.f32.mrb[10].mxu0  ;;  %v610_v20 = vpop.f32.mrb[10].mxu1 }
 0x108   :  { %v536_v16 = vpack.c.bf16 %v354_v10, %v353_v8  ;;  %v587_v21 = vpop.f32.mrb[11].mxu0  ;;  %v611_v22 = vpop.f32.mrb[11].mxu1 }
 0x109   :  { %548 = vst [vmem:[%s839_s3 + $0x8] sm:$0xff] %v516_v15   ;;  %v297_v23 = vadd.f32 %v585_v17, %v794_v34  ;;  %v329_v24 = vadd.f32 %v609_v18, %v794_v34  ;;  %v588_v25 = vadd.f32 %v587_v21, %v586_v19  ;;  %v612_v26 = vadd.f32 %v611_v22, %v610_v20 }
 0x10a   :  { %552 = vst [vmem:[%s839_s3 + $0x28] sm:$0xff] %v536_v16  }
 0x10b   :  { %v300_v27 = vadd.f32 %v588_v25, %v794_v34  ;;  %v332_v28 = vadd.f32 %v612_v26, %v794_v34  ;;  %v347_v29 = vmax.f32 %v297_v23, 0.0  ;;  %v355_v30 = vmax.f32 %v329_v24, 0.0 }
 0x10d   :  { %v348_v31 = vmax.f32 %v300_v27, 0.0  ;;  %v356_v32 = vmax.f32 %v332_v28, 0.0  ;;  %v589_v33 = vpop.f32.mrb[12].mxu0  ;;  %v613_v35 = vpop.f32.mrb[12].mxu1 }
 0x10e   :  { %v590_v36 = vpop.f32.mrb[13].mxu0  ;;  %v614_v37 = vpop.f32.mrb[13].mxu1 }
 0x10f   :  { %v521_v38 = vpack.c.bf16 %v348_v31, %v347_v29  ;;  %v541_v39 = vpack.c.bf16 %v356_v32, %v355_v30  ;;  %v591_v40 = vadd.f32 %v590_v36, %v589_v33  ;;  %v615_v41 = vadd.f32 %v614_v37, %v613_v35  ;;  %v592_v42 = vpop.f32.mrb[14].mxu0  ;;  %v616_v43 = vpop.f32.mrb[14].mxu1 }
 0x110   :  { %v593_v44 = vpop.f32.mrb[15].mxu0  ;;  %v617_v45 = vpop.f32.mrb[15].mxu1 }
 0x111   :  { %549 = vst [vmem:[%s839_s3 + $0x10] sm:$0xff] %v521_v38   ;;  %553 = vst [vmem:[%s839_s3 + $0x30] sm:$0xff] %v541_v39   ;;  %v305_v46 = vadd.f32 %v591_v40, %v794_v34  ;;  %v337_v47 = vadd.f32 %v615_v41, %v794_v34  ;;  %v594_v48 = vadd.f32 %v593_v44, %v592_v42 }
 0x112   :  { %v618_v49 = vadd.f32 %v617_v45, %v616_v43 }
 0x113   :  { %v308_v50 = vadd.f32 %v594_v48, %v794_v34  ;;  %v349_v52 = vmax.f32 %v305_v46, 0.0  ;;  %v357_v53 = vmax.f32 %v337_v47, 0.0 }
 0x114   :  { %v340_v51 = vadd.f32 %v618_v49, %v794_v34 }
 0x115   :  { %v350_v54 = vmax.f32 %v308_v50, 0.0 }
 0x116   :  { %v358_v55 = vmax.f32 %v340_v51, 0.0 }
 0x117   :  { %v526_v56 = vpack.c.bf16 %v350_v54, %v349_v52 }
 0x118   :  { %v546_v57 = vpack.c.bf16 %v358_v55, %v357_v53 }
 0x119   :  { %550 = vst [vmem:[%s839_s3 + $0x18] sm:$0xff] %v526_v56  }
 0x11a   :  { %554 = vst [vmem:[%s839_s3 + $0x38] sm:$0xff] %v546_v57  }

// kernel: patch_embed4_2_forward.5
= control target key start
LH: loop header
LB: loop body
LE: loop exit
PB: predicated region body
PF: predicated region fallthrough
CT: control target
= control target key end

     0   :  { %s2380_s0 = inlined_call_operand.vmem [shape: bf16[8,2048], index: 0, kind: input, shape index: {}]   ;;  %s2381_s1 = inlined_call_operand.vmem [shape: bf16[2048,128], index: 1, kind: input, shape index: {}]   ;;  %s2382_s2 = inlined_call_operand.vmem [shape: f32[1,128], index: 2, kind: input, shape index: {}]   ;;  %s2383_s3 = inlined_call_operand.hbm [shape: f32[8,128], index: 3, kind: output, shape index: {}]  }
   0x1   :  { %v1768_v0 = vld [vmem:[%s2381_s1 + $0x40] sm:$0xff]   ;;  %v1772_v4 = vld [vmem:[%s2381_s1 + $0x48] sm:$0xff]   ;;  %v1776_v8 = vld [vmem:[%s2381_s1 + $0x50] sm:$0xff]  }
   0x2   :  { %v1769_v1 = vld [vmem:[%s2381_s1 + $0xc0] sm:$0xff]   ;;  %1591 = vmatprep.subr.bf16.mxu0 %v1768_v0  ;;  %v1773_v5 = vld [vmem:[%s2381_s1 + $0xc8] sm:$0xff]   ;;  %v1777_v9 = vld [vmem:[%s2381_s1 + $0xd0] sm:$0xff]  }
   0x3   :  { %v1770_v2 = vld [vmem:[%s2381_s1] sm:$0xff]   ;;  %1613 = vmatprep.subr.bf16.mxu1 %v1769_v1  ;;  %v1774_v6 = vld [vmem:[%s2381_s1 + $0x8] sm:$0xff]   ;;  %v1778_v10 = vld [vmem:[%s2381_s1 + $0x10] sm:$0xff]  }
   0x4   :  { %v1771_v3 = vld [vmem:[%s2381_s1 + $0x80] sm:$0xff]   ;;  %1592 = vmatpush3.bf16.msra.mxu0 %v1770_v2  ;;  %v1775_v7 = vld [vmem:[%s2381_s1 + $0x88] sm:$0xff]   ;;  %v1779_v11 = vld [vmem:[%s2381_s1 + $0x90] sm:$0xff]  }
   0x5   :  { %1614 = vmatpush3.bf16.msra.mxu1 %v1771_v3  ;;  %1593 = vmatprep.subr.bf16.mxu0 %v1772_v4  ;;  %v1780_v12 = vld [vmem:[%s2381_s1 + $0x58] sm:$0xff]   ;;  %v1784_v16 = vld [vmem:[%s2381_s1 + $0x60] sm:$0xff]   ;;  %v1788_v20 = vld [vmem:[%s2381_s1 + $0x68] sm:$0xff]  }
   0x6   :  { %1615 = vmatprep.subr.bf16.mxu1 %v1773_v5  ;;  %v1781_v13 = vld [vmem:[%s2381_s1 + $0xd8] sm:$0xff]   ;;  %v1785_v17 = vld [vmem:[%s2381_s1 + $0xe0] sm:$0xff]   ;;  %v1789_v21 = vld [vmem:[%s2381_s1 + $0xe8] sm:$0xff]  }
   0x7   :  { %v1782_v14 = vld [vmem:[%s2381_s1 + $0x18] sm:$0xff]   ;;  %v1786_v18 = vld [vmem:[%s2381_s1 + $0x20] sm:$0xff]   ;;  %v1790_v22 = vld [vmem:[%s2381_s1 + $0x28] sm:$0xff]  }
   0x8   :  { %1594 = vmatpush3.bf16.msra.mxu0 %v1774_v6  ;;  %v1783_v15 = vld [vmem:[%s2381_s1 + $0x98] sm:$0xff]   ;;  %v1787_v19 = vld [vmem:[%s2381_s1 + $0xa0] sm:$0xff]   ;;  %v1791_v23 = vld [vmem:[%s2381_s1 + $0xa8] sm:$0xff]  }
   0x9   :  { %1616 = vmatpush3.bf16.msra.mxu1 %v1775_v7  ;;  %1595 = vmatprep.subr.bf16.mxu0 %v1776_v8  ;;  %v1792_v24 = vld [vmem:[%s2381_s1 + $0x70] sm:$0xff]   ;;  %v1796_v28 = vld [vmem:[%s2381_s1 + $0x78] sm:$0xff]   ;;  %v16_v32 = vld [vmem:[%s2380_s0] sm:$0xff] }
   0xa   :  { %1617 = vmatprep.subr.bf16.mxu1 %v1777_v9  ;;  %v1793_v25 = vld [vmem:[%s2381_s1 + $0xf0] sm:$0xff]   ;;  %v1797_v29 = vld [vmem:[%s2381_s1 + $0xf8] sm:$0xff]   ;;  %v17_v33 = vld [vmem:[%s2380_s0 + $0x8] sm:$0xff]  ;;  %v1447_v34 = vcombine.low %v16_v32, %v16_v32  ;;  %v1448_v35 = vcombine.high %v16_v32, %v16_v32 }
   0xb   :  { %v1794_v26 = vld [vmem:[%s2381_s1 + $0x30] sm:$0xff]   ;;  %v1798_v30 = vld [vmem:[%s2381_s1 + $0x38] sm:$0xff]   ;;  %v1449_v36 = vcombine.low %v17_v33, %v17_v33  ;;  %v1450_v37 = vcombine.high %v17_v33, %v17_v33  ;;  %v1804_v38 = vld [vmem:[%s2381_s1 + $0x140] sm:$0xff]  }
   0xc   :  { %1596 = vmatpush3.bf16.msra.mxu0 %v1778_v10  ;;  %v1795_v27 = vld [vmem:[%s2381_s1 + $0xb0] sm:$0xff]   ;;  %v1799_v31 = vld [vmem:[%s2381_s1 + $0xb8] sm:$0xff]   ;;  %v1805_v39 = vld [vmem:[%s2381_s1 + $0x1c0] sm:$0xff]   ;;  %1143 = vmatprep.mubr.bf16.mxu0 %v1448_v35 }
   0xd   :  { %1618 = vmatpush3.bf16.msra.mxu1 %v1779_v11  ;;  %1597 = vmatprep.subr.bf16.mxu0 %v1780_v12  ;;  %v1806_v40 = vld [vmem:[%s2381_s1 + $0x100] sm:$0xff]   ;;  %v1808_v42 = vld [vmem:[%s2381_s1 + $0x148] sm:$0xff]   ;;  %v1812_v46 = vld [vmem:[%s2381_s1 + $0x150] sm:$0xff]  }
   0xe   :  { %1619 = vmatprep.subr.bf16.mxu1 %v1781_v13  ;;  %1183 = vmatprep.mubr.bf16.mxu1 %v1450_v37  ;;  %v1807_v41 = vld [vmem:[%s2381_s1 + $0x180] sm:$0xff]   ;;  %v1809_v43 = vld [vmem:[%s2381_s1 + $0x1c8] sm:$0xff]   ;;  %v1813_v47 = vld [vmem:[%s2381_s1 + $0x1d0] sm:$0xff]  }
   0xf   :  { %v1810_v44 = vld [vmem:[%s2381_s1 + $0x108] sm:$0xff]   ;;  %v1814_v48 = vld [vmem:[%s2381_s1 + $0x110] sm:$0xff]   ;;  %v1816_v50 = vld [vmem:[%s2381_s1 + $0x158] sm:$0xff]  }
  0x10   :  { %1598 = vmatpush3.bf16.msra.mxu0 %v1782_v14  ;;  %v1811_v45 = vld [vmem:[%s2381_s1 + $0x188] sm:$0xff]   ;;  %v1815_v49 = vld [vmem:[%s2381_s1 + $0x190] sm:$0xff]   ;;  %v1817_v51 = vld [vmem:[%s2381_s1 + $0x1d8] sm:$0xff]  }
  0x11   :  { %1620 = vmatpush3.bf16.msra.mxu1 %v1783_v15  ;;  %1599 = vmatprep.subr.bf16.mxu0 %v1784_v16  ;;  %v1818_v52 = vld [vmem:[%s2381_s1 + $0x118] sm:$0xff]   ;;  %v1820_v54 = vld [vmem:[%s2381_s1 + $0x160] sm:$0xff]   ;;  %v1824_v58 = vld [vmem:[%s2381_s1 + $0x168] sm:$0xff]  }
  0x12   :  { %1621 = vmatprep.subr.bf16.mxu1 %v1785_v17  ;;  %v1819_v53 = vld [vmem:[%s2381_s1 + $0x198] sm:$0xff]   ;;  %v1821_v55 = vld [vmem:[%s2381_s1 + $0x1e0] sm:$0xff]   ;;  %v1825_v59 = vld [vmem:[%s2381_s1 + $0x1e8] sm:$0xff]  }
  0x13   :  { %v1822_v56 = vld [vmem:[%s2381_s1 + $0x120] sm:$0xff]   ;;  %v1826_v60 = vld [vmem:[%s2381_s1 + $0x128] sm:$0xff]   ;;  %v1828_v62 = vld [vmem:[%s2381_s1 + $0x170] sm:$0xff]  }
  0x14   :  { %1600 = vmatpush3.bf16.msra.mxu0 %v1786_v18  ;;  %v1823_v57 = vld [vmem:[%s2381_s1 + $0x1a0] sm:$0xff]   ;;  %v1827_v61 = vld [vmem:[%s2381_s1 + $0x1a8] sm:$0xff]   ;;  %v1829_v63 = vld [vmem:[%s2381_s1 + $0x1f0] sm:$0xff]  }
  0x15   :  { %1622 = vmatpush3.bf16.msra.mxu1 %v1787_v19  ;;  %1601 = vmatprep.subr.bf16.mxu0 %v1788_v20  ;;  %v1830_v0 = vld [vmem:[%s2381_s1 + $0x130] sm:$0xff]   ;;  %v1832_v2 = vld [vmem:[%s2381_s1 + $0x178] sm:$0xff]   ;;  %v1840_v12 = vld [vmem:[%s2381_s1 + $0x240] sm:$0xff]  }
  0x16   :  { %1623 = vmatprep.subr.bf16.mxu1 %v1789_v21  ;;  %v1831_v1 = vld [vmem:[%s2381_s1 + $0x1b0] sm:$0xff]   ;;  %v1833_v3 = vld [vmem:[%s2381_s1 + $0x1f8] sm:$0xff]   ;;  %v1841_v13 = vld [vmem:[%s2381_s1 + $0x2c0] sm:$0xff]  }
  0x17   :  { %v1834_v4 = vld [vmem:[%s2381_s1 + $0x138] sm:$0xff]   ;;  %v18_v6 = vld [vmem:[%s2380_s0 + $0x10] sm:$0xff]  ;;  %v1842_v14 = vld [vmem:[%s2381_s1 + $0x200] sm:$0xff]  }
  0x18   :  { %1602 = vmatpush3.bf16.msra.mxu0 %v1790_v22  ;;  %v1835_v5 = vld [vmem:[%s2381_s1 + $0x1b8] sm:$0xff]   ;;  %v1451_v7 = vcombine.low %v18_v6, %v18_v6  ;;  %v1452_v8 = vcombine.high %v18_v6, %v18_v6  ;;  %v1843_v15 = vld [vmem:[%s2381_s1 + $0x280] sm:$0xff]   ;;  %v1844_v16 = vld [vmem:[%s2381_s1 + $0x248] sm:$0xff]  }
  0x19   :  { %1624 = vmatpush3.bf16.msra.mxu1 %v1791_v23  ;;  %1603 = vmatprep.subr.bf16.mxu0 %v1792_v24  ;;  %v19_v9 = vld [vmem:[%s2380_s0 + $0x18] sm:$0xff]  ;;  %v1845_v17 = vld [vmem:[%s2381_s1 + $0x2c8] sm:$0xff]   ;;  %v1848_v20 = vld [vmem:[%s2381_s1 + $0x250] sm:$0xff]  }
  0x1a   :  { %1625 = vmatprep.subr.bf16.mxu1 %v1793_v25  ;;  %v1453_v10 = vcombine.low %v19_v9, %v19_v9  ;;  %v1454_v11 = vcombine.high %v19_v9, %v19_v9  ;;  %v1846_v18 = vld [vmem:[%s2381_s1 + $0x208] sm:$0xff]   ;;  %v1849_v21 = vld [vmem:[%s2381_s1 + $0x2d0] sm:$0xff]   ;;  %v1852_v24 = vld [vmem:[%s2381_s1 + $0x258] sm:$0xff]  }
  0x1b   :  { %v1847_v19 = vld [vmem:[%s2381_s1 + $0x288] sm:$0xff]   ;;  %v1850_v22 = vld [vmem:[%s2381_s1 + $0x210] sm:$0xff]   ;;  %v1853_v25 = vld [vmem:[%s2381_s1 + $0x2d8] sm:$0xff]  }
  0x1c   :  { %1604 = vmatpush3.bf16.msra.mxu0 %v1794_v26  ;;  %v1851_v23 = vld [vmem:[%s2381_s1 + $0x290] sm:$0xff]   ;;  %v1854_v26 = vld [vmem:[%s2381_s1 + $0x218] sm:$0xff]   ;;  %v1860_v32 = vld [vmem:[%s2381_s1 + $0x268] sm:$0xff]  }
  0x1d   :  { %1626 = vmatpush3.bf16.msra.mxu1 %v1795_v27  ;;  %1605 = vmatprep.subr.bf16.mxu0 %v1796_v28  ;;  %v1855_v27 = vld [vmem:[%s2381_s1 + $0x298] sm:$0xff]   ;;  %v1856_v28 = vld [vmem:[%s2381_s1 + $0x260] sm:$0xff]   ;;  %v1861_v33 = vld [vmem:[%s2381_s1 + $0x2e8] sm:$0xff]  }
  0x1e   :  { %1627 = vmatprep.subr.bf16.mxu1 %v1797_v29  ;;  %v1857_v29 = vld [vmem:[%s2381_s1 + $0x2e0] sm:$0xff]   ;;  %v1863_v35 = vld [vmem:[%s2381_s1 + $0x2a8] sm:$0xff]   ;;  %v1865_v37 = vld [vmem:[%s2381_s1 + $0x2f0] sm:$0xff]  }
  0x1f   :  { %v1896_v6 = vld [vmem:[%s2381_s1 + $0x368] sm:$0xff]  }
  0x20   :  { %1606 = vmatpush3.bf16.msra.mxu0 %v1798_v30  ;;  %v1858_v30 = vld [vmem:[%s2381_s1 + $0x220] sm:$0xff]   ;;  %v1899_v9 = vld [vmem:[%s2381_s1 + $0x3a8] sm:$0xff]  }
  0x21   :  { %1628 = vmatpush3.bf16.msra.mxu1 %v1799_v31  ;;  %1635 = vmatprep.subr.bf16.mxu0 %v1804_v38  ;;  %v1859_v31 = vld [vmem:[%s2381_s1 + $0x2a0] sm:$0xff]   ;;  %v1866_v38 = vld [vmem:[%s2381_s1 + $0x230] sm:$0xff]  }
  0x22   :  { %1657 = vmatprep.subr.bf16.mxu1 %v1805_v39  ;;  %v1867_v39 = vld [vmem:[%s2381_s1 + $0x2b0] sm:$0xff]  }
  0x23   :  { %1144 = vmatmul.mubr.bf16.vlgmr.msra.gmra.mrb[0].mxu0 %v1447_v34  ;;  %v1862_v34 = vld [vmem:[%s2381_s1 + $0x228] sm:$0xff]  }
  0x24   :  { %1184 = vmatmul.mubr.bf16.vlgmr.msra.gmra.mrb[0].mxu1 %v1449_v36  ;;  %1636 = vmatpush3.bf16.msra.mxu0 %v1806_v40  ;;  %v1864_v36 = vld [vmem:[%s2381_s1 + $0x270] sm:$0xff]   ;;  %v1868_v40 = vld [vmem:[%s2381_s1 + $0x278] sm:$0xff]  }
  0x25   :  { %1658 = vmatpush3.bf16.msra.mxu1 %v1807_v41  ;;  %1637 = vmatprep.subr.bf16.mxu0 %v1808_v42  ;;  %v1869_v41 = vld [vmem:[%s2381_s1 + $0x2f8] sm:$0xff]  }
  0x26   :  { %1659 = vmatprep.subr.bf16.mxu1 %v1809_v43  ;;  %1223 = vmatprep.mubr.bf16.mxu0 %v1452_v8  ;;  %v1870_v42 = vld [vmem:[%s2381_s1 + $0x238] sm:$0xff]   ;;  %v1898_v8 = vld [vmem:[%s2381_s1 + $0x328] sm:$0xff]  }
  0x27   :  { %1263 = vmatprep.mubr.bf16.mxu1 %v1454_v11  ;;  %v1871_v43 = vld [vmem:[%s2381_s1 + $0x2b8] sm:$0xff]   ;;  %v1901_v11 = vld [vmem:[%s2381_s1 + $0x3f0] sm:$0xff]  }
  0x28   :  { %1638 = vmatpush3.bf16.msra.mxu0 %v1810_v44  ;;  %v20_v44 = vld [vmem:[%s2380_s0 + $0x20] sm:$0xff] }
  0x29   :  { %1660 = vmatpush3.bf16.msra.mxu1 %v1811_v45  ;;  %1639 = vmatprep.subr.bf16.mxu0 %v1812_v46  ;;  %v21_v45 = vld [vmem:[%s2380_s0 + $0x28] sm:$0xff]  ;;  %v1455_v46 = vcombine.low %v20_v44, %v20_v44 }
  0x2a   :  { %1661 = vmatprep.subr.bf16.mxu1 %v1813_v47  ;;  %v1456_v47 = vcombine.high %v20_v44, %v20_v44 }
  0x2c   :  { %1640 = vmatpush3.bf16.msra.mxu0 %v1814_v48  ;;  %v1457_v48 = vcombine.low %v21_v45, %v21_v45 }
  0x2d   :  { %1662 = vmatpush3.bf16.msra.mxu1 %v1815_v49  ;;  %1641 = vmatprep.subr.bf16.mxu0 %v1816_v50  ;;  %v1458_v49 = vcombine.high %v21_v45, %v21_v45  ;;  %v1876_v50 = vld [vmem:[%s2381_s1 + $0x340] sm:$0xff]  }
  0x2e   :  { %1663 = vmatprep.subr.bf16.mxu1 %v1817_v51  ;;  %v1877_v51 = vld [vmem:[%s2381_s1 + $0x3c0] sm:$0xff]  }
  0x30   :  { %1642 = vmatpush3.bf16.msra.mxu0 %v1818_v52  ;;  %v1878_v52 = vld [vmem:[%s2381_s1 + $0x300] sm:$0xff]  }
  0x31   :  { %1664 = vmatpush3.bf16.msra.mxu1 %v1819_v53  ;;  %1643 = vmatprep.subr.bf16.mxu0 %v1820_v54  ;;  %v1879_v53 = vld [vmem:[%s2381_s1 + $0x380] sm:$0xff]   ;;  %v1880_v54 = vld [vmem:[%s2381_s1 + $0x348] sm:$0xff]  }
  0x32   :  { %1665 = vmatprep.subr.bf16.mxu1 %v1821_v55  ;;  %v1881_v55 = vld [vmem:[%s2381_s1 + $0x3c8] sm:$0xff]  }
  0x34   :  { %1644 = vmatpush3.bf16.msra.mxu0 %v1822_v56  ;;  %v1882_v56 = vld [vmem:[%s2381_s1 + $0x308] sm:$0xff]  }
  0x35   :  { %1666 = vmatpush3.bf16.msra.mxu1 %v1823_v57  ;;  %1645 = vmatprep.subr.bf16.mxu0 %v1824_v58  ;;  %v1883_v57 = vld [vmem:[%s2381_s1 + $0x388] sm:$0xff]   ;;  %v1884_v58 = vld [vmem:[%s2381_s1 + $0x350] sm:$0xff]  }
  0x36   :  { %1667 = vmatprep.subr.bf16.mxu1 %v1825_v59  ;;  %v1885_v59 = vld [vmem:[%s2381_s1 + $0x3d0] sm:$0xff]  }
  0x38   :  { %1646 = vmatpush3.bf16.msra.mxu0 %v1826_v60  ;;  %v1886_v60 = vld [vmem:[%s2381_s1 + $0x310] sm:$0xff]  }
  0x39   :  { %1668 = vmatpush3.bf16.msra.mxu1 %v1827_v61  ;;  %1647 = vmatprep.subr.bf16.mxu0 %v1828_v62  ;;  %v1887_v61 = vld [vmem:[%s2381_s1 + $0x390] sm:$0xff]   ;;  %v1888_v62 = vld [vmem:[%s2381_s1 + $0x358] sm:$0xff]  }
  0x3a   :  { %1669 = vmatprep.subr.bf16.mxu1 %v1829_v63  ;;  %v1889_v63 = vld [vmem:[%s2381_s1 + $0x3d8] sm:$0xff]  }
  0x3c   :  { %1648 = vmatpush3.bf16.msra.mxu0 %v1830_v0  ;;  %v1890_v0 = vld [vmem:[%s2381_s1 + $0x318] sm:$0xff]  }
  0x3d   :  { %1670 = vmatpush3.bf16.msra.mxu1 %v1831_v1  ;;  %1649 = vmatprep.subr.bf16.mxu0 %v1832_v2  ;;  %v1891_v1 = vld [vmem:[%s2381_s1 + $0x398] sm:$0xff]   ;;  %v1892_v2 = vld [vmem:[%s2381_s1 + $0x360] sm:$0xff]  }
  0x3e   :  { %1671 = vmatprep.subr.bf16.mxu1 %v1833_v3  ;;  %v1893_v3 = vld [vmem:[%s2381_s1 + $0x3e0] sm:$0xff]  }
  0x40   :  { %1650 = vmatpush3.bf16.msra.mxu0 %v1834_v4  ;;  %v1894_v4 = vld [vmem:[%s2381_s1 + $0x320] sm:$0xff]  }
  0x41   :  { %1672 = vmatpush3.bf16.msra.mxu1 %v1835_v5  ;;  %1679 = vmatprep.subr.bf16.mxu0 %v1840_v12  ;;  %v1895_v5 = vld [vmem:[%s2381_s1 + $0x3a0] sm:$0xff]   ;;  %v1902_v12 = vld [vmem:[%s2381_s1 + $0x330] sm:$0xff]  }
  0x42   :  { %1701 = vmatprep.subr.bf16.mxu1 %v1841_v13  ;;  %v1903_v13 = vld [vmem:[%s2381_s1 + $0x3b0] sm:$0xff]  }
  0x43   :  { %1224 = vmatmul.mubr.bf16.vlgmr.msra.gmra.mrb[4].mxu0 %v1451_v7  ;;  %v1897_v7 = vld [vmem:[%s2381_s1 + $0x3e8] sm:$0xff]  }
  0x44   :  { %1264 = vmatmul.mubr.bf16.vlgmr.msra.gmra.mrb[4].mxu1 %v1453_v10  ;;  %1680 = vmatpush3.bf16.msra.mxu0 %v1842_v14  ;;  %v1900_v10 = vld [vmem:[%s2381_s1 + $0x370] sm:$0xff]   ;;  %v1904_v14 = vld [vmem:[%s2381_s1 + $0x378] sm:$0xff]  }
  0x45   :  { %1702 = vmatpush3.bf16.msra.mxu1 %v1843_v15  ;;  %1681 = vmatprep.subr.bf16.mxu0 %v1844_v16  ;;  %v1905_v15 = vld [vmem:[%s2381_s1 + $0x3f8] sm:$0xff]  }
  0x46   :  { %1703 = vmatprep.subr.bf16.mxu1 %v1845_v17  ;;  %1303 = vmatprep.mubr.bf16.mxu0 %v1456_v47  ;;  %v1906_v16 = vld [vmem:[%s2381_s1 + $0x338] sm:$0xff]  }
  0x47   :  { %1343 = vmatprep.mubr.bf16.mxu1 %v1458_v49  ;;  %v1907_v17 = vld [vmem:[%s2381_s1 + $0x3b8] sm:$0xff]  }
  0x48   :  { %1682 = vmatpush3.bf16.msra.mxu0 %v1846_v18  ;;  %v22_v18 = vld [vmem:[%s2380_s0 + $0x30] sm:$0xff] }
  0x49   :  { %1704 = vmatpush3.bf16.msra.mxu1 %v1847_v19  ;;  %1683 = vmatprep.subr.bf16.mxu0 %v1848_v20  ;;  %v23_v19 = vld [vmem:[%s2380_s0 + $0x38] sm:$0xff]  ;;  %v1459_v20 = vcombine.low %v22_v18, %v22_v18 }
  0x4a   :  { %1705 = vmatprep.subr.bf16.mxu1 %v1849_v21  ;;  %v1460_v21 = vcombine.high %v22_v18, %v22_v18 }
  0x4c   :  { %1684 = vmatpush3.bf16.msra.mxu0 %v1850_v22  ;;  %v1461_v22 = vcombine.low %v23_v19, %v23_v19 }
  0x4d   :  { %1706 = vmatpush3.bf16.msra.mxu1 %v1851_v23  ;;  %1685 = vmatprep.subr.bf16.mxu0 %v1852_v24 }
  0x4e   :  { %1707 = vmatprep.subr.bf16.mxu1 %v1853_v25 }
  0x50   :  { %1686 = vmatpush3.bf16.msra.mxu0 %v1854_v26 }
  0x51   :  { %1708 = vmatpush3.bf16.msra.mxu1 %v1855_v27  ;;  %1687 = vmatprep.subr.bf16.mxu0 %v1856_v28 }
  0x52   :  { %1709 = vmatprep.subr.bf16.mxu1 %v1857_v29 }
  0x54   :  { %1688 = vmatpush3.bf16.msra.mxu0 %v1858_v30 }
  0x55   :  { %1710 = vmatpush3.bf16.msra.mxu1 %v1859_v31  ;;  %1689 = vmatprep.subr.bf16.mxu0 %v1860_v32 }
  0x56   :  { %1711 = vmatprep.subr.bf16.mxu1 %v1861_v33 }
  0x58   :  { %1690 = vmatpush3.bf16.msra.mxu0 %v1862_v34 }
  0x59   :  { %1712 = vmatpush3.bf16.msra.mxu1 %v1863_v35  ;;  %1691 = vmatprep.subr.bf16.mxu0 %v1864_v36 }
  0x5a   :  { %1713 = vmatprep.subr.bf16.mxu1 %v1865_v37 }
  0x5c   :  { %1692 = vmatpush3.bf16.msra.mxu0 %v1866_v38 }
  0x5d   :  { %1714 = vmatpush3.bf16.msra.mxu1 %v1867_v39  ;;  %1693 = vmatprep.subr.bf16.mxu0 %v1868_v40 }
  0x5e   :  { %1715 = vmatprep.subr.bf16.mxu1 %v1869_v41 }
  0x60   :  { %1694 = vmatpush3.bf16.msra.mxu0 %v1870_v42 }
  0x61   :  { %1716 = vmatpush3.bf16.msra.mxu1 %v1871_v43  ;;  %1723 = vmatprep.subr.bf16.mxu0 %v1876_v50 }
  0x62   :  { %1745 = vmatprep.subr.bf16.mxu1 %v1877_v51 }
  0x63   :  { %1304 = vmatmul.mubr.bf16.vlgmr.msra.gmra.mrb[8].mxu0 %v1455_v46 }
  0x64   :  { %1344 = vmatmul.mubr.bf16.vlgmr.msra.gmra.mrb[8].mxu1 %v1457_v48  ;;  %1724 = vmatpush3.bf16.msra.mxu0 %v1878_v52 }
  0x65   :  { %1746 = vmatpush3.bf16.msra.mxu1 %v1879_v53  ;;  %1725 = vmatprep.subr.bf16.mxu0 %v1880_v54 }
  0x66   :  { %1747 = vmatprep.subr.bf16.mxu1 %v1881_v55 }
  0x68   :  { %1726 = vmatpush3.bf16.msra.mxu0 %v1882_v56 }
  0x69   :  { %1748 = vmatpush3.bf16.msra.mxu1 %v1883_v57  ;;  %1727 = vmatprep.subr.bf16.mxu0 %v1884_v58 }
  0x6a   :  { %1749 = vmatprep.subr.bf16.mxu1 %v1885_v59 }
  0x6c   :  { %1728 = vmatpush3.bf16.msra.mxu0 %v1886_v60 }
  0x6d   :  { %1750 = vmatpush3.bf16.msra.mxu1 %v1887_v61  ;;  %1729 = vmatprep.subr.bf16.mxu0 %v1888_v62 }
  0x6e   :  { %1751 = vmatprep.subr.bf16.mxu1 %v1889_v63 }
  0x70   :  { %1730 = vmatpush3.bf16.msra.mxu0 %v1890_v0 }
  0x71   :  { %1752 = vmatpush3.bf16.msra.mxu1 %v1891_v1  ;;  %1731 = vmatprep.subr.bf16.mxu0 %v1892_v2 }
  0x72   :  { %1753 = vmatprep.subr.bf16.mxu1 %v1893_v3 }
  0x74   :  { %1732 = vmatpush3.bf16.msra.mxu0 %v1894_v4 }
  0x75   :  { %1754 = vmatpush3.bf16.msra.mxu1 %v1895_v5  ;;  %1733 = vmatprep.subr.bf16.mxu0 %v1896_v6 }
  0x76   :  { %1755 = vmatprep.subr.bf16.mxu1 %v1897_v7 }
  0x78   :  { %1734 = vmatpush3.bf16.msra.mxu0 %v1898_v8 }
  0x79   :  { %1756 = vmatpush3.bf16.msra.mxu1 %v1899_v9  ;;  %1735 = vmatprep.subr.bf16.mxu0 %v1900_v10 }
  0x7a   :  { %1757 = vmatprep.subr.bf16.mxu1 %v1901_v11 }
  0x7c   :  { %1736 = vmatpush3.bf16.msra.mxu0 %v1902_v12 }
  0x7d   :  { %1758 = vmatpush3.bf16.msra.mxu1 %v1903_v13  ;;  %1737 = vmatprep.subr.bf16.mxu0 %v1904_v14 }
  0x7e   :  { %1759 = vmatprep.subr.bf16.mxu1 %v1905_v15 }
  0x80   :  { %1738 = vmatpush3.bf16.msra.mxu0 %v1906_v16 }
  0x81   :  { %1760 = vmatpush3.bf16.msra.mxu1 %v1907_v17 }
  0x82   :  { %8 = vsyncpa [#allocation3], 0  ;;  %v1462_v23 = vcombine.high %v23_v19, %v23_v19  ;;  %1383 = vmatprep.mubr.bf16.mxu0 %v1460_v21  ;;  %v1446_v26 = vld [vmem:[%s2382_s2] ss:$0 sm:$0xff]  ;;  %s1936_s0 = smov [#allocation2]  }
  0x83   :  { %1384 = vmatmul.mubr.bf16.vlgmr.msra.gmra.mrb[12].mxu0 %v1459_v20  ;;  %s1438_s2 = sshll.u32 %s1936_s0, 4  ;;  %s1439_s2 = int_to_ptr.vmem [resolvable:$true] %s1438_s2 }
  0x84   :  { %1423 = vmatprep.mubr.bf16.mxu1 %v1462_v23  ;;  %s1912_s15 = scalar_lea.vmem %s1439_s2, 128  ;;  %p1917_p1 = scmp.lt.s32.totalorder %s1439_s2, %s1439_s2 }
  0x85   :  { %1424 = vmatmul.mubr.bf16.vlgmr.msra.gmra.mrb[12].mxu1 %v1461_v22  ;;  %p1913_p0 = scmp.ne.s32.totalorder %s1439_s2, %s1912_s15  ;;  %p1918_p2 = scmp.lt.s32.totalorder %s1912_s15, %s1912_s15 }
  0x87   :  { %p1919_p3 = por %p1918_p2, %p1917_p1 }
  0x89   :  { %p1920_p4 = pnand %p1919_p3, %p1913_p0 }
  0xf6   :  { %v1607_v24 = vpop.f32.mrb[0].mxu0 }
  0xf7   :  { %v1629_v25 = vpop.f32.mrb[0].mxu1  ;;  %v1608_v27 = vpop.f32.mrb[1].mxu0 }
  0xf8   :  { %v1630_v28 = vpop.f32.mrb[1].mxu1  ;;  %v1609_v29 = vadd.f32 %v1608_v27, %v1607_v24  ;;  %v1610_v31 = vpop.f32.mrb[2].mxu0 }
  0xf9   :  { %v1631_v30 = vadd.f32 %v1630_v28, %v1629_v25  ;;  %v1632_v32 = vpop.f32.mrb[2].mxu1  ;;  %v1611_v33 = vpop.f32.mrb[3].mxu0 }
  0xfa   :  { %v1633_v34 = vpop.f32.mrb[3].mxu1  ;;  %v1146_v35 = vadd.f32 %v1609_v29, %v1446_v26 }
  0xfc   :  { %v1186_v36 = vadd.f32 %v1631_v30, %v1146_v35 }
 0x116   :  { %v1651_v37 = vpop.f32.mrb[4].mxu0 }
 0x117   :  { %v1673_v38 = vpop.f32.mrb[4].mxu1  ;;  %v1652_v39 = vpop.f32.mrb[5].mxu0 }
 0x118   :  { %v1674_v40 = vpop.f32.mrb[5].mxu1  ;;  %v1653_v41 = vadd.f32 %v1652_v39, %v1651_v37  ;;  %v1654_v43 = vpop.f32.mrb[6].mxu0 }
 0x119   :  { %v1675_v42 = vadd.f32 %v1674_v40, %v1673_v38  ;;  %v1676_v44 = vpop.f32.mrb[6].mxu1  ;;  %v1655_v45 = vpop.f32.mrb[7].mxu0 }
 0x11a   :  { %v1677_v46 = vpop.f32.mrb[7].mxu1  ;;  %v1226_v47 = vadd.f32 %v1653_v41, %v1186_v36 }
 0x11c   :  { %v1266_v48 = vadd.f32 %v1675_v42, %v1226_v47 }
 0x136   :  { %v1695_v49 = vpop.f32.mrb[8].mxu0 }
 0x137   :  { %v1717_v50 = vpop.f32.mrb[8].mxu1  ;;  %v1696_v51 = vpop.f32.mrb[9].mxu0 }
 0x138   :  { %v1697_v52 = vadd.f32 %v1696_v51, %v1695_v49  ;;  %v1718_v53 = vpop.f32.mrb[9].mxu1  ;;  %v1698_v54 = vpop.f32.mrb[10].mxu0 }
 0x139   :  { %v1719_v55 = vadd.f32 %v1718_v53, %v1717_v50  ;;  %v1720_v56 = vpop.f32.mrb[10].mxu1  ;;  %v1699_v57 = vpop.f32.mrb[11].mxu0 }
 0x13a   :  { %v1306_v58 = vadd.f32 %v1697_v52, %v1266_v48  ;;  %v1721_v59 = vpop.f32.mrb[11].mxu1 }
 0x13c   :  { %v1346_v60 = vadd.f32 %v1719_v55, %v1306_v58 }
 0x156   :  { %v1739_v61 = vpop.f32.mrb[12].mxu0 }
 0x157   :  { %v1740_v63 = vpop.f32.mrb[13].mxu0 }
 0x158   :  { %v1761_v62 = vpop.f32.mrb[12].mxu1  ;;  %v1741_v0 = vadd.f32 %v1740_v63, %v1739_v61  ;;  %v1742_v2 = vpop.f32.mrb[14].mxu0 }
 0x159   :  { %v1762_v1 = vpop.f32.mrb[13].mxu1  ;;  %v1743_v5 = vpop.f32.mrb[15].mxu0 }
 0x15a   :  { %v1763_v3 = vadd.f32 %v1762_v1, %v1761_v62  ;;  %v1764_v4 = vpop.f32.mrb[14].mxu1  ;;  %v1386_v6 = vadd.f32 %v1741_v0, %v1346_v60 }
 0x15b   :  { %v1765_v7 = vpop.f32.mrb[15].mxu1 }
 0x15c   :  { %v1426_v8 = vadd.f32 %v1763_v3, %v1386_v6 }
 0x15e   :  { %1431 = vst [vmem:[#allocation2] sm:$0xff] %v1426_v8 }
 0x15f   :  { %1923 = shalt.err (!%p1920_p4)
}
 0x160   :  { %s1924_s18 = scalar_lea.hbm %s2383_s3, 128 }
 0x161   :  { %p1925_p5 = scmp.ne.s32.totalorder %s2383_s3, %s1924_s18  ;;  %p1928_p6 = scmp.lt.u32.totalorder %s1924_s18, %s2383_s3 }
 0x163   :  { %p1930_p7 = pnand %p1928_p6, %p1925_p5 }
 0x165   :  { %1933 = shalt.err (!%p1930_p7)
}
 0x166   :  { %1441 = dma.vmem_to_hbm [thread:$0]  %s1439_s2, 128, %s2383_s3, [#allocation3]  }
 0x167   :  { %1934 = dma.done.wait [#allocation3], 128  }
 0x168   :  { %1935 = vsyncadd [#allocation3], 4294967168 }
 0x169   :  { %1445 = vsyncpa [#allocation3], 1 }

// kernel: patch_embed4_2_forward.4
= control target key start
LH: loop header
LB: loop body
LE: loop exit
PB: predicated region body
PF: predicated region fallthrough
CT: control target
= control target key end

     0   :  { %s5479_s18 = smov 0   ;;  %s6515_s0 = inlined_call_operand.vmem [shape: bf16[2,8,8,128], index: 0, kind: input, shape index: {}]   ;;  %s6516_s1 = inlined_call_operand.vmem [shape: bf16[1152,128], index: 1, kind: input, shape index: {}]   ;;  %s6517_s2 = inlined_call_operand.vmem [shape: f32[1,128], index: 2, kind: input, shape index: {}]   ;;  %s6518_s3 = inlined_call_operand.vmem [shape: bf16[1152,128], index: 3, kind: input, shape index: {}]   ;;  %s6519_s4 = inlined_call_operand.vmem [shape: f32[1,128], index: 4, kind: input, shape index: {}]   ;;  %s6520_s5 = inlined_call_operand.vmem [shape: bf16[2,8,8,128], index: 5, kind: output, shape index: {}]  }
   0x1 LB: > { %s4497_s19 = sadd.s32 4294967295, %s5446_s18   ;;  %p4501_p0 = scmp.ge.s32.totalorder %s5446_s18, 1  ;;  %s5446_s18 = sphi %s5479_s18, %s15_s18  }
   0x2   : > { %p187_p1 = scmp.lt.s32.totalorder %s5446_s18, 3 }
   0x4   : > { %p188_p2 = pnand %p4501_p0, %p187_p1 }
   0x6   : > { %191 = sbr.rel (%p188_p2) target bundleno = 792 (0x318), region = 40 }
   0xd   : > { %v5200_v0 = vld [vmem:[%s6516_s1 + $0x40] sm:$0xff]   ;;  %v5448_v3 = vmov 0   ;;  %v5204_v5 = vld [vmem:[%s6516_s1 + $0x48] sm:$0xff]   ;;  %v5208_v9 = vld [vmem:[%s6516_s1 + $0x50] sm:$0xff]   ;;  %p215_p3 = scmp.lt.s32.totalorder %s4497_s19, 1  ;;  %vm228_vm0 = vcmask 1040384  }
   0xe   : > { %v5201_v1 = vld [vmem:[%s6516_s1] sm:$0xff]   ;;  %4799 = vmatprep.subr.bf16.mxu0 %v5200_v0  ;;  %226 = vst [vmem:[#allocation2] sm:$0xf] %v5448_v3  ;;  %227 = vst [vmem:[#allocation2 + $0x4] sm:$0xf] %v5448_v3  ;;  %v5205_v6 = vld [vmem:[%s6516_s1 + $0x8] sm:$0xff]  }
   0xf   : > { %v5202_v2 = vld [vmem:[%s6516_s1 + $0xc0] sm:$0xff]   ;;  %234 = vst [vmem:[#allocation2 + $0xc] sm:$0xf] %v5448_v3  ;;  %235 = vst [vmem:[#allocation2 + $0x10] sm:$0xf] %v5448_v3  ;;  %4800 = vmatpush3.bf16.msra.mxu0 %v5201_v1  ;;  %v5206_v7 = vld [vmem:[%s6516_s1 + $0xc8] sm:$0xff]  }
  0x10   : > { %279 = vst [vmem:[#allocation3] sm:$0xf] %v5448_v3  ;;  %280 = vst [vmem:[#allocation3 + $0x4] sm:$0xf] %v5448_v3  ;;  %v5203_v4 = vld [vmem:[%s6516_s1 + $0x80] sm:$0xff]   ;;  %4839 = vmatprep.subr.bf16.mxu1 %v5202_v2  ;;  %4801 = vmatprep.subr.bf16.mxu0 %v5204_v5  ;;  %v5207_v8 = vld [vmem:[%s6516_s1 + $0x88] sm:$0xff]  }
  0x11   : > { %239 = vst [vmem:[#allocation2 + $0x18] sm:$0xf] %v5448_v3  ;;  %240 = vst [vmem:[#allocation2 + $0x1c] sm:$0xf] %v5448_v3  ;;  %4840 = vmatpush3.bf16.msra.mxu1 %v5203_v4  ;;  %v5209_v10 = vld [vmem:[%s6516_s1 + $0x10] sm:$0xff]   ;;  %v5212_v13 = vld [vmem:[%s6516_s1 + $0x58] sm:$0xff]  }
  0x12   : > { %244 = vst [vmem:[#allocation2 + $0x24] sm:$0xf] %v5448_v3  ;;  %245 = vst [vmem:[#allocation2 + $0x28] sm:$0xf] %v5448_v3  ;;  %4841 = vmatprep.subr.bf16.mxu1 %v5206_v7  ;;  %v5210_v11 = vld [vmem:[%s6516_s1 + $0xd0] sm:$0xff]   ;;  %v5213_v14 = vld [vmem:[%s6516_s1 + $0x18] sm:$0xff]  }
  0x13   : > { %249 = vst [vmem:[#allocation2 + $0x30] sm:$0xf] %v5448_v3  ;;  %250 = vst [vmem:[#allocation2 + $0x34] sm:$0xf] %v5448_v3  ;;  %4802 = vmatpush3.bf16.msra.mxu0 %v5205_v6  ;;  %v5211_v12 = vld [vmem:[%s6516_s1 + $0x90] sm:$0xff]   ;;  %v5214_v15 = vld [vmem:[%s6516_s1 + $0xd8] sm:$0xff]  }
  0x14   : > { %254 = vst [vmem:[#allocation2 + $0x3c] sm:$0xf] %v5448_v3  ;;  %255 = vst [vmem:[#allocation2 + $0x40] sm:$0xf] %v5448_v3  ;;  %4803 = vmatprep.subr.bf16.mxu0 %v5208_v9  ;;  %v5215_v16 = vld [vmem:[%s6516_s1 + $0x98] sm:$0xff]   ;;  %v5216_v17 = vld [vmem:[%s6516_s1 + $0x60] sm:$0xff]  }
  0x15   : > { %259 = vst [vmem:[#allocation2 + $0x48] sm:$0xf] %v5448_v3  ;;  %260 = vst [vmem:[#allocation2 + $0x4c] sm:$0xf] %v5448_v3  ;;  %4842 = vmatpush3.bf16.msra.mxu1 %v5207_v8  ;;  %v5217_v18 = vld [vmem:[%s6516_s1 + $0x20] sm:$0xff]   ;;  %v5220_v21 = vld [vmem:[%s6516_s1 + $0x68] sm:$0xff]  }
  0x16   : > { %264 = vst [vmem:[#allocation2 + $0x54] sm:$0xf] %v5448_v3  ;;  %265 = vst [vmem:[#allocation2 + $0x58] sm:$0xf] %v5448_v3  ;;  %4843 = vmatprep.subr.bf16.mxu1 %v5210_v11  ;;  %v5218_v19 = vld [vmem:[%s6516_s1 + $0xe0] sm:$0xff]   ;;  %v5221_v22 = vld [vmem:[%s6516_s1 + $0x28] sm:$0xff]  }
  0x17   : > { %269 = vst [vmem:[#allocation2 + $0x60] sm:$0xf] %v5448_v3  ;;  %270 = vst [vmem:[#allocation2 + $0x64] sm:$0xf] %v5448_v3  ;;  %4804 = vmatpush3.bf16.msra.mxu0 %v5209_v10  ;;  %v5219_v20 = vld [vmem:[%s6516_s1 + $0xa0] sm:$0xff]   ;;  %s6593_s19 = smov (!%p215_p3, %s4497_s19), 1 }
  0x18   : > { %274 = vst [vmem:[#allocation2 + $0x6c] sm:$0xf] %v5448_v3  ;;  %275 = vst [vmem:[#allocation2 + $0x70] sm:$0xf] %v5448_v3  ;;  %4805 = vmatprep.subr.bf16.mxu0 %v5212_v13  ;;  %v5222_v23 = vld [vmem:[%s6516_s1 + $0xe8] sm:$0xff]   ;;  %v5224_v25 = vld [vmem:[%s6516_s1 + $0x70] sm:$0xff]  }
  0x19   : > { %284 = vst [vmem:[#allocation3 + $0xc] sm:$0xf] %v5448_v3  ;;  %285 = vst [vmem:[#allocation3 + $0x10] sm:$0xf] %v5448_v3  ;;  %4844 = vmatpush3.bf16.msra.mxu1 %v5211_v12  ;;  %v5223_v24 = vld [vmem:[%s6516_s1 + $0xa8] sm:$0xff]   ;;  %v5225_v26 = vld [vmem:[%s6516_s1 + $0x30] sm:$0xff]  }
  0x1a   : > { %289 = vst [vmem:[#allocation3 + $0x18] sm:$0xf] %v5448_v3  ;;  %290 = vst [vmem:[#allocation3 + $0x1c] sm:$0xf] %v5448_v3  ;;  %4845 = vmatprep.subr.bf16.mxu1 %v5214_v15  ;;  %s4774_s26 = sshll.u32 %s6593_s19, 5  ;;  %v5226_v27 = vld [vmem:[%s6516_s1 + $0xf0] sm:$0xff]  }
  0x1b   : > { %294 = vst [vmem:[#allocation3 + $0x24] sm:$0xf] %v5448_v3  ;;  %295 = vst [vmem:[#allocation3 + $0x28] sm:$0xf] %v5448_v3  ;;  %4806 = vmatpush3.bf16.msra.mxu0 %v5213_v14  ;;  %v5227_v28 = vld [vmem:[%s6516_s1 + $0xb0] sm:$0xff]   ;;  %v5228_v29 = vld [vmem:[%s6516_s1 + $0x78] sm:$0xff]   ;;  %s5586_s10 = scalar_lea.vmem %s6515_s0, %s4774_s26  ;;  %s224_s6 = scalar_lea.vmem %s6520_s5, %s4774_s26 }
  0x1c   : > { %299 = vst [vmem:[#allocation3 + $0x30] sm:$0xf] %v5448_v3  ;;  %300 = vst [vmem:[#allocation3 + $0x34] sm:$0xf] %v5448_v3  ;;  %4807 = vmatprep.subr.bf16.mxu0 %v5216_v17  ;;  %v5229_v30 = vld [vmem:[%s6516_s1 + $0x38] sm:$0xff]   ;;  %v5234_v49 = vld [vmem:[%s6516_s1 + $0x140] sm:$0xff]  }
  0x1d   : > { %304 = vst [vmem:[#allocation3 + $0x3c] sm:$0xf] %v5448_v3  ;;  %305 = vst [vmem:[#allocation3 + $0x40] sm:$0xf] %v5448_v3  ;;  %4846 = vmatpush3.bf16.msra.mxu1 %v5215_v16  ;;  %v5230_v31 = vld [vmem:[%s6516_s1 + $0xf8] sm:$0xff]   ;;  %v5238_v56 = vld [vmem:[%s6516_s1 + $0x1c0] sm:$0xff]  }
  0x1e   : > { %309 = vst [vmem:[#allocation3 + $0x48] sm:$0xf] %v5448_v3  ;;  %310 = vst [vmem:[#allocation3 + $0x4c] sm:$0xf] %v5448_v3  ;;  %4847 = vmatprep.subr.bf16.mxu1 %v5218_v19  ;;  %vm229_vm1 = vsmask.f32 256 }
  0x1f   : > { %314 = vst [vmem:[#allocation3 + $0x54] sm:$0xf] %v5448_v3  ;;  %315 = vst [vmem:[#allocation3 + $0x58] sm:$0xf] %v5448_v3  ;;  %4808 = vmatpush3.bf16.msra.mxu0 %v5217_v18  ;;  %v329_v32 = vld [vmem:[%s5586_s10] sm:$0xf] }
  0x20   : > { %319 = vst [vmem:[#allocation3 + $0x60] sm:$0xf] %v5448_v3  ;;  %320 = vst [vmem:[#allocation3 + $0x64] sm:$0xf] %v5448_v3  ;;  %4809 = vmatprep.subr.bf16.mxu0 %v5220_v21  ;;  %v346_v33 = vld [vmem:[#allocation2] sm:$0x8] }
  0x21   : > { %324 = vst [vmem:[#allocation3 + $0x6c] sm:$0xf] %v5448_v3  ;;  %325 = vst [vmem:[#allocation3 + $0x70] sm:$0xf] %v5448_v3  ;;  %4848 = vmatpush3.bf16.msra.mxu1 %v5219_v20  ;;  %v347_v34 = vld [vmem:[#allocation2 + $0x4] sm:$0xf] }
  0x22   : > { %4849 = vmatprep.subr.bf16.mxu1 %v5222_v23  ;;  %338 = vst [vmem:[#allocation2 + $0x10] sm:$0xf] %v329_v32  ;;  %v348_v35 = vld [vmem:[#allocation2 + $0xc] sm:$0x8]  ;;  %vm362_vm2 = vsmask.f32 4368  ;;  %vm5597_vm3 = vmand %vm228_vm0, %vm229_vm1 }
  0x23   : > { %4810 = vmatpush3.bf16.msra.mxu0 %v5221_v22  ;;  %v365_v36 = vshrl.u32 %v346_v33, 16  ;;  %v370_v37 = vshrl.u32 %v347_v34, 16  ;;  %v373_v38 = vshll.u32 %v347_v34, 16  ;;  %v484_v39 = vld [vmem:[#allocation2 + $0x4] sm:$0xf]  ;;  %vm5602_vm4 = vmor %vm229_vm1, %vm362_vm2  ;;  %v378_v46 = vshrl.u32 %v348_v35, 16 }
  0x24   : > { %4811 = vmatprep.subr.bf16.mxu0 %v5224_v25  ;;  %492 = vst [vmem:[#allocation4 + $0x4] sm:$0xf] %v484_v39  ;;  %v2397_v40 = vld [vmem:[#allocation3] sm:$0x8]  ;;  %v2398_v41 = vld [vmem:[#allocation3 + $0x4] sm:$0xf] }
  0x25   : > { %4850 = vmatpush3.bf16.msra.mxu1 %v5223_v24  ;;  %v4506_v44 = vrot.slane %v365_v36, 11  ;;  %v372_v45 = vrot.slane %v370_v37, 7  ;;  %v2419_v47 = vshrl.u32 %v2398_v41, 16  ;;  %v5233_v48 = vld [vmem:[%s6516_s1 + $0xb8] sm:$0xff]   ;;  %v2414_v51 = vshrl.u32 %v2397_v40, 16 }
  0x26   : > { %4851 = vmatprep.subr.bf16.mxu1 %v5226_v27  ;;  %v2422_v52 = vshll.u32 %v2398_v41, 16  ;;  %v231_v54 = vld [vmem:[#allocation2 + $0x8] sm:$0x1]  ;;  %v236_v55 = vld [vmem:[#allocation2 + $0x14] sm:$0x1]  ;;  %v4507_v5 = vrot.slane %v378_v46, 11 }
  0x27   : > { %4812 = vmatpush3.bf16.msra.mxu0 %v5225_v26  ;;  %v375_v50 = vor.u32 %v373_v38, %v372_v45  ;;  %v2421_v53 = vrot.slane %v2419_v47, 7  ;;  %v232_v60 = vsel %vm5597_vm3, 0, %v231_v54  ;;  %v237_v61 = vsel %vm5597_vm3, 0, %v236_v55  ;;  %v281_v0 = vld [vmem:[#allocation3 + $0x8] sm:$0x1] }
  0x28   : > { %4813 = vmatprep.subr.bf16.mxu0 %v5228_v29  ;;  %233 = vst [vmem:[#allocation2 + $0x8] sm:$0x1] %v232_v60  ;;  %238 = vst [vmem:[#allocation2 + $0x14] sm:$0x1] %v237_v61  ;;  %v330_v1 = vld [vmem:[%s5586_s10 + $0x4] sm:$0xf] }
  0x29   : > { %4852 = vmatpush3.bf16.msra.mxu1 %v5227_v28  ;;  %v349_v57 = vld [vmem:[#allocation2 + $0x10] sm:$0xf]  ;;  %v376_v58 = vsel %vm5602_vm4, %v4506_v44, %v375_v50  ;;  %v282_v2 = vsel %vm5597_vm3, 0, %v281_v0  ;;  %339 = vst [vmem:[#allocation2 + $0x1c] sm:$0xf] %v330_v1  ;;  %v4639_v13 = vrot.slane %v2414_v51, 11  ;;  %v2424_v14 = vor.u32 %v2422_v52, %v2421_v53 }
  0x2a   : > { %4853 = vmatprep.subr.bf16.mxu1 %v5230_v31  ;;  %v485_v59 = vld [vmem:[#allocation2 + $0x10] sm:$0xf]  ;;  %v383_v62 = vshrl.u32 %v349_v57, 16  ;;  %v386_v63 = vshll.u32 %v349_v57, 16  ;;  %476 = vst [vmem:[#allocation4] sm:$0xf] %v376_v58 }
  0x2b   : > { %4814 = vmatpush3.bf16.msra.mxu0 %v5229_v30  ;;  %493 = vst [vmem:[#allocation4 + $0x28] sm:$0xf] %v485_v59  ;;  %v500_v3 = vld [vmem:[#allocation2 + $0x4] sm:$0xf]  ;;  %v502_v4 = vld [vmem:[#allocation2 + $0x10] sm:$0xf]  ;;  %v2425_v55 = vsel %vm5602_vm4, %v4639_v13, %v2424_v14 }
  0x2c   : > { %4879 = vmatprep.subr.bf16.mxu0 %v5234_v49  ;;  %v385_v6 = vrot.slane %v383_v62, 7  ;;  %283 = vst [vmem:[#allocation3 + $0x8] sm:$0x1] %v282_v2  ;;  %vm516_vm5 = vsmask.f32 3328  ;;  %v520_v7 = vshrl.u32 %v500_v3, 16 }
  0x2d   : > { %4854 = vmatpush3.bf16.msra.mxu1 %v5233_v48  ;;  %v523_v8 = vshll.u32 %v500_v3, 16  ;;  %v534_v9 = vshrl.u32 %v502_v4, 16  ;;  %v537_v10 = vshll.u32 %v502_v4, 16  ;;  %v647_v11 = vld [vmem:[#allocation2 + $0xc] sm:$0x8]  ;;  %v5237_v59 = vld [vmem:[%s6516_s1 + $0x100] sm:$0xff]  }
  0x2e   : > { %4919 = vmatprep.subr.bf16.mxu1 %v5238_v56  ;;  %v388_v12 = vor.u32 %v386_v63, %v385_v6  ;;  %v648_v15 = vld [vmem:[#allocation2 + $0x10] sm:$0xf]  ;;  %v649_v16 = vld [vmem:[#allocation2 + $0x18] sm:$0x8]  ;;  %v664_v17 = vshrl.u32 %v647_v11, 16  ;;  %v522_v18 = vrot.slane %v520_v7, 4 }
  0x2f   : > { %v525_v19 = vrot.slane %v523_v8, 5  ;;  %v536_v20 = vrot.slane %v534_v9, 4  ;;  %v539_v21 = vrot.slane %v537_v10, 5  ;;  %v2549_v22 = vld [vmem:[#allocation3 + $0x4] sm:$0xf]  ;;  %v669_v24 = vshrl.u32 %v648_v15, 16 }
  0x30   : > { %v389_v23 = vsel %vm5602_vm4, %v4507_v5, %v388_v12  ;;  %vm517_vm6 = vsmask.f32 7440  ;;  %v672_v25 = vshll.u32 %v648_v15, 16  ;;  %v501_v26 = vld [vmem:[#allocation2 + $0x8] sm:$0x1]  ;;  %v4514_v30 = vrot.slane %v664_v17, 11 }
  0x31   : > { %477 = vst [vmem:[#allocation4 + $0x24] sm:$0xf] %v389_v23  ;;  %v503_v27 = vld [vmem:[#allocation2 + $0x14] sm:$0x1]  ;;  %v526_v28 = vor.u32 %v525_v19, %v522_v18  ;;  %v540_v29 = vor.u32 %v539_v21, %v536_v20  ;;  %v677_v31 = vshrl.u32 %v649_v16, 16  ;;  %v529_v32 = vshll.u32 %v501_v26, 16  ;;  %vm5628_vm7 = vmor %vm516_vm5, %vm517_vm6 }
  0x32   : > { %v543_v33 = vshll.u32 %v503_v27, 16  ;;  %v650_v34 = vld [vmem:[#allocation2 + $0x1c] sm:$0xf]  ;;  %v671_v35 = vrot.slane %v669_v24, 7  ;;  %v2566_v36 = vshrl.u32 %v2549_v22, 16  ;;  %v1240_v45 = vld [vmem:[#allocation4] sm:$0xff] }
  0x33   : > { %v527_v38 = vrot.slane %v526_v28, 4  ;;  %v541_v39 = vrot.slane %v540_v29, 4  ;;  %v4515_v40 = vrot.slane %v677_v31, 11  ;;  %v682_v41 = vshrl.u32 %v650_v34, 16  ;;  %v2550_v44 = vld [vmem:[#allocation3 + $0x8] sm:$0x1] }
  0x34   : > { %v2533_v46 = vld [vmem:[#allocation3 + $0x4] sm:$0xf]  ;;  %v531_v47 = vrot.slane %v529_v32, 5  ;;  %v545_v48 = vrot.slane %v543_v33, 5  ;;  %v674_v49 = vor.u32 %v672_v25, %v671_v35  ;;  %v685_v50 = vshll.u32 %v650_v34, 16  ;;  %v5240_v62 = vld [vmem:[%s6516_s1 + $0x148] sm:$0xff]  }
  0x35   : > { %v684_v51 = vrot.slane %v682_v41, 7  ;;  %v2568_v52 = vrot.slane %v2566_v36, 4  ;;  %v2569_v53 = vshll.u32 %v2549_v22, 16  ;;  %v2575_v54 = vshll.u32 %v2550_v44, 16  ;;  %v5231_v0 = vld [vmem:[#allocation4 + $0x4] ss:$36 sps:$4 sm:$0xff]  }
  0x36   : > { %v532_v56 = vsel %vm5628_vm7, %v527_v38, %v531_v47  ;;  %v546_v57 = vsel %vm5628_vm7, %v541_v39, %v545_v48  ;;  %v675_v58 = vsel %vm5602_vm4, %v4514_v30, %v674_v49  ;;  %2525 = vst [vmem:[#allocation4] sm:$0xf] %v2425_v55  ;;  %2541 = vst [vmem:[#allocation4 + $0x4] sm:$0xf] %v2533_v46  ;;  %2079 = vmatprep.mubr.bf16.mxu0 %v5231_v0  ;;  %v5241_v5 = vld [vmem:[%s6516_s1 + $0x108] sm:$0xff]   ;;  %v5247_v16 = vld [vmem:[%s6516_s1 + $0x150] sm:$0xff]  }
  0x37   : > { %639 = vst [vmem:[#allocation4 + $0x8] sm:$0xf] %v532_v56  ;;  %640 = vst [vmem:[#allocation4 + $0x2c] sm:$0xf] %v546_v57  ;;  %v687_v60 = vor.u32 %v685_v50, %v684_v51  ;;  %v2571_v61 = vrot.slane %v2569_v53, 5  ;;  %v2577_v1 = vrot.slane %v2575_v54, 5 }
  0x38   : > { %775 = vst [vmem:[#allocation4 + $0xc] sm:$0xf] %v675_v58  ;;  %v1245_v63 = vld [vmem:[#allocation4 + $0x24] sm:$0xff]  ;;  %v331_v6 = vld [vmem:[%s5586_s10 + $0x8] sm:$0xf]  ;;  %v5239_v22 = vld [vmem:[%s6516_s1 + $0x180] sm:$0xff]  }
  0x39   : > { %v4531_v2 = vcombine.low %v1240_v45, %v1245_v63  ;;  %v688_v3 = vsel %vm5602_vm4, %v4515_v40, %v687_v60  ;;  %v2572_v4 = vor.u32 %v2571_v61, %v2568_v52  ;;  %v350_v7 = vld [vmem:[#allocation2 + $0x18] sm:$0x8]  ;;  %v351_v8 = vld [vmem:[#allocation2 + $0x1c] sm:$0xf]  ;;  %340 = vst [vmem:[#allocation2 + $0x28] sm:$0xf] %v331_v6 }
  0x3a   : > { %776 = vst [vmem:[#allocation4 + $0x30] sm:$0xf] %v688_v3  ;;  %v352_v10 = vld [vmem:[#allocation2 + $0x24] sm:$0x8]  ;;  %v391_v11 = vshrl.u32 %v350_v7, 16  ;;  %v396_v12 = vshrl.u32 %v351_v8, 16 }
  0x3b   : > { %2080 = vmatmul.mubr.bf16.vlgmr.msra.gmra.mrb[0].mxu0 %v4531_v2  ;;  %v2573_v9 = vrot.slane %v2572_v4, 4  ;;  %v399_v13 = vshll.u32 %v351_v8, 16  ;;  %v404_v14 = vshrl.u32 %v352_v10, 16  ;;  %v486_v15 = vld [vmem:[#allocation2 + $0x1c] sm:$0xf]  ;;  %v5242_v28 = vld [vmem:[%s6516_s1 + $0x1c8] sm:$0xff]  }
  0x3c   : > { %4880 = vmatpush3.bf16.msra.mxu0 %v5237_v59  ;;  %v4508_v17 = vrot.slane %v391_v11, 11  ;;  %v398_v18 = vrot.slane %v396_v12, 7  ;;  %494 = vst [vmem:[#allocation4 + $0x4c] sm:$0xf] %v486_v15  ;;  %v241_v20 = vld [vmem:[#allocation2 + $0x20] sm:$0x1] }
  0x3d   : > { %4881 = vmatprep.subr.bf16.mxu0 %v5240_v62  ;;  %v2578_v21 = vsel %vm5628_vm7, %v2573_v9, %v2577_v1  ;;  %v5660_v24 = vrot.slane %v404_v14, 11  ;;  %v242_v25 = vsel %vm5597_vm3, 0, %v241_v20  ;;  %v246_v26 = vld [vmem:[#allocation2 + $0x2c] sm:$0x1]  ;;  %v504_v30 = vld [vmem:[#allocation2 + $0x1c] sm:$0xf] }
  0x3e   : > { %v401_v23 = vor.u32 %v399_v13, %v398_v18  ;;  %v332_v27 = vld [vmem:[%s5586_s10 + $0xc] sm:$0xf]  ;;  %243 = vst [vmem:[#allocation2 + $0x20] sm:$0x1] %v242_v25  ;;  %v247_v29 = vsel %vm5597_vm3, 0, %v246_v26  ;;  %v5250_v32 = vld [vmem:[%s6516_s1 + $0x110] sm:$0xff]  }
  0x3f   : > { %v1241_v19 = vld [vmem:[#allocation4 + $0x8] sm:$0xff]  ;;  %341 = vst [vmem:[#allocation2 + $0x34] sm:$0xf] %v332_v27  ;;  %v651_v31 = vld [vmem:[#allocation2 + $0x24] sm:$0x8]  ;;  %v548_v36 = vshrl.u32 %v504_v30, 16 }
  0x40   : > { %4882 = vmatpush3.bf16.msra.mxu0 %v5241_v5  ;;  %v402_v35 = vsel %vm5602_vm4, %v4508_v17, %v401_v23  ;;  %248 = vst [vmem:[#allocation2 + $0x2c] sm:$0x1] %v247_v29  ;;  %v551_v38 = vshll.u32 %v504_v30, 16  ;;  %v690_v39 = vshrl.u32 %v651_v31, 16  ;;  %2685 = vst [vmem:[#allocation4 + $0x8] sm:$0xf] %v2578_v21 }
  0x41   : > { %v1246_v33 = vld [vmem:[#allocation4 + $0x2c] sm:$0xff]  ;;  %4883 = vmatprep.subr.bf16.mxu0 %v5247_v16  ;;  %v353_v41 = vld [vmem:[#allocation2 + $0x28] sm:$0xf]  ;;  %478 = vst [vmem:[#allocation4 + $0x48] sm:$0xf] %v402_v35  ;;  %v550_v49 = vrot.slane %v548_v36, 4 }
  0x42   : > { %v5235_v34 = vld [vmem:[#allocation4 + $0xc] ss:$36 sps:$4 sm:$0xff]   ;;  %v4533_v40 = vcombine.low %v1241_v19, %v1246_v33  ;;  %v487_v44 = vld [vmem:[#allocation2 + $0x28] sm:$0xf]  ;;  %v409_v46 = vshrl.u32 %v353_v41, 16  ;;  %v412_v47 = vshll.u32 %v353_v41, 16 }
  0x43   : > { %v506_v45 = vld [vmem:[#allocation2 + $0x28] sm:$0xf]  ;;  %2144 = vmatprep.mubr.bf16.mxu1 %v5235_v34  ;;  %495 = vst [vmem:[#allocation4 + $0x70] sm:$0xf] %v487_v44  ;;  %v553_v50 = vrot.slane %v551_v38, 5  ;;  %v4516_v55 = vrot.slane %v690_v39, 11 }
  0x44   : > { %v5245_v48 = vld [vmem:[%s6516_s1 + $0x188] sm:$0xff]   ;;  %2145 = vmatmul.mubr.bf16.vlgmr.msra.gmra.mrb[0].mxu1 %v4533_v40  ;;  %v562_v52 = vshrl.u32 %v506_v45, 16  ;;  %v565_v53 = vshll.u32 %v506_v45, 16  ;;  %v653_v54 = vld [vmem:[#allocation2 + $0x30] sm:$0x8]  ;;  %4884 = vmatpush3.bf16.msra.mxu0 %v5250_v32  ;;  %v411_v57 = vrot.slane %v409_v46, 7 }
  0x45   : > { %v652_v51 = vld [vmem:[#allocation2 + $0x28] sm:$0xf]  ;;  %4920 = vmatpush3.bf16.msra.mxu1 %v5239_v22  ;;  %v554_v58 = vor.u32 %v553_v50, %v550_v49  ;;  %v703_v60 = vshrl.u32 %v653_v54, 16  ;;  %v5252_v61 = vld [vmem:[%s6516_s1 + $0x1d0] sm:$0xff]   ;;  %v5254_v1 = vld [vmem:[%s6516_s1 + $0x158] sm:$0xff]  }
  0x46   : > { %v695_v56 = vshrl.u32 %v652_v51, 16  ;;  %v698_v59 = vshll.u32 %v652_v51, 16  ;;  %4921 = vmatprep.subr.bf16.mxu1 %v5242_v28  ;;  %v564_v62 = vrot.slane %v562_v52, 4  ;;  %v567_v63 = vrot.slane %v565_v53, 5  ;;  %v505_v3 = vld [vmem:[#allocation2 + $0x20] sm:$0x1]  ;;  %4885 = vmatprep.subr.bf16.mxu0 %v5254_v1 }
  0x47   : > { %v414_v2 = vor.u32 %v412_v47, %v411_v57  ;;  %v555_v4 = vrot.slane %v554_v58, 4  ;;  %v654_v5 = vld [vmem:[#allocation2 + $0x34] sm:$0xf]  ;;  %v4517_v6 = vrot.slane %v703_v60, 11  ;;  %v507_v8 = vld [vmem:[#allocation2 + $0x2c] sm:$0x1] }
  0x48   : > { %v697_v0 = vrot.slane %v695_v56, 7  ;;  %v5253_v7 = vld [vmem:[%s6516_s1 + $0x190] sm:$0xff]   ;;  %v557_v9 = vshll.u32 %v505_v3, 16  ;;  %v568_v10 = vor.u32 %v567_v63, %v564_v62  ;;  %v708_v12 = vshrl.u32 %v654_v5, 16  ;;  %v5255_v16 = vld [vmem:[%s6516_s1 + $0x118] sm:$0xff]   ;;  %v5261_v45 = vld [vmem:[%s6516_s1 + $0x160] sm:$0xff]  }
  0x49   : > { %v415_v13 = vsel %vm5602_vm4, %v5660_v24, %v414_v2  ;;  %4922 = vmatpush3.bf16.msra.mxu1 %v5245_v48  ;;  %v571_v14 = vshll.u32 %v507_v8, 16  ;;  %v711_v15 = vshll.u32 %v654_v5, 16  ;;  %v5256_v21 = vld [vmem:[%s6516_s1 + $0x1d8] sm:$0xff]   ;;  %4886 = vmatpush3.bf16.msra.mxu0 %v5255_v16  ;;  %v333_v27 = vld [vmem:[%s5586_s10 + $0x10] sm:$0xf]  ;;  %v5264_v46 = vld [vmem:[%s6516_s1 + $0x120] sm:$0xff]  }
  0x4a   : > { %v700_v11 = vor.u32 %v698_v59, %v697_v0  ;;  %479 = vst [vmem:[#allocation4 + $0x6c] sm:$0xf] %v415_v13  ;;  %v559_v17 = vrot.slane %v557_v9, 5  ;;  %v569_v18 = vrot.slane %v568_v10, 4  ;;  %v710_v20 = vrot.slane %v708_v12, 7  ;;  %4923 = vmatprep.subr.bf16.mxu1 %v5252_v61  ;;  %v5259_v23 = vld [vmem:[%s6516_s1 + $0x198] sm:$0xff]   ;;  %4887 = vmatprep.subr.bf16.mxu0 %v5261_v45 }
  0x4b   : > { %v573_v22 = vrot.slane %v571_v14, 5  ;;  %342 = vst [vmem:[#allocation2 + $0x40] sm:$0xf] %v333_v27  ;;  %v354_v29 = vld [vmem:[#allocation2 + $0x30] sm:$0x8]  ;;  %v5266_v54 = vld [vmem:[%s6516_s1 + $0x1e0] sm:$0xff]  }
  0x4c   : > { %v701_v19 = vsel %vm5602_vm4, %v4516_v55, %v700_v11  ;;  %v560_v24 = vsel %vm5628_vm7, %v555_v4, %v559_v17  ;;  %v713_v25 = vor.u32 %v711_v15, %v710_v20  ;;  %v355_v30 = vld [vmem:[#allocation2 + $0x34] sm:$0xf]  ;;  %v356_v31 = vld [vmem:[#allocation2 + $0x3c] sm:$0x8]  ;;  %v417_v32 = vshrl.u32 %v354_v29, 16  ;;  %v5267_v15 = vld [vmem:[%s6516_s1 + $0x1a0] sm:$0xff]  }
  0x4d   : > { %777 = vst [vmem:[#allocation4 + $0x54] sm:$0xf] %v701_v19  ;;  %v574_v26 = vsel %vm5628_vm7, %v569_v18, %v573_v22  ;;  %641 = vst [vmem:[#allocation4 + $0x50] sm:$0xf] %v560_v24  ;;  %4924 = vmatpush3.bf16.msra.mxu1 %v5253_v7  ;;  %v422_v33 = vshrl.u32 %v355_v30, 16  ;;  %v425_v34 = vshll.u32 %v355_v30, 16  ;;  %4888 = vmatpush3.bf16.msra.mxu0 %v5264_v46 }
  0x4e   : > { %642 = vst [vmem:[#allocation4 + $0x74] sm:$0xf] %v574_v26  ;;  %v714_v28 = vsel %vm5602_vm4, %v4517_v6, %v713_v25  ;;  %4925 = vmatprep.subr.bf16.mxu1 %v5256_v21  ;;  %v430_v35 = vshrl.u32 %v356_v31, 16  ;;  %v488_v36 = vld [vmem:[#allocation2 + $0x34] sm:$0xf]  ;;  %v4510_v40 = vrot.slane %v417_v32, 11 }
  0x4f   : > { %778 = vst [vmem:[#allocation4 + $0x78] sm:$0xf] %v714_v28  ;;  %496 = vst [vmem:[#allocation4 + $0x94] sm:$0xf] %v488_v36  ;;  %v5243_v38 = vld [vmem:[#allocation4 + $0x4c] ss:$36 sps:$4 sm:$0xff]  }
  0x50   : > { %v424_v41 = vrot.slane %v422_v33, 7  ;;  %v4511_v44 = vrot.slane %v430_v35, 11  ;;  %2087 = vmatprep.mubr.bf16.mxu0 %v5243_v38  ;;  %v251_v47 = vld [vmem:[#allocation2 + $0x38] sm:$0x1]  ;;  %v256_v48 = vld [vmem:[#allocation2 + $0x44] sm:$0x1] }
  0x51   : > { %v5246_v39 = vld [vmem:[#allocation4 + $0x48] ss:$36 sps:$4 sm:$0xff]   ;;  %4926 = vmatpush3.bf16.msra.mxu1 %v5259_v23  ;;  %v334_v49 = vld [vmem:[%s5586_s10 + $0x14] sm:$0xf]  ;;  %v252_v51 = vsel %vm5597_vm3, 0, %v251_v47  ;;  %v257_v52 = vsel %vm5597_vm3, 0, %v256_v48 }
  0x52   : > { %2088 = vmatmul.mubr.bf16.gmra.mrb[4].mxu0 %v5246_v39  ;;  %v427_v50 = vor.u32 %v425_v34, %v424_v41  ;;  %343 = vst [vmem:[#allocation2 + $0x4c] sm:$0xf] %v334_v49  ;;  %v508_v53 = vld [vmem:[#allocation2 + $0x34] sm:$0xf]  ;;  %v357_v55 = vld [vmem:[#allocation2 + $0x40] sm:$0xf]  ;;  %4927 = vmatprep.subr.bf16.mxu1 %v5266_v54 }
  0x53   : > { %v489_v56 = vld [vmem:[#allocation2 + $0x40] sm:$0xf]  ;;  %253 = vst [vmem:[#allocation2 + $0x38] sm:$0x1] %v252_v51  ;;  %258 = vst [vmem:[#allocation2 + $0x44] sm:$0x1] %v257_v52 }
  0x54   : > { %v510_v57 = vld [vmem:[#allocation2 + $0x40] sm:$0xf]  ;;  %v428_v60 = vsel %vm5602_vm4, %v4510_v40, %v427_v50  ;;  %v435_v61 = vshrl.u32 %v357_v55, 16  ;;  %497 = vst [vmem:[#allocation4 + $0xb8] sm:$0xf] %v489_v56  ;;  %v438_v62 = vshll.u32 %v357_v55, 16 }
  0x55   : > { %v5251_v59 = vld [vmem:[#allocation4 + $0x50] ss:$36 sps:$4 sm:$0xff]   ;;  %480 = vst [vmem:[#allocation4 + $0x90] sm:$0xf] %v428_v60  ;;  %v576_v63 = vshrl.u32 %v508_v53, 16  ;;  %v579_v0 = vshll.u32 %v508_v53, 16  ;;  %4928 = vmatpush3.bf16.msra.mxu1 %v5267_v15 }
  0x56   : > { %v5248_v58 = vld [vmem:[#allocation4 + $0x54] ss:$36 sps:$4 sm:$0xff]   ;;  %v590_v1 = vshrl.u32 %v510_v57, 16  ;;  %v655_v2 = vld [vmem:[#allocation2 + $0x3c] sm:$0x8]  ;;  %v437_v3 = vrot.slane %v435_v61, 7 }
  0x57   : > { %2152 = vmatprep.mubr.bf16.mxu1 %v5248_v58  ;;  %v593_v4 = vshll.u32 %v510_v57, 16  ;;  %v656_v5 = vld [vmem:[#allocation2 + $0x40] sm:$0xf]  ;;  %v657_v6 = vld [vmem:[#allocation2 + $0x48] sm:$0x8]  ;;  %v578_v7 = vrot.slane %v576_v63, 4 }
  0x58   : > { %2153 = vmatmul.mubr.bf16.gmra.mrb[4].mxu1 %v5251_v59  ;;  %v581_v8 = vrot.slane %v579_v0, 5  ;;  %v592_v9 = vrot.slane %v590_v1, 4  ;;  %v716_v10 = vshrl.u32 %v655_v2, 16  ;;  %v440_v11 = vor.u32 %v438_v62, %v437_v3  ;;  %v5268_v39 = vld [vmem:[%s6516_s1 + $0x168] sm:$0xff]   ;;  %v335_v47 = vld [vmem:[%s5586_s10 + $0x18] sm:$0xf] }
  0x59   : > { %v595_v12 = vrot.slane %v593_v4, 5  ;;  %v721_v13 = vshrl.u32 %v656_v5, 16  ;;  %v724_v14 = vshll.u32 %v656_v5, 16  ;;  %v658_v17 = vld [vmem:[#allocation2 + $0x4c] sm:$0xf]  ;;  %v729_v19 = vshrl.u32 %v657_v6, 16  ;;  %4889 = vmatprep.subr.bf16.mxu0 %v5268_v39 }
  0x5a   : > { %v582_v16 = vor.u32 %v581_v8, %v578_v7  ;;  %v4518_v18 = vrot.slane %v716_v10, 11  ;;  %v441_v20 = vsel %vm5602_vm4, %v4511_v44, %v440_v11  ;;  %v509_v21 = vld [vmem:[#allocation2 + $0x38] sm:$0x1]  ;;  %v511_v22 = vld [vmem:[#allocation2 + $0x44] sm:$0x1]  ;;  %v734_v25 = vshrl.u32 %v658_v17, 16 }
  0x5b   : > { %v596_v23 = vor.u32 %v595_v12, %v592_v9  ;;  %v723_v24 = vrot.slane %v721_v13, 7  ;;  %481 = vst [vmem:[#allocation4 + $0xb4] sm:$0xf] %v441_v20  ;;  %v585_v27 = vshll.u32 %v509_v21, 16  ;;  %v599_v28 = vshll.u32 %v511_v22, 16  ;;  %v5269_v44 = vld [vmem:[%s6516_s1 + $0x128] sm:$0xff]  }
  0x5c   : > { %v583_v26 = vrot.slane %v582_v16, 4  ;;  %v4519_v29 = vrot.slane %v729_v19, 11  ;;  %v736_v32 = vrot.slane %v734_v25, 7  ;;  %v737_v33 = vshll.u32 %v658_v17, 16  ;;  %v5270_v46 = vld [vmem:[%s6516_s1 + $0x1e8] sm:$0xff]   ;;  %4890 = vmatpush3.bf16.msra.mxu0 %v5269_v44  ;;  %v5275_v60 = vld [vmem:[%s6516_s1 + $0x170] sm:$0xff]  }
  0x5d   : > { %v597_v30 = vrot.slane %v596_v23, 4  ;;  %v726_v31 = vor.u32 %v724_v14, %v723_v24  ;;  %v587_v34 = vrot.slane %v585_v27, 5  ;;  %v601_v35 = vrot.slane %v599_v28, 5  ;;  %344 = vst [vmem:[#allocation2 + $0x58] sm:$0xf] %v335_v47  ;;  %4929 = vmatprep.subr.bf16.mxu1 %v5270_v46  ;;  %v5273_v58 = vld [vmem:[%s6516_s1 + $0x1a8] sm:$0xff]   ;;  %4891 = vmatprep.subr.bf16.mxu0 %v5275_v60 }
  0x5e   : > { %v739_v38 = vor.u32 %v737_v33, %v736_v32  ;;  %v358_v48 = vld [vmem:[#allocation2 + $0x48] sm:$0x8]  ;;  %v359_v49 = vld [vmem:[#allocation2 + $0x4c] sm:$0xf]  ;;  %v360_v50 = vld [vmem:[#allocation2 + $0x54] sm:$0x8]  ;;  %4930 = vmatpush3.bf16.msra.mxu1 %v5273_v58 }
  0x5f   : > { %v727_v36 = vsel %vm5602_vm4, %v4518_v18, %v726_v31  ;;  %v588_v40 = vsel %vm5628_vm7, %v583_v26, %v587_v34  ;;  %v602_v41 = vsel %vm5628_vm7, %v597_v30, %v601_v35  ;;  %v5257_v51 = vld [vmem:[#allocation4 + $0x94] ss:$36 sps:$4 sm:$0xff]   ;;  %v443_v53 = vshrl.u32 %v358_v48, 16  ;;  %v490_v57 = vld [vmem:[#allocation2 + $0x4c] sm:$0xf]  ;;  %v5278_v6 = vld [vmem:[%s6516_s1 + $0x130] sm:$0xff]  }
  0x60   : > { %779 = vst [vmem:[#allocation4 + $0x9c] sm:$0xf] %v727_v36  ;;  %643 = vst [vmem:[#allocation4 + $0x98] sm:$0xf] %v588_v40  ;;  %v740_v45 = vsel %vm5602_vm4, %v4519_v29, %v739_v38  ;;  %v448_v54 = vshrl.u32 %v359_v49, 16  ;;  %v451_v55 = vshll.u32 %v359_v49, 16  ;;  %2095 = vmatprep.mubr.bf16.mxu0 %v5257_v51  ;;  %4892 = vmatpush3.bf16.msra.mxu0 %v5278_v6 }
  0x61   : > { %644 = vst [vmem:[#allocation4 + $0xbc] sm:$0xf] %v602_v41  ;;  %780 = vst [vmem:[#allocation4 + $0xc0] sm:$0xf] %v740_v45  ;;  %v456_v56 = vshrl.u32 %v360_v50, 16  ;;  %v4512_v59 = vrot.slane %v443_v53, 11 }
  0x62   : > { %v5260_v52 = vld [vmem:[#allocation4 + $0x90] ss:$36 sps:$4 sm:$0xff]   ;;  %498 = vst [vmem:[#allocation4 + $0xdc] sm:$0xf] %v490_v57  ;;  %v450_v61 = vrot.slane %v448_v54, 7  ;;  %v5280_v48 = vld [vmem:[%s6516_s1 + $0x1f0] sm:$0xff]  }
  0x63   : > { %2096 = vmatmul.mubr.bf16.gmra.mrb[8].mxu0 %v5260_v52  ;;  %v4513_v62 = vrot.slane %v456_v56, 11  ;;  %v261_v63 = vld [vmem:[#allocation2 + $0x50] sm:$0x1]  ;;  %v266_v0 = vld [vmem:[#allocation2 + $0x5c] sm:$0x1]  ;;  %4931 = vmatprep.subr.bf16.mxu1 %v5280_v48 }
  0x64   : > { %v336_v1 = vld [vmem:[%s5586_s10 + $0x1c] sm:$0xf]  ;;  %v453_v2 = vor.u32 %v451_v55, %v450_v61  ;;  %v262_v3 = vsel %vm5597_vm3, 0, %v261_v63  ;;  %v267_v4 = vsel %vm5597_vm3, 0, %v266_v0  ;;  %v512_v5 = vld [vmem:[#allocation2 + $0x4c] sm:$0xf] }
  0x65   : > { %345 = vst [vmem:[#allocation2 + $0x64] sm:$0xf] %v336_v1  ;;  %263 = vst [vmem:[#allocation2 + $0x50] sm:$0x1] %v262_v3  ;;  %v604_v9 = vshrl.u32 %v512_v5, 16  ;;  %v607_v17 = vshll.u32 %v512_v5, 16 }
  0x66   : > { %268 = vst [vmem:[#allocation2 + $0x5c] sm:$0x1] %v267_v4  ;;  %v361_v10 = vld [vmem:[#allocation2 + $0x58] sm:$0xf]  ;;  %v454_v11 = vsel %vm5602_vm4, %v4512_v59, %v453_v2  ;;  %v659_v18 = vld [vmem:[#allocation2 + $0x54] sm:$0x8] }
  0x67   : > { %v491_v12 = vld [vmem:[#allocation2 + $0x58] sm:$0xf]  ;;  %v461_v14 = vshrl.u32 %v361_v10, 16  ;;  %v464_v15 = vshll.u32 %v361_v10, 16  ;;  %482 = vst [vmem:[#allocation4 + $0xd8] sm:$0xf] %v454_v11 }
  0x68   : > { %v5262_v7 = vld [vmem:[#allocation4 + $0x9c] ss:$36 sps:$4 sm:$0xff]   ;;  %v514_v13 = vld [vmem:[#allocation2 + $0x58] sm:$0xf]  ;;  %499 = vst [vmem:[#allocation4 + $0x100] sm:$0xf] %v491_v12 }
  0x69   : > { %v5265_v8 = vld [vmem:[#allocation4 + $0x98] ss:$36 sps:$4 sm:$0xff]   ;;  %2160 = vmatprep.mubr.bf16.mxu1 %v5262_v7  ;;  %v606_v16 = vrot.slane %v604_v9, 4  ;;  %v618_v19 = vshrl.u32 %v514_v13, 16  ;;  %v621_v20 = vshll.u32 %v514_v13, 16  ;;  %v463_v23 = vrot.slane %v461_v14, 7 }
  0x6a   : > { %2161 = vmatmul.mubr.bf16.gmra.mrb[8].mxu1 %v5265_v8  ;;  %v660_v21 = vld [vmem:[#allocation2 + $0x58] sm:$0xf]  ;;  %v661_v22 = vld [vmem:[#allocation2 + $0x60] sm:$0x8]  ;;  %v609_v24 = vrot.slane %v607_v17, 5  ;;  %v742_v25 = vshrl.u32 %v659_v18, 16 }
  0x6b   : > { %v747_v26 = vshrl.u32 %v660_v21, 16  ;;  %v620_v27 = vrot.slane %v618_v19, 4  ;;  %v623_v28 = vrot.slane %v621_v20, 5  ;;  %v750_v29 = vshll.u32 %v660_v21, 16  ;;  %v5281_v55 = vld [vmem:[%s6516_s1 + $0x1b0] sm:$0xff]   ;;  %v5282_v56 = vld [vmem:[%s6516_s1 + $0x178] sm:$0xff]  }
  0x6c   : > { %v755_v30 = vshrl.u32 %v661_v22, 16  ;;  %v466_v31 = vor.u32 %v464_v15, %v463_v23  ;;  %v610_v32 = vor.u32 %v609_v24, %v606_v16  ;;  %v662_v33 = vld [vmem:[#allocation2 + $0x64] sm:$0xf]  ;;  %v4520_v34 = vrot.slane %v742_v25, 11  ;;  %v513_v36 = vld [vmem:[#allocation2 + $0x50] sm:$0x1]  ;;  %4932 = vmatpush3.bf16.msra.mxu1 %v5281_v55  ;;  %4893 = vmatprep.subr.bf16.mxu0 %v5282_v56 }
  0x6d   : > { %v749_v35 = vrot.slane %v747_v26, 7  ;;  %v515_v38 = vld [vmem:[#allocation2 + $0x5c] sm:$0x1]  ;;  %v624_v39 = vor.u32 %v623_v28, %v620_v27  ;;  %v760_v41 = vshrl.u32 %v662_v33, 16  ;;  %v613_v46 = vshll.u32 %v513_v36, 16  ;;  %v5794_v18 = vld [vmem:[%s6516_s1 + $0x200] sm:$0xff]  }
  0x6e   : > { %v4521_v40 = vrot.slane %v755_v30, 11  ;;  %v467_v44 = vsel %vm5602_vm4, %v4513_v62, %v466_v31  ;;  %v611_v45 = vrot.slane %v610_v32, 4  ;;  %v627_v47 = vshll.u32 %v515_v38, 16  ;;  %v5283_v61 = vld [vmem:[%s6516_s1 + $0x138] sm:$0xff]   ;;  %v783_v0 = vld [vmem:[#allocation2 + $0x10] sm:$0xf] }
  0x6f   : > { %483 = vst [vmem:[#allocation4 + $0xfc] sm:$0xf] %v467_v44  ;;  %v625_v49 = vrot.slane %v624_v39, 4  ;;  %v752_v50 = vor.u32 %v750_v29, %v749_v35  ;;  %v762_v51 = vrot.slane %v760_v41, 7  ;;  %v763_v52 = vshll.u32 %v662_v33, 16  ;;  %v5284_v63 = vld [vmem:[%s6516_s1 + $0x1f8] sm:$0xff]   ;;  %4894 = vmatpush3.bf16.msra.mxu0 %v5283_v61 }
  0x70   : > { %v615_v53 = vrot.slane %v613_v46, 5  ;;  %v629_v54 = vrot.slane %v627_v47, 5  ;;  %v784_v1 = vld [vmem:[#allocation2 + $0x1c] sm:$0xf]  ;;  %791 = vst [vmem:[#allocation4 + $0x10] sm:$0xf] %v783_v0  ;;  %4933 = vmatprep.subr.bf16.mxu1 %v5284_v63  ;;  %5143 = vmatprep.subr.bf16.mxu0 %v5794_v18 }
  0x71   : > { %v753_v57 = vsel %vm5602_vm4, %v4520_v34, %v752_v50  ;;  %v765_v58 = vor.u32 %v763_v52, %v762_v51  ;;  %v799_v2 = vld [vmem:[#allocation2 + $0x10] sm:$0xf]  ;;  %v800_v3 = vld [vmem:[#allocation2 + $0x14] sm:$0x1]  ;;  %792 = vst [vmem:[#allocation4 + $0x34] sm:$0xf] %v784_v1 }
  0x72   : > { %v616_v59 = vsel %vm5628_vm7, %v611_v45, %v615_v53  ;;  %v630_v60 = vsel %vm5628_vm7, %v625_v49, %v629_v54  ;;  %781 = vst [vmem:[#allocation4 + $0xe4] sm:$0xf] %v753_v57  ;;  %v801_v4 = vld [vmem:[#allocation2 + $0x1c] sm:$0xf]  ;;  %v802_v5 = vld [vmem:[#allocation2 + $0x20] sm:$0x1] }
  0x73   : > { %645 = vst [vmem:[#allocation4 + $0xe0] sm:$0xf] %v616_v59  ;;  %646 = vst [vmem:[#allocation4 + $0x104] sm:$0xf] %v630_v60  ;;  %v766_v62 = vsel %vm5602_vm4, %v4521_v40, %v765_v58  ;;  %v816_v6 = vshrl.u32 %v799_v2, 16  ;;  %v819_v7 = vshll.u32 %v799_v2, 16 }
  0x74   : > { %782 = vst [vmem:[#allocation4 + $0x108] sm:$0xf] %v766_v62  ;;  %v5271_v8 = vld [vmem:[#allocation4 + $0xdc] ss:$36 sps:$4 sm:$0xff]   ;;  %v825_v10 = vshll.u32 %v800_v3, 16  ;;  %v830_v13 = vshrl.u32 %v801_v4, 16 }
  0x75   : > { %v818_v11 = vrot.slane %v816_v6, 4  ;;  %v821_v12 = vrot.slane %v819_v7, 5  ;;  %v833_v14 = vshll.u32 %v801_v4, 16  ;;  %2103 = vmatprep.mubr.bf16.mxu0 %v5271_v8  ;;  %v839_v16 = vshll.u32 %v802_v5, 16  ;;  %v5287_v17 = vld [vmem:[%s6516_s1 + $0x1b8] sm:$0xff]  }
  0x76   : > { %v5274_v9 = vld [vmem:[#allocation4 + $0xd8] ss:$36 sps:$4 sm:$0xff]   ;;  %v827_v15 = vrot.slane %v825_v10, 5  ;;  %v832_v20 = vrot.slane %v830_v13, 4  ;;  %4934 = vmatpush3.bf16.msra.mxu1 %v5287_v17  ;;  %v944_v23 = vld [vmem:[#allocation2 + $0x18] sm:$0x8] }
  0x77   : > { %2104 = vmatmul.mubr.bf16.gmra.mrb[12].mxu0 %v5274_v9  ;;  %v822_v19 = vor.u32 %v821_v12, %v818_v11  ;;  %v835_v21 = vrot.slane %v833_v14, 5  ;;  %v841_v22 = vrot.slane %v839_v16, 5  ;;  %v945_v24 = vld [vmem:[#allocation2 + $0x1c] sm:$0xf]  ;;  %v946_v29 = vld [vmem:[#allocation2 + $0x24] sm:$0x8] }
  0x78   : > { %v947_v30 = vld [vmem:[#allocation2 + $0x28] sm:$0xf]  ;;  %v961_v31 = vshrl.u32 %v944_v23, 16  ;;  %v966_v32 = vshrl.u32 %v945_v24, 16  ;;  %v969_v35 = vshll.u32 %v945_v24, 16  ;;  %v974_v36 = vshrl.u32 %v946_v29, 16 }
  0x79   : > { %v823_v27 = vrot.slane %v822_v19, 4  ;;  %v836_v28 = vor.u32 %v835_v21, %v832_v20  ;;  %v1080_v38 = vld [vmem:[#allocation2 + $0x1c] sm:$0xf]  ;;  %v979_v41 = vshrl.u32 %v947_v30, 16  ;;  %v982_v44 = vshll.u32 %v947_v30, 16  ;;  %v5293_v9 = vld [vmem:[%s6516_s1 + $0x208] sm:$0xff]  }
  0x7a   : > { %v5279_v26 = vld [vmem:[#allocation4 + $0xe0] ss:$36 sps:$4 sm:$0xff]   ;;  %v4522_v39 = vrot.slane %v961_v31, 11  ;;  %v968_v40 = vrot.slane %v966_v32, 7  ;;  %v1081_v45 = vld [vmem:[#allocation2 + $0x28] sm:$0xf] }
  0x7b   : > { %v5276_v25 = vld [vmem:[#allocation4 + $0xe4] ss:$36 sps:$4 sm:$0xff]   ;;  %v828_v33 = vsel %vm5628_vm7, %v823_v27, %v827_v15  ;;  %v837_v34 = vrot.slane %v836_v28, 4  ;;  %1088 = vst [vmem:[#allocation4 + $0x1c] sm:$0xf] %v1080_v38  ;;  %v4523_v48 = vrot.slane %v974_v36, 11 }
  0x7c   : > { %2168 = vmatprep.mubr.bf16.mxu1 %v5276_v25  ;;  %935 = vst [vmem:[#allocation4 + $0x14] sm:$0xf] %v828_v33  ;;  %1089 = vst [vmem:[#allocation4 + $0x40] sm:$0xf] %v1081_v45  ;;  %v971_v47 = vor.u32 %v969_v35, %v968_v40  ;;  %v981_v49 = vrot.slane %v979_v41, 7  ;;  %v5297_v30 = vld [vmem:[%s6516_s1 + $0x210] sm:$0xff]  }
  0x7d   : > { %2169 = vmatmul.mubr.bf16.gmra.mrb[12].mxu1 %v5279_v26  ;;  %v842_v46 = vsel %vm5628_vm7, %v837_v34, %v841_v22  ;;  %v785_v50 = vld [vmem:[#allocation2 + $0x28] sm:$0xf]  ;;  %v786_v51 = vld [vmem:[#allocation2 + $0x34] sm:$0xf]  ;;  %v804_v53 = vld [vmem:[#allocation2 + $0x2c] sm:$0x1] }
  0x7e   : > { %936 = vst [vmem:[#allocation4 + $0x38] sm:$0xf] %v842_v46  ;;  %793 = vst [vmem:[#allocation4 + $0x58] sm:$0xf] %v785_v50  ;;  %v803_v52 = vld [vmem:[#allocation2 + $0x28] sm:$0xf]  ;;  %v972_v55 = vsel %vm5602_vm4, %v4522_v39, %v971_v47  ;;  %v984_v56 = vor.u32 %v982_v44, %v981_v49 }
  0x7f   : > { %794 = vst [vmem:[#allocation4 + $0x7c] sm:$0xf] %v786_v51  ;;  %v805_v54 = vld [vmem:[#allocation2 + $0x34] sm:$0xf]  ;;  %v806_v57 = vld [vmem:[#allocation2 + $0x38] sm:$0x1] }
  0x80   : > { %v844_v58 = vshrl.u32 %v803_v52, 16  ;;  %v847_v59 = vshll.u32 %v803_v52, 16  ;;  %1072 = vst [vmem:[#allocation4 + $0x18] sm:$0xf] %v972_v55  ;;  %v853_v60 = vshll.u32 %v804_v53, 16  ;;  %v858_v61 = vshrl.u32 %v805_v54, 16 }
  0x81   : > { %v861_v62 = vshll.u32 %v805_v54, 16  ;;  %v867_v63 = vshll.u32 %v806_v57, 16  ;;  %v985_v0 = vsel %vm5602_vm4, %v4523_v48, %v984_v56  ;;  %v948_v3 = vld [vmem:[#allocation2 + $0x30] sm:$0x8]  ;;  %v949_v4 = vld [vmem:[#allocation2 + $0x34] sm:$0xf] }
  0x82   : > { %v846_v1 = vrot.slane %v844_v58, 4  ;;  %v849_v2 = vrot.slane %v847_v59, 5  ;;  %1073 = vst [vmem:[#allocation4 + $0x3c] sm:$0xf] %v985_v0  ;;  %v855_v5 = vrot.slane %v853_v60, 5  ;;  %v860_v6 = vrot.slane %v858_v61, 4 }
  0x83   : > { %v863_v7 = vrot.slane %v861_v62, 5  ;;  %v869_v8 = vrot.slane %v867_v63, 5  ;;  %v950_v11 = vld [vmem:[#allocation2 + $0x3c] sm:$0x8]  ;;  %v951_v12 = vld [vmem:[#allocation2 + $0x40] sm:$0xf] }
  0x84   : > { %v850_v10 = vor.u32 %v849_v2, %v846_v1  ;;  %v987_v13 = vshrl.u32 %v948_v3, 16  ;;  %v992_v14 = vshrl.u32 %v949_v4, 16  ;;  %v5288_v16 = vld [vmem:[#allocation4 + $0x10] ss:$36 sps:$4 sm:$0xff]   ;;  %v995_v19 = vshll.u32 %v949_v4, 16  ;;  %v5301_v46 = vld [vmem:[%s6516_s1 + $0x218] sm:$0xff]  }
  0x85   : > { %v5285_v15 = vld [vmem:[#allocation4 + $0x14] ss:$36 sps:$4 sm:$0xff]   ;;  %v864_v17 = vor.u32 %v863_v7, %v860_v6  ;;  %v1000_v23 = vshrl.u32 %v950_v11, 16  ;;  %v1082_v24 = vld [vmem:[#allocation2 + $0x34] sm:$0xf]  ;;  %v1005_v26 = vshrl.u32 %v951_v12, 16 }
  0x86   : > { %v851_v20 = vrot.slane %v850_v10, 4  ;;  %v4524_v21 = vrot.slane %v987_v13, 11  ;;  %v994_v22 = vrot.slane %v992_v14, 7  ;;  %2209 = vmatprep.mubr.bf16.mxu0 %v5285_v15  ;;  %v1008_v27 = vshll.u32 %v951_v12, 16  ;;  %v1083_v28 = vld [vmem:[#allocation2 + $0x40] sm:$0xf] }
  0x87   : > { %v865_v25 = vrot.slane %v864_v17, 4  ;;  %1090 = vst [vmem:[#allocation4 + $0x64] sm:$0xf] %v1082_v24  ;;  %2210 = vmatmul.mubr.bf16.vlgmr.msra.gmra.mrb[16].mxu0 %v5288_v16  ;;  %1091 = vst [vmem:[#allocation4 + $0x88] sm:$0xf] %v1083_v28  ;;  %v4525_v33 = vrot.slane %v1000_v23, 11 }
  0x88   : > { %v856_v29 = vsel %vm5628_vm7, %v851_v20, %v855_v5  ;;  %v997_v31 = vor.u32 %v995_v19, %v994_v22  ;;  %5144 = vmatpush3.bf16.msra.mxu0 %v5794_v18  ;;  %v1007_v34 = vrot.slane %v1005_v26, 7  ;;  %v787_v35 = vld [vmem:[#allocation2 + $0x40] sm:$0xf]  ;;  %v788_v36 = vld [vmem:[#allocation2 + $0x4c] sm:$0xf] }
  0x89   : > { %v870_v32 = vsel %vm5628_vm7, %v865_v25, %v869_v8  ;;  %937 = vst [vmem:[#allocation4 + $0x5c] sm:$0xf] %v856_v29  ;;  %v5290_v38 = vld [vmem:[#allocation4 + $0x1c] ss:$36 sps:$4 sm:$0xff]   ;;  %5145 = vmatprep.subr.bf16.mxu0 %v5293_v9  ;;  %795 = vst [vmem:[#allocation4 + $0xa0] sm:$0xf] %v787_v35 }
  0x8a   : > { %v5292_v39 = vld [vmem:[#allocation4 + $0x18] ss:$36 sps:$4 sm:$0xff]   ;;  %938 = vst [vmem:[#allocation4 + $0x80] sm:$0xf] %v870_v32  ;;  %v998_v40 = vsel %vm5602_vm4, %v4524_v21, %v997_v31  ;;  %796 = vst [vmem:[#allocation4 + $0xc4] sm:$0xf] %v788_v36  ;;  %v1010_v41 = vor.u32 %v1008_v27, %v1007_v34  ;;  %2274 = vmatprep.mubr.bf16.mxu1 %v5290_v38 }
  0x8b   : > { %1074 = vst [vmem:[#allocation4 + $0x60] sm:$0xf] %v998_v40  ;;  %v807_v18 = vld [vmem:[#allocation2 + $0x40] sm:$0xf]  ;;  %v808_v44 = vld [vmem:[#allocation2 + $0x44] sm:$0x1]  ;;  %2275 = vmatmul.mubr.bf16.vlgmr.msra.gmra.mrb[16].mxu1 %v5292_v39 }
  0x8c   : > { %v809_v45 = vld [vmem:[#allocation2 + $0x4c] sm:$0xf]  ;;  %v810_v47 = vld [vmem:[#allocation2 + $0x50] sm:$0x1]  ;;  %v872_v48 = vshrl.u32 %v807_v18, 16  ;;  %v875_v49 = vshll.u32 %v807_v18, 16  ;;  %5146 = vmatpush3.bf16.msra.mxu0 %v5293_v9  ;;  %v1011_v52 = vsel %vm5602_vm4, %v4525_v33, %v1010_v41 }
  0x8d   : > { %v881_v50 = vshll.u32 %v808_v44, 16  ;;  %v886_v51 = vshrl.u32 %v809_v45, 16  ;;  %v889_v53 = vshll.u32 %v809_v45, 16  ;;  %v895_v54 = vshll.u32 %v810_v47, 16  ;;  %5147 = vmatprep.subr.bf16.mxu0 %v5297_v30  ;;  %1075 = vst [vmem:[#allocation4 + $0x84] sm:$0xf] %v1011_v52 }
  0x8e   : > { %v874_v55 = vrot.slane %v872_v48, 4  ;;  %v877_v56 = vrot.slane %v875_v49, 5  ;;  %v952_v59 = vld [vmem:[#allocation2 + $0x48] sm:$0x8]  ;;  %v953_v62 = vld [vmem:[#allocation2 + $0x4c] sm:$0xf] }
  0x8f   : > { %v883_v57 = vrot.slane %v881_v50, 5  ;;  %v888_v58 = vrot.slane %v886_v51, 4  ;;  %v891_v60 = vrot.slane %v889_v53, 5  ;;  %v897_v61 = vrot.slane %v895_v54, 5  ;;  %v954_v63 = vld [vmem:[#allocation2 + $0x54] sm:$0x8] }
  0x90   : > { %v878_v0 = vor.u32 %v877_v56, %v874_v55  ;;  %v955_v1 = vld [vmem:[#allocation2 + $0x58] sm:$0xf]  ;;  %v1013_v2 = vshrl.u32 %v952_v59, 16  ;;  %v1018_v3 = vshrl.u32 %v953_v62, 16  ;;  %v1021_v4 = vshll.u32 %v953_v62, 16  ;;  %5148 = vmatpush3.bf16.msra.mxu0 %v5297_v30  ;;  %v5305_v10 = vld [vmem:[%s6516_s1 + $0x220] sm:$0xff]  }
  0x91   : > { %v5294_v5 = vld [vmem:[#allocation4 + $0x5c] ss:$36 sps:$4 sm:$0xff]   ;;  %v892_v7 = vor.u32 %v891_v60, %v888_v58  ;;  %v1026_v8 = vshrl.u32 %v954_v63, 16  ;;  %5149 = vmatprep.subr.bf16.mxu0 %v5301_v46  ;;  %v1031_v13 = vshrl.u32 %v955_v1, 16  ;;  %v1034_v15 = vshll.u32 %v955_v1, 16  ;;  %v5316_v1 = vld [vmem:[%s6516_s1 + $0x238] sm:$0xff]  }
  0x92   : > { %v5296_v6 = vld [vmem:[#allocation4 + $0x58] ss:$36 sps:$4 sm:$0xff]   ;;  %v879_v9 = vrot.slane %v878_v0, 4  ;;  %v4526_v11 = vrot.slane %v1013_v2, 11  ;;  %v1020_v12 = vrot.slane %v1018_v3, 7  ;;  %2217 = vmatprep.mubr.bf16.mxu0 %v5294_v5  ;;  %v5313_v44 = vld [vmem:[%s6516_s1 + $0x230] sm:$0xff]  }
  0x93   : > { %v893_v14 = vrot.slane %v892_v7, 4  ;;  %v1084_v16 = vld [vmem:[#allocation2 + $0x4c] sm:$0xf]  ;;  %2218 = vmatmul.mubr.bf16.gmra.mrb[20].mxu0 %v5296_v6  ;;  %v4527_v20 = vrot.slane %v1026_v8, 11  ;;  %v1033_v21 = vrot.slane %v1031_v13, 7 }
  0x94   : > { %v884_v17 = vsel %vm5628_vm7, %v879_v9, %v883_v57  ;;  %v1023_v19 = vor.u32 %v1021_v4, %v1020_v12  ;;  %v1085_v22 = vld [vmem:[#allocation2 + $0x58] sm:$0xf]  ;;  %1092 = vst [vmem:[#allocation4 + $0xac] sm:$0xf] %v1084_v16  ;;  %v5309_v23 = vld [vmem:[%s6516_s1 + $0x228] sm:$0xff]   ;;  %5150 = vmatpush3.bf16.msra.mxu0 %v5301_v46 }
  0x95   : > { %v5298_v24 = vld [vmem:[#allocation4 + $0x64] ss:$36 sps:$4 sm:$0xff]   ;;  %v898_v26 = vsel %vm5628_vm7, %v893_v14, %v897_v61  ;;  %939 = vst [vmem:[#allocation4 + $0xa4] sm:$0xf] %v884_v17  ;;  %1093 = vst [vmem:[#allocation4 + $0xd0] sm:$0xf] %v1085_v22  ;;  %5151 = vmatprep.subr.bf16.mxu0 %v5305_v10  ;;  %v1036_v28 = vor.u32 %v1034_v15, %v1033_v21 }
  0x96   : > { %v5300_v25 = vld [vmem:[#allocation4 + $0x60] ss:$36 sps:$4 sm:$0xff]   ;;  %940 = vst [vmem:[#allocation4 + $0xc8] sm:$0xf] %v898_v26  ;;  %v1024_v27 = vsel %vm5602_vm4, %v4526_v11, %v1023_v19  ;;  %v271_v29 = vld [vmem:[#allocation2 + $0x68] sm:$0x1]  ;;  %2282 = vmatprep.mubr.bf16.mxu1 %v5298_v24 }
  0x97   : > { %v789_v30 = vld [vmem:[#allocation2 + $0x58] sm:$0xf]  ;;  %1076 = vst [vmem:[#allocation4 + $0xa8] sm:$0xf] %v1024_v27  ;;  %v272_v31 = vsel %vm5597_vm3, 0, %v271_v29  ;;  %2283 = vmatmul.mubr.bf16.gmra.mrb[20].mxu1 %v5300_v25  ;;  %v1037_v34 = vsel %vm5602_vm4, %v4527_v20, %v1036_v28 }
  0x98   : > { %v790_v32 = vld [vmem:[#allocation2 + $0x64] sm:$0xf]  ;;  %797 = vst [vmem:[#allocation4 + $0xe8] sm:$0xf] %v789_v30  ;;  %v811_v33 = vld [vmem:[#allocation2 + $0x58] sm:$0xf]  ;;  %5152 = vmatpush3.bf16.msra.mxu0 %v5305_v10 }
  0x99   : > { %273 = vst [vmem:[#allocation2 + $0x68] sm:$0x1] %v272_v31  ;;  %798 = vst [vmem:[#allocation4 + $0x10c] sm:$0xf] %v790_v32  ;;  %v812_v35 = vld [vmem:[#allocation2 + $0x5c] sm:$0x1]  ;;  %5153 = vmatprep.subr.bf16.mxu0 %v5309_v23 }
  0x9a   : > { %v813_v36 = vld [vmem:[#allocation2 + $0x64] sm:$0xf]  ;;  %v900_v38 = vshrl.u32 %v811_v33, 16  ;;  %v903_v39 = vshll.u32 %v811_v33, 16  ;;  %1077 = vst [vmem:[#allocation4 + $0xcc] sm:$0xf] %v1037_v34 }
  0x9b   : > { %v909_v40 = vshll.u32 %v812_v35, 16  ;;  %v914_v41 = vshrl.u32 %v813_v36, 16  ;;  %v917_v18 = vshll.u32 %v813_v36, 16  ;;  %v956_v47 = vld [vmem:[#allocation2 + $0x60] sm:$0x8] }
  0x9c   : > { %v902_v45 = vrot.slane %v900_v38, 4  ;;  %v905_v46 = vrot.slane %v903_v39, 5  ;;  %v957_v51 = vld [vmem:[#allocation2 + $0x64] sm:$0xf]  ;;  %v1039_v52 = vshrl.u32 %v956_v47, 16  ;;  %5154 = vmatpush3.bf16.msra.mxu0 %v5309_v23 }
  0x9d   : > { %v911_v48 = vrot.slane %v909_v40, 5  ;;  %v916_v49 = vrot.slane %v914_v41, 4  ;;  %v919_v50 = vrot.slane %v917_v18, 5  ;;  %v958_v54 = vld [vmem:[#allocation2 + $0x6c] sm:$0x8]  ;;  %v1044_v56 = vshrl.u32 %v957_v51, 16  ;;  %5155 = vmatprep.subr.bf16.mxu0 %v5313_v44 }
  0x9e   : > { %v906_v53 = vor.u32 %v905_v46, %v902_v45  ;;  %v959_v55 = vld [vmem:[#allocation2 + $0x70] sm:$0xf]  ;;  %v5302_v57 = vld [vmem:[#allocation4 + $0xa4] ss:$36 sps:$4 sm:$0xff]   ;;  %v4528_v60 = vrot.slane %v1039_v52, 11  ;;  %v1047_v63 = vshll.u32 %v957_v51, 16 }
  0x9f   : > { %v5304_v58 = vld [vmem:[#allocation4 + $0xa0] ss:$36 sps:$4 sm:$0xff]   ;;  %v920_v59 = vor.u32 %v919_v50, %v916_v49  ;;  %v1046_v62 = vrot.slane %v1044_v56, 7  ;;  %v1052_v0 = vshrl.u32 %v958_v54, 16  ;;  %2225 = vmatprep.mubr.bf16.mxu0 %v5302_v57  ;;  %v1057_v4 = vshrl.u32 %v959_v55, 16 }
  0xa0   : > { %v907_v61 = vrot.slane %v906_v53, 4  ;;  %v814_v2 = vld [vmem:[#allocation2 + $0x68] sm:$0x1]  ;;  %v1060_v5 = vshll.u32 %v959_v55, 16  ;;  %2226 = vmatmul.mubr.bf16.gmra.mrb[24].mxu0 %v5304_v58  ;;  %v5306_v6 = vld [vmem:[#allocation4 + $0xac] ss:$36 sps:$4 sm:$0xff]  }
  0xa1   : > { %v921_v3 = vrot.slane %v920_v59, 4  ;;  %v5308_v7 = vld [vmem:[#allocation4 + $0xa8] ss:$36 sps:$4 sm:$0xff]   ;;  %v923_v9 = vshll.u32 %v814_v2, 16  ;;  %v1049_v10 = vor.u32 %v1047_v63, %v1046_v62  ;;  %v4529_v11 = vrot.slane %v1052_v0, 11  ;;  %5156 = vmatpush3.bf16.msra.mxu0 %v5313_v44  ;;  %2290 = vmatprep.mubr.bf16.mxu1 %v5306_v6 }
  0xa2   : > { %v912_v8 = vsel %vm5628_vm7, %v907_v61, %v911_v48  ;;  %v1059_v12 = vrot.slane %v1057_v4, 7  ;;  %v1086_v13 = vld [vmem:[#allocation2 + $0x64] sm:$0xf]  ;;  %v1087_v14 = vld [vmem:[#allocation2 + $0x70] sm:$0xf]  ;;  %5157 = vmatprep.subr.bf16.mxu0 %v5316_v1  ;;  %2291 = vmatmul.mubr.bf16.gmra.mrb[24].mxu1 %v5308_v7 }
  0xa3   : > { %941 = vst [vmem:[#allocation4 + $0xec] sm:$0xf] %v912_v8  ;;  %v925_v15 = vrot.slane %v923_v9, 5  ;;  %v1050_v16 = vsel %vm5602_vm4, %v4528_v60, %v1049_v10  ;;  %1094 = vst [vmem:[#allocation4 + $0xf4] sm:$0xf] %v1086_v13 }
  0xa4   : > { %1095 = vst [vmem:[#allocation4 + $0x118] sm:$0xf] %v1087_v14  ;;  %v3004_v17 = vld [vmem:[#allocation3 + $0x6c] sm:$0x8]  ;;  %v3005_v19 = vld [vmem:[#allocation3 + $0x70] sm:$0xf]  ;;  %v1062_v20 = vor.u32 %v1060_v5, %v1059_v12 }
  0xa5   : > { %1078 = vst [vmem:[#allocation4 + $0xf0] sm:$0xf] %v1050_v16  ;;  %v3098_v21 = vshrl.u32 %v3004_v17, 16  ;;  %v3103_v22 = vshrl.u32 %v3005_v19, 16  ;;  %v3106_v23 = vshll.u32 %v3005_v19, 16  ;;  %v926_v24 = vsel %vm5628_vm7, %v921_v3, %v925_v15  ;;  %5158 = vmatpush3.bf16.msra.mxu0 %v5316_v1 }
  0xa6   : > { %v1096_v25 = vld [vmem:[#allocation2 + $0x1c] sm:$0xf]  ;;  %942 = vst [vmem:[#allocation4 + $0x110] sm:$0xf] %v926_v24  ;;  %v1063_v26 = vsel %vm5602_vm4, %v4529_v11, %v1062_v20  ;;  %v1097_v29 = vld [vmem:[#allocation2 + $0x20] sm:$0x1] }
  0xa7   : > { %v4662_v27 = vrot.slane %v3098_v21, 11  ;;  %v3105_v28 = vrot.slane %v3103_v22, 7  ;;  %v1098_v30 = vld [vmem:[#allocation2 + $0x28] sm:$0xf]  ;;  %1079 = vst [vmem:[#allocation4 + $0x114] sm:$0xf] %v1063_v26 }
  0xa8   : > { %v1099_v31 = vld [vmem:[#allocation2 + $0x2c] sm:$0x1]  ;;  %v1113_v32 = vshrl.u32 %v1096_v25, 16  ;;  %v1116_v33 = vshll.u32 %v1096_v25, 16  ;;  %v1122_v34 = vshll.u32 %v1097_v29, 16  ;;  %v1127_v35 = vshrl.u32 %v1098_v30, 16 }
  0xa9   : > { %v3108_v36 = vor.u32 %v3106_v23, %v3105_v28  ;;  %v1130_v38 = vshll.u32 %v1098_v30, 16  ;;  %v1136_v39 = vshll.u32 %v1099_v31, 16  ;;  %v1100_v40 = vld [vmem:[#allocation2 + $0x34] sm:$0xf]  ;;  %v1101_v41 = vld [vmem:[#allocation2 + $0x38] sm:$0x1] }
  0xaa   : > { %v1115_v18 = vrot.slane %v1113_v32, 4  ;;  %v1118_v44 = vrot.slane %v1116_v33, 5  ;;  %v1124_v45 = vrot.slane %v1122_v34, 5  ;;  %v1129_v46 = vrot.slane %v1127_v35, 4  ;;  %v1102_v50 = vld [vmem:[#allocation2 + $0x40] sm:$0xf] }
  0xab   : > { %v3109_v47 = vsel %vm5602_vm4, %v4662_v27, %v3108_v36  ;;  %v1132_v48 = vrot.slane %v1130_v38, 5  ;;  %v1138_v49 = vrot.slane %v1136_v39, 5  ;;  %v1103_v51 = vld [vmem:[#allocation2 + $0x44] sm:$0x1]  ;;  %v3133_v52 = vld [vmem:[#allocation3 + $0x70] sm:$0xf] }
  0xac   : > { %v1119_v53 = vor.u32 %v1118_v44, %v1115_v18  ;;  %v1141_v54 = vshrl.u32 %v1100_v40, 16  ;;  %v1144_v55 = vshll.u32 %v1100_v40, 16  ;;  %v1150_v56 = vshll.u32 %v1101_v41, 16  ;;  %v1273_v57 = vld [vmem:[#allocation4 + $0xf0] sm:$0xff]  ;;  %v1104_v62 = vld [vmem:[#allocation2 + $0x4c] sm:$0xf] }
  0xad   : > { %v1133_v58 = vor.u32 %v1132_v48, %v1129_v46  ;;  %v1155_v59 = vshrl.u32 %v1102_v50, 16  ;;  %v1158_v60 = vshll.u32 %v1102_v50, 16  ;;  %v1164_v61 = vshll.u32 %v1103_v51, 16  ;;  %v1105_v63 = vld [vmem:[#allocation2 + $0x50] sm:$0x1] }
  0xae   : > { %v5310_v0 = vld [vmem:[#allocation4 + $0xec] ss:$36 sps:$4 sm:$0xff]   ;;  %v1120_v2 = vrot.slane %v1119_v53, 4  ;;  %v1278_v3 = vld [vmem:[#allocation4 + $0x114] sm:$0xff]  ;;  %v1143_v6 = vrot.slane %v1141_v54, 4  ;;  %v1146_v7 = vrot.slane %v1144_v55, 5 }
  0xaf   : > { %v5312_v1 = vld [vmem:[#allocation4 + $0xe8] ss:$36 sps:$4 sm:$0xff]   ;;  %v5314_v4 = vld [vmem:[#allocation4 + $0xf4] ss:$36 sps:$4 sm:$0xff]   ;;  %v1134_v5 = vrot.slane %v1133_v58, 4  ;;  %2233 = vmatprep.mubr.bf16.mxu0 %v5310_v0  ;;  %v4564_v8 = vcombine.low %v1273_v57, %v1278_v3  ;;  %v1152_v10 = vrot.slane %v1150_v56, 5 }
  0xb0   : > { %3125 = vst [vmem:[#allocation4 + $0x114] sm:$0xf] %v3109_v47  ;;  %3141 = vst [vmem:[#allocation4 + $0x118] sm:$0xf] %v3133_v52  ;;  %v1125_v9 = vsel %vm5628_vm7, %v1120_v2, %v1124_v45  ;;  %v1157_v11 = vrot.slane %v1155_v59, 4  ;;  %2234 = vmatmul.mubr.bf16.gmra.mrb[28].mxu0 %v5312_v1  ;;  %2298 = vmatprep.mubr.bf16.mxu1 %v5314_v4  ;;  %v1147_v15 = vor.u32 %v1146_v7, %v1143_v6 }
  0xb1   : > { %v1106_v12 = vld [vmem:[#allocation2 + $0x58] sm:$0xf]  ;;  %v1107_v13 = vld [vmem:[#allocation2 + $0x5c] sm:$0x1]  ;;  %v1139_v14 = vsel %vm5628_vm7, %v1134_v5, %v1138_v49  ;;  %1232 = vst [vmem:[#allocation4 + $0x20] sm:$0xf] %v1125_v9  ;;  %2299 = vmatmul.mubr.bf16.gmra.mrb[28].mxu1 %v4564_v8 }
  0xb2   : > { %v1160_v16 = vrot.slane %v1158_v60, 5  ;;  %v1166_v17 = vrot.slane %v1164_v61, 5  ;;  %v276_v19 = vld [vmem:[#allocation2 + $0x74] sm:$0x1]  ;;  %1233 = vst [vmem:[#allocation4 + $0x44] sm:$0xf] %v1139_v14 }
  0xb3   : > { %v1169_v20 = vshrl.u32 %v1104_v62, 16  ;;  %v1172_v21 = vshll.u32 %v1104_v62, 16  ;;  %v1178_v22 = vshll.u32 %v1105_v63, 16  ;;  %v1183_v23 = vshrl.u32 %v1106_v12, 16  ;;  %v326_v24 = vld [vmem:[#allocation3 + $0x74] sm:$0x1] }
  0xb4   : > { %v1148_v25 = vrot.slane %v1147_v15, 4  ;;  %v1161_v26 = vor.u32 %v1160_v16, %v1157_v11  ;;  %v1186_v27 = vshll.u32 %v1106_v12, 16  ;;  %v1192_v28 = vshll.u32 %v1107_v13, 16  ;;  %v1108_v29 = vld [vmem:[#allocation2 + $0x64] sm:$0xf] }
  0xb5   : > { %v1171_v30 = vrot.slane %v1169_v20, 4  ;;  %v1174_v31 = vrot.slane %v1172_v21, 5  ;;  %v1180_v32 = vrot.slane %v1178_v22, 5  ;;  %v1185_v33 = vrot.slane %v1183_v23, 4  ;;  %v1109_v34 = vld [vmem:[#allocation2 + $0x68] sm:$0x1] }
  0xb6   : > { %v1153_v35 = vsel %vm5628_vm7, %v1148_v25, %v1152_v10  ;;  %v1162_v36 = vrot.slane %v1161_v26, 4  ;;  %v1188_v38 = vrot.slane %v1186_v27, 5  ;;  %v1194_v39 = vrot.slane %v1192_v28, 5  ;;  %v1110_v40 = vld [vmem:[#allocation2 + $0x70] sm:$0xf] }
  0xb7   : > { %1234 = vst [vmem:[#allocation4 + $0x68] sm:$0xf] %v1153_v35  ;;  %v1175_v41 = vor.u32 %v1174_v31, %v1171_v30  ;;  %v277_v18 = vsel %vm5597_vm3, 0, %v276_v19  ;;  %v327_v44 = vsel %vm5597_vm3, 0, %v326_v24  ;;  %v1197_v45 = vshrl.u32 %v1108_v29, 16 }
  0xb8   : > { %v3156_v46 = vld [vmem:[#allocation3 + $0x70] sm:$0xf]  ;;  %v1167_v47 = vsel %vm5628_vm7, %v1162_v36, %v1166_v17  ;;  %v1189_v48 = vor.u32 %v1188_v38, %v1185_v33  ;;  %278 = vst [vmem:[#allocation2 + $0x74] sm:$0x1] %v277_v18  ;;  %328 = vst [vmem:[#allocation3 + $0x74] sm:$0x1] %v327_v44 }
  0xb9   : > { %v1200_v49 = vshll.u32 %v1108_v29, 16  ;;  %v1206_v50 = vshll.u32 %v1109_v34, 16  ;;  %1235 = vst [vmem:[#allocation4 + $0x8c] sm:$0xf] %v1167_v47  ;;  %v1176_v51 = vrot.slane %v1175_v41, 4  ;;  %v1199_v52 = vrot.slane %v1197_v45, 4 }
  0xba   : > { %v1211_v53 = vshrl.u32 %v1110_v40, 16  ;;  %v1214_v54 = vshll.u32 %v1110_v40, 16  ;;  %v5317_v55 = vld [vmem:[#allocation4 + $0x20] ss:$36 sps:$4 sm:$0xff]   ;;  %v1190_v56 = vrot.slane %v1189_v48, 4  ;;  %v3257_v0 = vshrl.u32 %v3156_v46, 16 }
  0xbb   : > { %v1202_v57 = vrot.slane %v1200_v49, 5  ;;  %v1181_v58 = vsel %vm5628_vm7, %v1176_v51, %v1180_v32  ;;  %v1208_v59 = vrot.slane %v1206_v50, 5  ;;  %5159 = vmatprep.mubr.bf16.mxu0 %v5317_v55  ;;  %v3260_v1 = vshll.u32 %v3156_v46, 16  ;;  %v5880_v28 = vld [vmem:[%s6517_s2] ss:$0 sm:$0xff] }
  0xbc   : > { %v1213_v60 = vrot.slane %v1211_v53, 4  ;;  %v1216_v61 = vrot.slane %v1214_v54, 5  ;;  %v1195_v62 = vsel %vm5628_vm7, %v1190_v56, %v1194_v39  ;;  %1236 = vst [vmem:[#allocation4 + $0xb0] sm:$0xf] %v1181_v58  ;;  %v3259_v4 = vrot.slane %v3257_v0, 4  ;;  %v5321_v41 = vld [vmem:[%s6518_s3 + $0x40] sm:$0xff]  }
  0xbd   : > { %v1203_v63 = vor.u32 %v1202_v57, %v1199_v52  ;;  %1237 = vst [vmem:[#allocation4 + $0xd4] sm:$0xf] %v1195_v62  ;;  %v3262_v5 = vrot.slane %v3260_v1, 5  ;;  %4971 = vmatprep.subr.bf16.mxu1 %v5321_v41  ;;  %v301_v51 = vld [vmem:[#allocation3 + $0x38] sm:$0x1]  ;;  %v5322_v57 = vld [vmem:[%s6518_s3] sm:$0xff]  }
  0xbe   : > { %v1217_v2 = vor.u32 %v1216_v61, %v1213_v60  ;;  %v302_v55 = vsel %vm5597_vm3, 0, %v301_v51  ;;  %v5323_v60 = vld [vmem:[%s6518_s3 + $0xc0] sm:$0xff]   ;;  %4972 = vmatpush3.bf16.msra.mxu1 %v5322_v57  ;;  %v5326_v0 = vld [vmem:[%s6518_s3 + $0x8] sm:$0xff]   ;;  %v5335_v51 = vld [vmem:[%s6518_s3 + $0xd8] sm:$0xff]  }
  0xbf   : > { %v1204_v3 = vrot.slane %v1203_v63, 4  ;;  %v1111_v6 = vld [vmem:[#allocation2 + $0x74] sm:$0x1]  ;;  %v3157_v8 = vld [vmem:[#allocation3 + $0x74] sm:$0x1]  ;;  %v3263_v12 = vor.u32 %v3262_v5, %v3259_v4  ;;  %v5324_v61 = vld [vmem:[%s6518_s3 + $0x80] sm:$0xff]   ;;  %5011 = vmatprep.subr.bf16.mxu0 %v5323_v60 }
  0xc0   : > { %v1218_v7 = vrot.slane %v1217_v2, 4  ;;  %v5318_v9 = vld [vmem:[#allocation4 + $0x68] ss:$36 sps:$4 sm:$0xff]   ;;  %v1220_v11 = vshll.u32 %v1111_v6, 16  ;;  %v3266_v13 = vshll.u32 %v3157_v8, 16  ;;  %v5325_v63 = vld [vmem:[%s6518_s3 + $0x48] sm:$0xff]  }
  0xc1   : > { %v1209_v10 = vsel %vm5628_vm7, %v1204_v3, %v1208_v59  ;;  %5160 = vmatmul.mubr.bf16.vlgmr.msra.gmra.mrb[32].mxu0 %v5318_v9  ;;  %v3264_v15 = vrot.slane %v3263_v12, 4  ;;  %303 = vst [vmem:[#allocation3 + $0x38] sm:$0x1] %v302_v55  ;;  %4973 = vmatprep.subr.bf16.mxu1 %v5325_v63  ;;  %v5337_v55 = vld [vmem:[%s6518_s3 + $0x60] sm:$0xff]   ;;  %v5342_v63 = vld [vmem:[%s6518_s3 + $0x28] sm:$0xff]  }
  0xc2   : > { %1238 = vst [vmem:[#allocation4 + $0xf8] sm:$0xf] %v1209_v10  ;;  %v1222_v14 = vrot.slane %v1220_v11, 5  ;;  %v3268_v16 = vrot.slane %v3266_v13, 5  ;;  %5012 = vmatpush3.bf16.msra.mxu0 %v5324_v61  ;;  %4974 = vmatpush3.bf16.msra.mxu1 %v5326_v0  ;;  %v5338_v57 = vld [vmem:[%s6518_s3 + $0x20] sm:$0xff]   ;;  %v5341_v61 = vld [vmem:[%s6518_s3 + $0x68] sm:$0xff]  }
  0xc3   : > { %v5340_v60 = vld [vmem:[%s6518_s3 + $0xa0] sm:$0xff]   ;;  %v5343_v0 = vld [vmem:[%s6518_s3 + $0xe8] sm:$0xff]  }
  0xc4   : > { %v5319_v17 = vld [vmem:[#allocation4 + $0xb0] ss:$36 sps:$4 sm:$0xff]   ;;  %v1223_v19 = vsel %vm5628_vm7, %v1218_v7, %v1222_v14  ;;  %v3269_v20 = vsel %vm5628_vm7, %v3264_v15, %v3268_v16  ;;  %v5327_v7 = vld [vmem:[%s6518_s3 + $0xc8] sm:$0xff]  }
  0xc5   : > { %1239 = vst [vmem:[#allocation4 + $0x11c] sm:$0xf] %v1223_v19  ;;  %5163 = vmatprep.mubr.bf16.mxu0 %v5319_v17  ;;  %5013 = vmatprep.subr.bf16.mxu0 %v5327_v7  ;;  %v5328_v19 = vld [vmem:[%s6518_s3 + $0x88] sm:$0xff]   ;;  %v5346_v7 = vld [vmem:[%s6518_s3 + $0x30] sm:$0xff]  }
  0xc6   : > { %5014 = vmatpush3.bf16.msra.mxu0 %v5328_v19  ;;  %v2699_v42 = vld [vmem:[#allocation3 + $0x30] sm:$0x8] }
  0xcc   : > { %v5320_v21 = vld [vmem:[#allocation4 + $0xf8] ss:$36 sps:$4 sm:$0xff]  }
  0xcd   : > { %3285 = vst [vmem:[#allocation4 + $0x11c] sm:$0xf] %v3269_v20  ;;  %5164 = vmatmul.mubr.bf16.gmra.mrb[36].mxu0 %v5320_v21  ;;  %v5329_v20 = vld [vmem:[%s6518_s3 + $0x50] sm:$0xff]   ;;  %v306_v21 = vld [vmem:[#allocation3 + $0x44] sm:$0x1] }
  0xce   : > { %4975 = vmatprep.subr.bf16.mxu1 %v5329_v20 }
 0x10e   : > { %v4815_v22 = vpop.f32.mrb[0].mxu0 }
 0x10f   : > { %v4816_v23 = vpop.f32.mrb[1].mxu0 }
 0x110   : > { %v4817_v24 = vadd.f32 %v4816_v23, %v4815_v22  ;;  %v4818_v25 = vpop.f32.mrb[2].mxu0  ;;  %v307_v22 = vsel %vm5597_vm3, 0, %v306_v21 }
 0x111   : > { %v4819_v26 = vpop.f32.mrb[3].mxu0  ;;  %308 = vst [vmem:[#allocation3 + $0x44] sm:$0x1] %v307_v22  ;;  %v5351_v22 = vld [vmem:[%s6518_s3 + $0xf8] sm:$0xff]  }
 0x112   : > { %v4820_v27 = vadd.f32 %v4819_v26, %v4818_v25  ;;  %v2082_v29 = vadd.f32 %v4817_v24, %v5880_v28 }
 0x114   : > { %v2085_v32 = vadd.f32 %v4820_v27, %v5880_v28 }
 0x117   : > { %v4855_v30 = vpop.f32.mrb[0].mxu1 }
 0x118   : > { %v4856_v31 = vpop.f32.mrb[1].mxu1 }
 0x119   : > { %v4857_v33 = vadd.f32 %v4856_v31, %v4855_v30  ;;  %v4858_v34 = vpop.f32.mrb[2].mxu1  ;;  %v5331_v31 = vld [vmem:[%s6518_s3 + $0xd0] sm:$0xff]  }
 0x11a   : > { %v4859_v35 = vpop.f32.mrb[3].mxu1  ;;  %5015 = vmatprep.subr.bf16.mxu0 %v5331_v31 }
 0x11b   : > { %v5884_v36 = vadd.f32 %v4857_v33, %v2082_v29  ;;  %v4860_v38 = vadd.f32 %v4859_v35, %v4858_v34  ;;  %v5330_v29 = vld [vmem:[%s6518_s3 + $0x10] sm:$0xff]  }
 0x11c   : > { %4976 = vmatpush3.bf16.msra.mxu1 %v5330_v29  ;;  %v5332_v35 = vld [vmem:[%s6518_s3 + $0x90] sm:$0xff]  }
 0x11d   : > { %v5886_v39 = vadd.f32 %v4860_v38, %v2085_v32  ;;  %v296_v32 = vld [vmem:[#allocation3 + $0x2c] sm:$0x1]  ;;  %v286_v38 = vld [vmem:[#allocation3 + $0x14] sm:$0x1]  ;;  %5016 = vmatpush3.bf16.msra.mxu0 %v5332_v35 }
 0x11e   : > { %5017 = vmatprep.subr.bf16.mxu0 %v5335_v51 }
 0x125   : > { %v4821_v40 = vpop.f32.mrb[4].mxu0 }
 0x126   : > { %v4822_v18 = vpop.f32.mrb[5].mxu0 }
 0x127   : > { %v4823_v44 = vadd.f32 %v4822_v18, %v4821_v40  ;;  %v4824_v45 = vpop.f32.mrb[6].mxu0  ;;  %v297_v40 = vsel %vm5597_vm3, 0, %v296_v32  ;;  %v5333_v18 = vld [vmem:[%s6518_s3 + $0x58] sm:$0xff]   ;;  %v311_v32 = vld [vmem:[#allocation3 + $0x50] sm:$0x1] }
 0x128   : > { %v4825_v46 = vpop.f32.mrb[7].mxu0  ;;  %298 = vst [vmem:[#allocation3 + $0x2c] sm:$0x1] %v297_v40  ;;  %4977 = vmatprep.subr.bf16.mxu1 %v5333_v18 }
 0x129   : > { %v4826_v47 = vadd.f32 %v4825_v46, %v4824_v45  ;;  %v2090_v48 = vadd.f32 %v4823_v44, %v5880_v28  ;;  %v287_v44 = vsel %vm5597_vm3, 0, %v286_v38  ;;  %v312_v38 = vsel %vm5597_vm3, 0, %v311_v32 }
 0x12a   : > { %288 = vst [vmem:[#allocation3 + $0x14] sm:$0x1] %v287_v44  ;;  %313 = vst [vmem:[#allocation3 + $0x50] sm:$0x1] %v312_v38 }
 0x12b   : > { %v4861_v49 = vpop.f32.mrb[4].mxu1  ;;  %v2093_v52 = vadd.f32 %v4826_v47, %v5880_v28 }
 0x12c   : > { %v4862_v50 = vpop.f32.mrb[5].mxu1 }
 0x12d   : > { %v4863_v53 = vadd.f32 %v4862_v50, %v4861_v49  ;;  %v4864_v54 = vpop.f32.mrb[6].mxu1  ;;  %v291_v49 = vld [vmem:[#allocation3 + $0x20] sm:$0x1] }
 0x12e   : > { %v4865_v56 = vpop.f32.mrb[7].mxu1 }
 0x12f   : > { %v5898_v58 = vadd.f32 %v4863_v53, %v2090_v48  ;;  %v4866_v59 = vadd.f32 %v4865_v56, %v4864_v54  ;;  %v5334_v48 = vld [vmem:[%s6518_s3 + $0x18] sm:$0xff]  }
 0x130   : > { %4978 = vmatpush3.bf16.msra.mxu1 %v5334_v48  ;;  %v5336_v54 = vld [vmem:[%s6518_s3 + $0x98] sm:$0xff]  }
 0x131   : > { %v5906_v62 = vadd.f32 %v4866_v59, %v2093_v52  ;;  %v292_v52 = vsel %vm5597_vm3, 0, %v291_v49  ;;  %5018 = vmatpush3.bf16.msra.mxu0 %v5336_v54  ;;  %4979 = vmatprep.subr.bf16.mxu1 %v5337_v55  ;;  %v5339_v59 = vld [vmem:[%s6518_s3 + $0xe0] sm:$0xff]  }
 0x132   : > { %293 = vst [vmem:[#allocation3 + $0x20] sm:$0x1] %v292_v52  ;;  %5019 = vmatprep.subr.bf16.mxu0 %v5339_v59 }
 0x134   : > { %4980 = vmatpush3.bf16.msra.mxu1 %v5338_v57 }
 0x135   : > { %5020 = vmatpush3.bf16.msra.mxu0 %v5340_v60  ;;  %4981 = vmatprep.subr.bf16.mxu1 %v5341_v61 }
 0x136   : > { %v4827_v1 = vpop.f32.mrb[8].mxu0  ;;  %5021 = vmatprep.subr.bf16.mxu0 %v5343_v0 }
 0x137   : > { %v4828_v2 = vpop.f32.mrb[9].mxu0 }
 0x138   : > { %v4829_v3 = vadd.f32 %v4828_v2, %v4827_v1  ;;  %v4830_v4 = vpop.f32.mrb[10].mxu0  ;;  %4982 = vmatpush3.bf16.msra.mxu1 %v5342_v63  ;;  %v5344_v2 = vld [vmem:[%s6518_s3 + $0xa8] sm:$0xff]  }
 0x139   : > { %v4831_v5 = vpop.f32.mrb[11].mxu0  ;;  %5022 = vmatpush3.bf16.msra.mxu0 %v5344_v2 }
 0x13a   : > { %v4832_v6 = vadd.f32 %v4831_v5, %v4830_v4  ;;  %v2098_v8 = vadd.f32 %v4829_v3, %v5880_v28  ;;  %v5345_v4 = vld [vmem:[%s6518_s3 + $0x70] sm:$0xff]  }
 0x13b   : > { %4983 = vmatprep.subr.bf16.mxu1 %v5345_v4  ;;  %v2403_v4 = vld [vmem:[#allocation3 + $0x24] sm:$0x8] }
 0x13c   : > { %v2101_v11 = vadd.f32 %v4832_v6, %v5880_v28  ;;  %4984 = vmatpush3.bf16.msra.mxu1 %v5346_v7  ;;  %v2399_v7 = vld [vmem:[#allocation3 + $0xc] sm:$0x8] }
 0x13d   : > { %v4867_v9 = vpop.f32.mrb[8].mxu1 }
 0x13e   : > { %v4868_v10 = vpop.f32.mrb[9].mxu1 }
 0x13f   : > { %v4869_v12 = vadd.f32 %v4868_v10, %v4867_v9  ;;  %v4870_v13 = vpop.f32.mrb[10].mxu1  ;;  %v5347_v9 = vld [vmem:[%s6518_s3 + $0xf0] sm:$0xff]  }
 0x140   : > { %v4871_v14 = vpop.f32.mrb[11].mxu1  ;;  %5023 = vmatprep.subr.bf16.mxu0 %v5347_v9 }
 0x141   : > { %v5919_v15 = vadd.f32 %v4869_v12, %v2098_v8  ;;  %v4872_v16 = vadd.f32 %v4871_v14, %v4870_v13  ;;  %v5348_v12 = vld [vmem:[%s6518_s3 + $0xb0] sm:$0xff]   ;;  %v5349_v14 = vld [vmem:[%s6518_s3 + $0x78] sm:$0xff]  }
 0x142   : > { %5024 = vmatpush3.bf16.msra.mxu0 %v5348_v12  ;;  %4985 = vmatprep.subr.bf16.mxu1 %v5349_v14  ;;  %v2556_v12 = vld [vmem:[#allocation3 + $0x2c] sm:$0x1]  ;;  %v2401_v14 = vld [vmem:[#allocation3 + $0x18] sm:$0x8] }
 0x143   : > { %v5921_v17 = vadd.f32 %v4872_v16, %v2101_v11  ;;  %5025 = vmatprep.subr.bf16.mxu0 %v5351_v22  ;;  %v2453_v22 = vshrl.u32 %v2403_v4, 16 }
 0x14a   : > { %v4833_v23 = vpop.f32.mrb[12].mxu0 }
 0x14b   : > { %v4834_v24 = vpop.f32.mrb[13].mxu0 }
 0x14c   : > { %v4835_v25 = vadd.f32 %v4834_v24, %v4833_v23  ;;  %v4836_v26 = vpop.f32.mrb[14].mxu0  ;;  %v5355_v24 = vld [vmem:[%s6518_s3 + $0xb8] sm:$0xff]  }
 0x14d   : > { %v4837_v27 = vpop.f32.mrb[15].mxu0  ;;  %5026 = vmatpush3.bf16.msra.mxu0 %v5355_v24 }
 0x14e   : > { %v4838_v30 = vadd.f32 %v4837_v27, %v4836_v26  ;;  %v2106_v33 = vadd.f32 %v4835_v25, %v5880_v28  ;;  %v5356_v26 = vld [vmem:[%s6518_s3 + $0x140] sm:$0xff]  }
 0x14f   : > { %v5363_v27 = vld [vmem:[%s6518_s3 + $0x1c0] sm:$0xff]  }
 0x150   : > { %v4873_v34 = vpop.f32.mrb[12].mxu1  ;;  %v2109_v45 = vadd.f32 %v4838_v30, %v5880_v28  ;;  %5091 = vmatprep.subr.bf16.mxu0 %v5363_v27  ;;  %v2617_v27 = vshll.u32 %v2556_v12, 16 }
 0x151   : > { %v4874_v41 = vpop.f32.mrb[13].mxu1 }
 0x152   : > { %v4875_v46 = vadd.f32 %v4874_v41, %v4873_v34  ;;  %v4876_v47 = vpop.f32.mrb[14].mxu1 }
 0x153   : > { %v4877_v50 = vpop.f32.mrb[15].mxu1 }
 0x154   : > { %v5957_v53 = vadd.f32 %v4875_v46, %v2106_v33  ;;  %v4878_v28 = vadd.f32 %v4877_v50, %v4876_v47  ;;  %v316_v33 = vld [vmem:[#allocation3 + $0x5c] sm:$0x1] }
 0x155   : > { %v317_v40 = vsel %vm5597_vm3, 0, %v316_v33 }
 0x156   : > { %v5965_v56 = vadd.f32 %v4878_v28, %v2109_v45  ;;  %318 = vst [vmem:[#allocation3 + $0x5c] sm:$0x1] %v317_v40 }
 0x15a   : > { %v4895_v1 = vpop.f32.mrb[16].mxu0 }
 0x15b   : > { %v4896_v3 = vpop.f32.mrb[17].mxu0 }
 0x15c   : > { %v4897_v5 = vadd.f32 %v4896_v3, %v4895_v1  ;;  %v4898_v6 = vpop.f32.mrb[18].mxu0  ;;  %v3147_v1 = vld [vmem:[#allocation3 + $0x38] sm:$0x1]  ;;  %v3149_v3 = vld [vmem:[#allocation3 + $0x44] sm:$0x1] }
 0x15d   : > { %v4899_v8 = vpop.f32.mrb[19].mxu0 }
 0x15e   : > { %v2212_v10 = vadd.f32 %v4897_v5, %v5884_v36  ;;  %v4900_v11 = vadd.f32 %v4899_v8, %v4898_v6  ;;  %v4935_v13 = vpop.f32.mrb[16].mxu1  ;;  %v5350_v36 = vld [vmem:[%s6518_s3 + $0x38] sm:$0xff]  }
 0x15f   : > { %v4936_v19 = vpop.f32.mrb[17].mxu1  ;;  %4986 = vmatpush3.bf16.msra.mxu1 %v5350_v36  ;;  %v2697_v8 = vld [vmem:[#allocation3 + $0x24] sm:$0x8]  ;;  %v3210_v36 = vshll.u32 %v3149_v3, 16 }
 0x160   : > { %v2215_v16 = vadd.f32 %v4900_v11, %v5886_v39  ;;  %v4937_v20 = vadd.f32 %v4936_v19, %v4935_v13  ;;  %v4938_v21 = vpop.f32.mrb[18].mxu1  ;;  %5051 = vmatprep.subr.bf16.mxu1 %v5356_v26  ;;  %v2693_v11 = vld [vmem:[#allocation3 + $0xc] sm:$0x8]  ;;  %v321_v13 = vld [vmem:[#allocation3 + $0x68] sm:$0x1]  ;;  %v3196_v19 = vshll.u32 %v3147_v1, 16 }
 0x161   : > { %v4939_v23 = vpop.f32.mrb[19].mxu1  ;;  %v2736_v24 = vshrl.u32 %v2697_v8, 16  ;;  %v6044_v33 = vrot.slane %v3210_v36, 5  ;;  %v2701_v1 = vld [vmem:[#allocation3 + $0x3c] sm:$0x8] }
 0x162   : > { %v4940_v39 = vadd.f32 %v4939_v23, %v4938_v21  ;;  %v6014_v25 = vadd.f32 %v4937_v20, %v2212_v10  ;;  %v2695_v21 = vld [vmem:[#allocation3 + $0x18] sm:$0x8]  ;;  %v2710_v23 = vshrl.u32 %v2693_v11, 16  ;;  %v6042_v32 = vrot.slane %v3196_v19, 5  ;;  %v2411_v19 = vld [vmem:[#allocation3 + $0x54] sm:$0x8] }
 0x163   : > { %6528 = vst [vmem:[#allocation5_spill] sm:$0xff] %v6044_v33  ;;  %v6052_v40 = vrot.slane %v2736_v24, 11 }
 0x164   : > { %v6022_v29 = vadd.f32 %v4940_v39, %v2215_v16  ;;  %v322_v16 = vsel %vm5597_vm3, 0, %v321_v13  ;;  %v2440_v39 = vshrl.u32 %v2401_v14, 16  ;;  %v6050_v38 = vrot.slane %v2710_v23, 11  ;;  %v2703_v14 = vld [vmem:[#allocation3 + $0x48] sm:$0x8] }
 0x165   : > { %323 = vst [vmem:[#allocation3 + $0x68] sm:$0x1] %v322_v16  ;;  %v2409_v16 = vld [vmem:[#allocation3 + $0x48] sm:$0x8]  ;;  %v2775_v24 = vshrl.u32 %v2703_v14, 16 }
 0x166   : > { %v4901_v30 = vpop.f32.mrb[20].mxu0 }
 0x167   : > { %v4902_v31 = vpop.f32.mrb[21].mxu0 }
 0x168   : > { %v4903_v34 = vadd.f32 %v4902_v31, %v4901_v30  ;;  %v4904_v35 = vpop.f32.mrb[22].mxu0  ;;  %v2723_v30 = vshrl.u32 %v2695_v21, 16  ;;  %v2554_v31 = vld [vmem:[#allocation3 + $0x20] sm:$0x1]  ;;  %v2707_v21 = vld [vmem:[#allocation3 + $0x60] sm:$0x8] }
 0x169   : > { %v4905_v41 = vpop.f32.mrb[23].mxu0 }
 0x16a   : > { %v2220_v18 = vadd.f32 %v4903_v34, %v5898_v58  ;;  %v4941_v44 = vpop.f32.mrb[20].mxu1  ;;  %v4906_v45 = vadd.f32 %v4905_v41, %v4904_v35  ;;  %v6048_v35 = vrot.slane %v2453_v22, 11  ;;  %v2848_v22 = vld [vmem:[#allocation3 + $0x20] sm:$0x1] }
 0x16b   : > { %v4942_v46 = vpop.f32.mrb[21].mxu1 }
 0x16c   : > { %v2223_v47 = vadd.f32 %v4906_v45, %v5906_v62  ;;  %v4943_v48 = vadd.f32 %v4942_v46, %v4941_v44  ;;  %v4944_v49 = vpop.f32.mrb[22].mxu1  ;;  %v2603_v45 = vshll.u32 %v2554_v31, 16  ;;  %v6058_v46 = vrot.slane %v2617_v27, 5 }
 0x16d   : > { %v4945_v50 = vpop.f32.mrb[23].mxu1  ;;  %v2505_v31 = vshrl.u32 %v2411_v19, 16 }
 0x16e   : > { %v4946_v51 = vadd.f32 %v4945_v50, %v4944_v49  ;;  %v6030_v52 = vadd.f32 %v4943_v48, %v2220_v18  ;;  %v6054_v18 = vrot.slane %v2440_v39, 11  ;;  %v6060_v49 = vrot.slane %v2723_v30, 11  ;;  %v2990_v39 = vld [vmem:[#allocation3 + $0x18] sm:$0x8] }
 0x16f   : > { %v2749_v50 = vshrl.u32 %v2699_v42, 16  ;;  %v6063_v4 = vrot.slane %v2603_v45, 5  ;;  %v2492_v30 = vshrl.u32 %v2409_v16, 16  ;;  %v2850_v42 = vld [vmem:[#allocation3 + $0x2c] sm:$0x1]  ;;  %v2801_v45 = vshrl.u32 %v2707_v21, 16 }
 0x170   : > { %v6032_v28 = vadd.f32 %v4946_v51, %v2223_v47  ;;  %v2405_v51 = vld [vmem:[#allocation3 + $0x30] sm:$0x8] }
 0x173   : > { %v4907_v54 = vpop.f32.mrb[24].mxu0 }
 0x174   : > { %v4908_v55 = vpop.f32.mrb[25].mxu0 }
 0x175   : > { %v4909_v57 = vadd.f32 %v4908_v55, %v4907_v54  ;;  %v4910_v59 = vpop.f32.mrb[26].mxu0  ;;  %v4947_v60 = vpop.f32.mrb[24].mxu1 }
 0x176   : > { %v4911_v61 = vpop.f32.mrb[27].mxu0  ;;  %v4948_v0 = vpop.f32.mrb[25].mxu1 }
 0x177   : > { %v2228_v58 = vadd.f32 %v4909_v57, %v5919_v15  ;;  %v4912_v63 = vadd.f32 %v4911_v61, %v4910_v59  ;;  %v4949_v62 = vadd.f32 %v4948_v0, %v4947_v60  ;;  %v4950_v2 = vpop.f32.mrb[26].mxu1  ;;  %v2552_v15 = vld [vmem:[#allocation3 + $0x14] sm:$0x1]  ;;  %v2407_v59 = vld [vmem:[#allocation3 + $0x3c] sm:$0x8] }
 0x178   : > { %v4951_v6 = vpop.f32.mrb[27].mxu1  ;;  %v2589_v26 = vshll.u32 %v2552_v15, 16  ;;  %v2558_v60 = vld [vmem:[#allocation3 + $0x38] sm:$0x1]  ;;  %v2560_v0 = vld [vmem:[#allocation3 + $0x44] sm:$0x1] }
 0x179   : > { %v2231_v5 = vadd.f32 %v4912_v63, %v5921_v17  ;;  %v4952_v9 = vadd.f32 %v4951_v6, %v4950_v2  ;;  %v6036_v10 = vadd.f32 %v4949_v62, %v2228_v58  ;;  %v2427_v17 = vshrl.u32 %v2399_v7, 16 }
 0x17a   : > { %v6056_v44 = vrot.slane %v2589_v26, 5  ;;  %v6065_v7 = vrot.slane %v2749_v50, 11  ;;  %v2479_v8 = vshrl.u32 %v2407_v59, 16  ;;  %v2645_v13 = vshll.u32 %v2560_v0, 16  ;;  %v2992_v26 = vld [vmem:[#allocation3 + $0x24] sm:$0x8] }
 0x17b   : > { %v6040_v20 = vadd.f32 %v4952_v9, %v2231_v5  ;;  %v6046_v34 = vrot.slane %v2427_v17, 11  ;;  %v2466_v5 = vshrl.u32 %v2405_v51, 16  ;;  %v2631_v9 = vshll.u32 %v2558_v60, 16  ;;  %v2846_v17 = vld [vmem:[#allocation3 + $0x14] sm:$0x1] }
 0x17c   : > { %v2762_v15 = vshrl.u32 %v2701_v1, 16  ;;  %v6074_v27 = vrot.slane %v2479_v8, 11  ;;  %v6078_v50 = vrot.slane %v2645_v13, 5  ;;  %v2562_v59 = vld [vmem:[#allocation3 + $0x50] sm:$0x1] }
 0x17d   : > { %v6072_v23 = vrot.slane %v2466_v5, 11  ;;  %v2564_v60 = vld [vmem:[#allocation3 + $0x5c] sm:$0x1]  ;;  %v2852_v0 = vld [vmem:[#allocation3 + $0x38] sm:$0x1] }
 0x17e   : > { %6529 = vst [vmem:[#allocation6_spill] sm:$0xff] %v6074_v27  ;;  %6530 = vst [vmem:[#allocation7_spill] sm:$0xff] %v6078_v50  ;;  %v6080_v51 = vrot.slane %v2762_v15, 11  ;;  %v2994_v1 = vld [vmem:[#allocation3 + $0x30] sm:$0x8] }
 0x17f   : > { %v3033_v21 = vshrl.u32 %v2994_v1, 16  ;;  %v3151_v1 = vld [vmem:[#allocation3 + $0x50] sm:$0x1] }
 0x180   : > { %6531 = vst [vmem:[#allocation8_spill] sm:$0xff] %v6080_v51 }
 0x183   : > { %v4913_v41 = vpop.f32.mrb[28].mxu0 }
 0x184   : > { %v4914_v47 = vpop.f32.mrb[29].mxu0  ;;  %v4953_v48 = vpop.f32.mrb[28].mxu1 }
 0x185   : > { %v4915_v54 = vadd.f32 %v4914_v47, %v4913_v41  ;;  %v4916_v55 = vpop.f32.mrb[30].mxu0  ;;  %v4954_v57 = vpop.f32.mrb[29].mxu1  ;;  %v2871_v47 = vshll.u32 %v2846_v17, 16  ;;  %v2854_v17 = vld [vmem:[#allocation3 + $0x44] sm:$0x1] }
 0x186   : > { %v4917_v61 = vpop.f32.mrb[31].mxu0  ;;  %v4955_v58 = vadd.f32 %v4954_v57, %v4953_v48  ;;  %v4956_v63 = vpop.f32.mrb[30].mxu1  ;;  %v2885_v48 = vshll.u32 %v2848_v22, 16  ;;  %v6082_v57 = vrot.slane %v2775_v24, 11 }
 0x187   : > { %v2236_v62 = vadd.f32 %v4915_v54, %v5957_v53  ;;  %v4918_v2 = vadd.f32 %v4917_v61, %v4916_v55  ;;  %v4957_v3 = vpop.f32.mrb[31].mxu1  ;;  %v2705_v53 = vld [vmem:[#allocation3 + $0x54] sm:$0x8]  ;;  %v3007_v54 = vshrl.u32 %v2990_v39, 16  ;;  %v3020_v55 = vshrl.u32 %v2992_v26, 16 }
 0x188   : > { %v4958_v6 = vadd.f32 %v4957_v3, %v4956_v63  ;;  %v2788_v41 = vshrl.u32 %v2705_v53, 16  ;;  %6532 = vst [vmem:[#allocation9_spill] sm:$0xff] %v6082_v57  ;;  %v2899_v61 = vshll.u32 %v2850_v42, 16  ;;  %v6086_v63 = vrot.slane %v2505_v31, 11  ;;  %v2856_v26 = vld [vmem:[#allocation3 + $0x50] sm:$0x1] }
 0x189   : > { %v2239_v11 = vadd.f32 %v4918_v2, %v5965_v56  ;;  %v6068_v12 = vadd.f32 %v4955_v58, %v2236_v62  ;;  %v6076_v56 = vrot.slane %v2631_v9, 5  ;;  %v6084_v58 = vrot.slane %v2492_v30, 11  ;;  %v2998_v30 = vld [vmem:[#allocation3 + $0x48] sm:$0x8] }
 0x18a   : > { %6534 = vst [vmem:[#allocation11_spill] sm:$0xff] %v6086_v63  ;;  %v6088_v62 = vrot.slane %v2788_v41, 11  ;;  %v6090_v2 = vrot.slane %v2801_v45, 11  ;;  %v6092_v3 = vrot.slane %v2871_v47, 5  ;;  %v6094_v5 = vrot.slane %v2885_v48, 5 }
 0x18b   : > { %v6070_v36 = vadd.f32 %v4958_v6, %v2239_v11  ;;  %6533 = vst [vmem:[#allocation10_spill] sm:$0xff] %v6084_v58  ;;  %v2996_v6 = vld [vmem:[#allocation3 + $0x3c] sm:$0x8]  ;;  %v2659_v9 = vshll.u32 %v2562_v59, 16  ;;  %v2673_v11 = vshll.u32 %v2564_v60, 16  ;;  %v6096_v13 = vrot.slane %v3007_v54, 11 }
 0x18c   : > { %6535 = vst [vmem:[#allocation12_spill] sm:$0xff] %v6088_v62  ;;  %6536 = vst [vmem:[#allocation13_spill] sm:$0xff] %v6090_v2  ;;  %v6098_v14 = vrot.slane %v3020_v55, 11  ;;  %v6101_v19 = vrot.slane %v2899_v61, 5  ;;  %v2913_v53 = vshll.u32 %v2852_v0, 16  ;;  %v3046_v39 = vshrl.u32 %v2996_v6, 16 }
 0x18d   : > { %v3000_v45 = vld [vmem:[#allocation3 + $0x54] sm:$0x8]  ;;  %v2858_v47 = vld [vmem:[#allocation3 + $0x5c] sm:$0x1]  ;;  %v2927_v54 = vshll.u32 %v2854_v17, 16  ;;  %v2941_v0 = vshll.u32 %v2856_v26, 16 }
 0x18e   : > { %6537 = vst [vmem:[#allocation14_spill] sm:$0xff] %v6098_v14  ;;  %6538 = vst [vmem:[#allocation15_spill] sm:$0xff] %v6101_v19  ;;  %v3002_v55 = vld [vmem:[#allocation3 + $0x60] sm:$0x8]  ;;  %v3143_v59 = vld [vmem:[#allocation3 + $0x20] sm:$0x1] }
 0x18f   : > { %v3153_v2 = vld [vmem:[#allocation3 + $0x5c] sm:$0x1]  ;;  %v2955_v62 = vshll.u32 %v2858_v47, 16  ;;  %v3168_v17 = vshll.u32 %v3143_v59, 16  ;;  %v3224_v63 = vshll.u32 %v3151_v1, 16  ;;  %v6108_v26 = vrot.slane %v2673_v11, 5 }
 0x190   : > { %v6116_v47 = vrot.slane %v2927_v54, 5  ;;  %v6120_v59 = vrot.slane %v2941_v0, 5 }
 0x191   : > { %6540 = vst [vmem:[#allocation17_spill] sm:$0xff] %v6108_v26  ;;  %v6126_v11 = vrot.slane %v2955_v62, 5 }
 0x192   : > { %6544 = vst [vmem:[#allocation21_spill] sm:$0xff] %v6116_v47  ;;  %6546 = vst [vmem:[#allocation23_spill] sm:$0xff] %v6120_v59 }
 0x193   : > { %6549 = vst [vmem:[#allocation26_spill] sm:$0xff] %v6126_v11 }
 0x194   : > { %v5161_v8 = vpop.f32.mrb[32].mxu0 }
 0x195   : > { %v2350_v15 = vadd.f32 %v5161_v8, %v6030_v52  ;;  %v2341_v16 = vpop.f32.mrb[33].mxu0 }
 0x196   : > { %v2342_v22 = vadd.f32 %v2341_v16, %v6014_v25  ;;  %v5162_v24 = vpop.f32.mrb[34].mxu0  ;;  %v3145_v25 = vld [vmem:[#allocation3 + $0x2c] sm:$0x1]  ;;  %v3059_v16 = vshrl.u32 %v2998_v30, 16  ;;  %v6110_v30 = vrot.slane %v2913_v53, 5  ;;  %v6130_v53 = vrot.slane %v3168_v17, 5 }
 0x197   : > { %v2374_v31 = vmax.f32 %v2350_v15, 0.0  ;;  %v2353_v42 = vadd.f32 %v5162_v24, %v6032_v28  ;;  %v2344_v41 = vpop.f32.mrb[35].mxu0  ;;  %v2860_v15 = vld [vmem:[#allocation3 + $0x68] sm:$0x1]  ;;  %v3072_v24 = vshrl.u32 %v3000_v45, 16  ;;  %v6114_v45 = vrot.slane %v3046_v39, 11 }
 0x198   : > { %v2372_v48 = vmax.f32 %v2342_v22, 0.0  ;;  %v2345_v52 = vadd.f32 %v2344_v41, %v6022_v29  ;;  %v3085_v22 = vshrl.u32 %v3002_v55, 16  ;;  %v3182_v41 = vshll.u32 %v3145_v25, 16  ;;  %6541 = vst [vmem:[#allocation18_spill] sm:$0xff] %v6110_v30  ;;  %v6118_v55 = vld [vmem:[#allocation3 + $0x68] sm:$0x1] }
 0x199   : > { %v2382_v60 = vpack.c.bf16 %v2374_v31, %v2374_v31  ;;  %v2375_v61 = vmax.f32 %v2353_v42, 0.0  ;;  %v6106_v31 = vrot.slane %v2659_v9, 5  ;;  %v2969_v42 = vshll.u32 %v2860_v15, 16  ;;  %6543 = vst [vmem:[#allocation20_spill] sm:$0xff] %v6114_v45  ;;  %6545 = vst [vmem:[#allocation22_spill] sm:$0xff] %v6118_v55 }
 0x19a   : > { %v2380_v6 = vpack.c.bf16 %v2372_v48, %v2372_v48  ;;  %v2373_v8 = vmax.f32 %v2345_v52, 0.0  ;;  %v3238_v48 = vshll.u32 %v3153_v2, 16  ;;  %v6112_v52 = vrot.slane %v3033_v21, 11  ;;  %6551 = vst [vmem:[#allocation28_spill] sm:$0xff] %v6130_v53 }
 0x19b   : > { %2391 = vst [vmem:[#allocation3 + $0x28] sm:$0xf] %v2382_v60  ;;  %v2383_v28 = vpack.c.bf16 %v2375_v61, %v2375_v61  ;;  %6539 = vst [vmem:[#allocation16_spill] sm:$0xff] %v6106_v31  ;;  %v6122_v60 = vrot.slane %v3059_v16, 11  ;;  %v6124_v9 = vrot.slane %v3072_v24, 11  ;;  %v6128_v61 = vrot.slane %v3085_v22, 11 }
 0x19c   : > { %2389 = vst [vmem:[#allocation3 + $0x10] sm:$0xf] %v2380_v6  ;;  %v2381_v29 = vpack.c.bf16 %v2373_v8, %v2373_v8  ;;  %6542 = vst [vmem:[#allocation19_spill] sm:$0xff] %v6112_v52  ;;  %v6132_v21 = vrot.slane %v3182_v41, 5  ;;  %v6134_v39 = vrot.slane %v3224_v63, 5  ;;  %v6139_v25 = vrot.slane %v2969_v42, 5 }
 0x19d   : > { %2392 = vst [vmem:[#allocation3 + $0x34] sm:$0xf] %v2383_v28  ;;  %6547 = vst [vmem:[#allocation24_spill] sm:$0xff] %v6122_v60  ;;  %v6141_v1 = vrot.slane %v3238_v48, 5 }
 0x19e   : > { %2390 = vst [vmem:[#allocation3 + $0x1c] sm:$0xf] %v2381_v29  ;;  %6548 = vst [vmem:[#allocation25_spill] sm:$0xff] %v6124_v9 }
 0x19f   : > { %6550 = vst [vmem:[#allocation27_spill] sm:$0xff] %v6128_v61  ;;  %6552 = vst [vmem:[#allocation29_spill] sm:$0xff] %v6132_v21 }
 0x1a0   : > { %v5165_v2 = vpop.f32.mrb[36].mxu0  ;;  %6553 = vst [vmem:[#allocation30_spill] sm:$0xff] %v6134_v39  ;;  %6554 = vst [vmem:[#allocation31_spill] sm:$0xff] %v6139_v25 }
 0x1a1   : > { %v6137_v54 = vadd.f32 %v5165_v2, %v6068_v12  ;;  %v2357_v0 = vpop.f32.mrb[37].mxu0  ;;  %6555 = vst [vmem:[#allocation32_spill] sm:$0xff] %v6141_v1 }
 0x1a2   : > { %v2404_v6 = vld [vmem:[#allocation3 + $0x28] sm:$0xf]  ;;  %v6145_v15 = vadd.f32 %v2357_v0, %v6036_v10 }
 0x1a3   : > { %v2536_v8 = vld [vmem:[#allocation3 + $0x28] sm:$0xf]  ;;  %v2458_v28 = vshrl.u32 %v2404_v6, 16  ;;  %v2461_v24 = vshll.u32 %v2404_v6, 16  ;;  %v2845_v26 = vld [vmem:[#allocation3 + $0x10] sm:$0xf] }
 0x1a4   : > { %v2555_v16 = vld [vmem:[#allocation3 + $0x28] sm:$0xf]  ;;  %2544 = vst [vmem:[#allocation4 + $0x70] sm:$0xf] %v2536_v8  ;;  %v2406_v58 = vld [vmem:[#allocation3 + $0x34] sm:$0xf] }
 0x1a5   : > { %v2608_v63 = vshrl.u32 %v2555_v16, 16  ;;  %v2611_v22 = vshll.u32 %v2555_v16, 16  ;;  %v2698_v29 = vld [vmem:[#allocation3 + $0x28] sm:$0xf]  ;;  %v2460_v48 = vrot.slane %v2458_v28, 7 }
 0x1a6   : > { %v2741_v12 = vshrl.u32 %v2698_v29, 16  ;;  %v2744_v17 = vshll.u32 %v2698_v29, 16  ;;  %v2831_v41 = vld [vmem:[#allocation3 + $0x28] sm:$0xf]  ;;  %v2400_v29 = vld [vmem:[#allocation3 + $0x10] sm:$0xf] }
 0x1a7   : > { %v2849_v42 = vld [vmem:[#allocation3 + $0x28] sm:$0xf]  ;;  %v2610_v2 = vrot.slane %v2608_v63, 4  ;;  %v2613_v1 = vrot.slane %v2611_v22, 5  ;;  %2839 = vst [vmem:[#allocation4 + $0x58] sm:$0xf] %v2831_v41  ;;  %v6147_v6 = vor.u32 %v2461_v24, %v2460_v48 }
 0x1a8   : > { %v2890_v62 = vshrl.u32 %v2849_v42, 16  ;;  %v2993_v39 = vld [vmem:[#allocation3 + $0x28] sm:$0xf]  ;;  %v2743_v61 = vrot.slane %v2741_v12, 7  ;;  %v2893_v25 = vshll.u32 %v2849_v42, 16  ;;  %v6152_v12 = vpop.f32.mrb[38].mxu0 }
 0x1a9   : > { %v3025_v10 = vshrl.u32 %v2993_v39, 16  ;;  %v3028_v0 = vshll.u32 %v2993_v39, 16  ;;  %v3127_v11 = vld [vmem:[#allocation3 + $0x28] sm:$0xf]  ;;  %v2614_v16 = vor.u32 %v2613_v1, %v2610_v2  ;;  %v2534_v41 = vld [vmem:[#allocation3 + $0x10] sm:$0xf] }
 0x1aa   : > { %v2892_v9 = vrot.slane %v2890_v62, 4  ;;  %v3144_v8 = vld [vmem:[#allocation3 + $0x28] sm:$0xf]  ;;  %3135 = vst [vmem:[#allocation4 + $0x40] sm:$0xf] %v3127_v11  ;;  %v6150_v28 = vor.u32 %v2744_v17, %v2743_v61  ;;  %v2895_v63 = vrot.slane %v2893_v25, 5 }
 0x1ab   : > { %v3027_v22 = vrot.slane %v3025_v10, 7  ;;  %v3173_v59 = vshrl.u32 %v3144_v8, 16  ;;  %v6154_v42 = vrot.slane %v2614_v16, 4  ;;  %v3176_v39 = vshll.u32 %v3144_v8, 16  ;;  %v2551_v1 = vld [vmem:[#allocation3 + $0x10] sm:$0xf] }
 0x1ac   : > { %v2432_v24 = vshrl.u32 %v2400_v29, 16  ;;  %v2435_v48 = vshll.u32 %v2400_v29, 16  ;;  %2542 = vst [vmem:[#allocation4 + $0x28] sm:$0xf] %v2534_v41  ;;  %v2896_v62 = vor.u32 %v2895_v63, %v2892_v9  ;;  %v2580_v60 = vshrl.u32 %v2551_v1, 16  ;;  %v2360_v19 = vpop.f32.mrb[39].mxu0 }
 0x1ad   : > { %v6156_v11 = vor.u32 %v3028_v0, %v3027_v22  ;;  %v3175_v2 = vrot.slane %v3173_v59, 4  ;;  %v2694_v61 = vld [vmem:[#allocation3 + $0x10] sm:$0xf]  ;;  %v3178_v25 = vrot.slane %v3176_v39, 5  ;;  %v2583_v47 = vshll.u32 %v2551_v1, 16 }
 0x1ae   : > { %v2829_v17 = vld [vmem:[#allocation3 + $0x10] sm:$0xf]  ;;  %v2434_v10 = vrot.slane %v2432_v24, 7  ;;  %v2715_v45 = vshrl.u32 %v2694_v61, 16  ;;  %v6158_v16 = vrot.slane %v2896_v62, 4  ;;  %v2582_v8 = vrot.slane %v2580_v60, 4 }
 0x1af   : > { %2837 = vst [vmem:[#allocation4 + $0x10] sm:$0xf] %v2829_v17  ;;  %v2718_v31 = vshll.u32 %v2694_v61, 16  ;;  %v2862_v29 = vshrl.u32 %v2845_v26, 16  ;;  %v3179_v41 = vor.u32 %v3178_v25, %v3175_v2  ;;  %v2585_v0 = vrot.slane %v2583_v47, 5  ;;  %v6591_v43 = vld [vmem:[#allocation32_spill] sm:$0xff] }
 0x1b0   : > { %6556 = vst [vmem:[#allocation33_spill] sm:$0xff] %v6158_v16  ;;  %v6160_v9 = vor.u32 %v2435_v48, %v2434_v10  ;;  %v2717_v59 = vrot.slane %v2715_v45, 7  ;;  %v2537_v63 = vld [vmem:[#allocation3 + $0x34] sm:$0xf]  ;;  %v2865_v39 = vshll.u32 %v2845_v26, 16  ;;  %v2471_v24 = vshrl.u32 %v2406_v58, 16 }
 0x1b1   : > { %v2557_v22 = vld [vmem:[#allocation3 + $0x34] sm:$0xf]  ;;  %v2864_v57 = vrot.slane %v2862_v29, 4  ;;  %v2474_v1 = vshll.u32 %v2406_v58, 16  ;;  %2545 = vst [vmem:[#allocation4 + $0x94] sm:$0xf] %v2537_v63  ;;  %v2586_v62 = vor.u32 %v2585_v0, %v2582_v8 }
 0x1b2   : > { %v2700_v51 = vld [vmem:[#allocation3 + $0x34] sm:$0xf]  ;;  %v6162_v17 = vrot.slane %v3179_v41, 4  ;;  %v6164_v60 = vor.u32 %v2718_v31, %v2717_v59  ;;  %v2622_v61 = vshrl.u32 %v2557_v22, 16  ;;  %v2867_v48 = vrot.slane %v2865_v39, 5 }
 0x1b3   : > { %v2832_v50 = vld [vmem:[#allocation3 + $0x34] sm:$0xf]  ;;  %v2473_v25 = vrot.slane %v2471_v24, 7  ;;  %v2625_v47 = vshll.u32 %v2557_v22, 16  ;;  %v2754_v45 = vshrl.u32 %v2700_v51, 16  ;;  %v6166_v29 = vrot.slane %v2586_v62, 4 }
 0x1b4   : > { %6557 = vst [vmem:[#allocation34_spill] sm:$0xff] %v6162_v17  ;;  %v2851_v2 = vld [vmem:[#allocation3 + $0x34] sm:$0xf]  ;;  %2840 = vst [vmem:[#allocation4 + $0x7c] sm:$0xf] %v2832_v50  ;;  %v2624_v26 = vrot.slane %v2622_v61, 4  ;;  %v2868_v41 = vor.u32 %v2867_v48, %v2864_v57 }
 0x1b5   : > { %v2995_v10 = vld [vmem:[#allocation3 + $0x34] sm:$0xf]  ;;  %v2757_v58 = vshll.u32 %v2700_v51, 16  ;;  %v2904_v27 = vshrl.u32 %v2851_v2, 16  ;;  %v6168_v33 = vor.u32 %v2474_v1, %v2473_v25  ;;  %v2627_v31 = vrot.slane %v2625_v47, 5 }
 0x1b6   : > { %v3128_v63 = vld [vmem:[#allocation3 + $0x34] sm:$0xf]  ;;  %v2756_v8 = vrot.slane %v2754_v45, 7  ;;  %v2402_v59 = vld [vmem:[#allocation3 + $0x1c] sm:$0xf]  ;;  %v2907_v24 = vshll.u32 %v2851_v2, 16 }
 0x1b7   : > { %v3146_v0 = vld [vmem:[#allocation3 + $0x34] sm:$0xf]  ;;  %3136 = vst [vmem:[#allocation4 + $0x64] sm:$0xf] %v3128_v63  ;;  %v2906_v39 = vrot.slane %v2904_v27, 4  ;;  %v3038_v22 = vshrl.u32 %v2995_v10, 16  ;;  %v2628_v62 = vor.u32 %v2627_v31, %v2624_v26 }
 0x1b8   : > { %v3041_v55 = vshll.u32 %v2995_v10, 16  ;;  %v2535_v17 = vld [vmem:[#allocation3 + $0x1c] sm:$0xf]  ;;  %v6170_v50 = vrot.slane %v2868_v41, 4  ;;  %v6172_v61 = vor.u32 %v2757_v58, %v2756_v8  ;;  %v3187_v51 = vshrl.u32 %v3146_v0, 16 }
 0x1b9   : > { %v2553_v21 = vld [vmem:[#allocation3 + $0x1c] sm:$0xf]  ;;  %2543 = vst [vmem:[#allocation4 + $0x4c] sm:$0xf] %v2535_v17  ;;  %v2909_v1 = vrot.slane %v2907_v24, 5  ;;  %v3040_v48 = vrot.slane %v3038_v22, 7 }
 0x1ba   : > { %v2696_v57 = vld [vmem:[#allocation3 + $0x1c] sm:$0xf]  ;;  %v3190_v25 = vshll.u32 %v3146_v0, 16  ;;  %v2445_v47 = vshrl.u32 %v2402_v59, 16  ;;  %v6174_v63 = vrot.slane %v2628_v62, 4  ;;  %v3189_v27 = vrot.slane %v3187_v51, 4 }
 0x1bb   : > { %v2830_v45 = vld [vmem:[#allocation3 + $0x1c] sm:$0xf]  ;;  %v2448_v2 = vshll.u32 %v2402_v59, 16  ;;  %v2594_v10 = vshrl.u32 %v2553_v21, 16  ;;  %v2910_v41 = vor.u32 %v2909_v1, %v2906_v39  ;;  %v6176_v26 = vor.u32 %v3041_v55, %v3040_v48 }
 0x1bc   : > { %v2847_v53 = vld [vmem:[#allocation3 + $0x1c] sm:$0xf]  ;;  %2838 = vst [vmem:[#allocation4 + $0x34] sm:$0xf] %v2830_v45  ;;  %v3192_v58 = vrot.slane %v3190_v25, 5  ;;  %v2447_v31 = vrot.slane %v2445_v47, 7 }
 0x1bd   : > { %6558 = vst [vmem:[#allocation35_spill] sm:$0xff] %v6176_v26  ;;  %v2991_v8 = vld [vmem:[#allocation3 + $0x1c] sm:$0xf]  ;;  %v2596_v17 = vrot.slane %v2594_v10, 4  ;;  %v2597_v24 = vshll.u32 %v2553_v21, 16  ;;  %v2728_v22 = vshrl.u32 %v2696_v57, 16 }
 0x1be   : > { %v3126_v52 = vld [vmem:[#allocation3 + $0x1c] sm:$0xf]  ;;  %v2731_v0 = vshll.u32 %v2696_v57, 16  ;;  %v6178_v62 = vrot.slane %v2910_v41, 4  ;;  %v3193_v51 = vor.u32 %v3192_v58, %v3189_v27  ;;  %v2450_v59 = vor.u32 %v2448_v2, %v2447_v31 }
 0x1bf   : > { %v3142_v30 = vld [vmem:[#allocation3 + $0x1c] sm:$0xf]  ;;  %3134 = vst [vmem:[#allocation4 + $0x1c] sm:$0xf] %v3126_v52  ;;  %v2876_v16 = vshrl.u32 %v2847_v53, 16  ;;  %v2599_v45 = vrot.slane %v2597_v24, 5  ;;  %v2369_v24 = vadd.f32 %v6152_v12, %v6070_v36 }
 0x1c0   : > { %v2730_v39 = vrot.slane %v2728_v22, 7  ;;  %v2879_v55 = vshll.u32 %v2847_v53, 16  ;;  %v3012_v1 = vshrl.u32 %v2991_v8, 16  ;;  %v3194_v48 = vrot.slane %v3193_v51, 4 }
 0x1c1   : > { %v2878_v25 = vrot.slane %v2876_v16, 4  ;;  %v3015_v47 = vshll.u32 %v2991_v8, 16  ;;  %v3159_v26 = vshrl.u32 %v3142_v30, 16  ;;  %v2600_v10 = vor.u32 %v2599_v45, %v2596_v17  ;;  %v6568_v45 = vld [vmem:[#allocation34_spill] sm:$0xff] }
 0x1c2   : > { %v2733_v21 = vor.u32 %v2731_v0, %v2730_v39  ;;  %v2881_v14 = vrot.slane %v2879_v55, 5  ;;  %v3014_v57 = vrot.slane %v3012_v1, 7  ;;  %v3199_v52 = vsel %vm5628_vm7, %v3194_v48, %v6042_v32  ;;  %v6566_v0 = vld [vmem:[#allocation28_spill] sm:$0xff] }
 0x1c3   : > { %v3161_v27 = vrot.slane %v3159_v26, 4  ;;  %v3162_v2 = vshll.u32 %v3142_v30, 16  ;;  %v6559_v41 = vmax.f32 %v6137_v54, 0.0  ;;  %3280 = vst [vmem:[#allocation4 + $0x68] sm:$0xf] %v3199_v52  ;;  %v2601_v53 = vrot.slane %v2600_v10, 4 }
 0x1c4   : > { %v2882_v31 = vor.u32 %v2881_v14, %v2878_v25  ;;  %v3017_v16 = vor.u32 %v3015_v47, %v3014_v57  ;;  %v2376_v8 = vmax.f32 %v6145_v15, 0.0  ;;  %v2361_v22 = vadd.f32 %v2360_v19, %v6040_v20  ;;  %v6565_v26 = vld [vmem:[#allocation19_spill] sm:$0xff] }
 0x1c5   : > { %v2386_v58 = vpack.c.bf16 %v6559_v41, %v6559_v41  ;;  %v3164_v17 = vrot.slane %v3162_v2, 5  ;;  %v2438_v32 = vsel %vm5602_vm4, %v6046_v34, %v6160_v9  ;;  %v2451_v14 = vsel %vm5602_vm4, %v6054_v18, %v2450_v59  ;;  %v6567_v59 = vld [vmem:[#allocation29_spill] sm:$0xff] }
 0x1c6   : > { %v2883_v30 = vrot.slane %v2882_v31, 4  ;;  %v2384_v54 = vpack.c.bf16 %v2376_v8, %v2376_v8  ;;  %2526 = vst [vmem:[#allocation4 + $0x24] sm:$0xf] %v2438_v32  ;;  %v2464_v15 = vsel %vm5602_vm4, %v6048_v35, %v6147_v6  ;;  %v2379_v12 = vmax.f32 %v2369_v24, 0.0  ;;  %2527 = vst [vmem:[#allocation4 + $0x48] sm:$0xf] %v2451_v14 }
 0x1c7   : > { %2395 = vst [vmem:[#allocation3 + $0x58] sm:$0xf] %v2386_v58  ;;  %v3165_v36 = vor.u32 %v3164_v17, %v3161_v27  ;;  %v2377_v20 = vmax.f32 %v2361_v22, 0.0  ;;  %2528 = vst [vmem:[#allocation4 + $0x6c] sm:$0xf] %v2464_v15  ;;  %v2592_v34 = vsel %vm5628_vm7, %v6166_v29, %v6056_v44  ;;  %v2721_v18 = vsel %vm5602_vm4, %v6050_v38, %v6164_v60 }
 0x1c8   : > { %2393 = vst [vmem:[#allocation3 + $0x40] sm:$0xf] %v2384_v54  ;;  %2686 = vst [vmem:[#allocation4 + $0x2c] sm:$0xf] %v2592_v34  ;;  %v2734_v35 = vsel %vm5602_vm4, %v6060_v49, %v2733_v21  ;;  %v2606_v19 = vsel %vm5628_vm7, %v2601_v53, %v6063_v4  ;;  %v2620_v44 = vsel %vm5628_vm7, %v6154_v42, %v6058_v46 }
 0x1c9   : > { %v3166_v6 = vrot.slane %v3165_v36, 4  ;;  %v2387_v9 = vpack.c.bf16 %v2379_v12, %v2379_v12  ;;  %v2385_v29 = vpack.c.bf16 %v2377_v20, %v2377_v20  ;;  %2821 = vst [vmem:[#allocation4 + $0xc] sm:$0xf] %v2721_v18  ;;  %2822 = vst [vmem:[#allocation4 + $0x30] sm:$0xf] %v2734_v35  ;;  %v2747_v38 = vsel %vm5602_vm4, %v6052_v40, %v6150_v28  ;;  %v6562_v28 = vld [vmem:[#allocation33_spill] sm:$0xff] }
 0x1ca   : > { %2687 = vst [vmem:[#allocation4 + $0x50] sm:$0xf] %v2606_v19  ;;  %2688 = vst [vmem:[#allocation4 + $0x74] sm:$0xf] %v2620_v44  ;;  %v2760_v49 = vsel %vm5602_vm4, %v6065_v7, %v6172_v61  ;;  %v2477_v46 = vsel %vm5602_vm4, %v6072_v23, %v6168_v33  ;;  %v2634_v4 = vsel %vm5628_vm7, %v6174_v63, %v6076_v56  ;;  %v6560_v23 = vld [vmem:[#allocation14_spill] sm:$0xff]  ;;  %v6564_v63 = vld [vmem:[#allocation35_spill] sm:$0xff] }
 0x1cb   : > { %2823 = vst [vmem:[#allocation4 + $0x54] sm:$0xf] %v2747_v38  ;;  %v2874_v40 = vsel %vm5628_vm7, %v6170_v50, %v6092_v3  ;;  %2396 = vst [vmem:[#allocation3 + $0x64] sm:$0xf] %v2387_v9  ;;  %v2888_v7 = vsel %vm5628_vm7, %v2883_v30, %v6094_v5  ;;  %v3018_v33 = vsel %vm5602_vm4, %v6096_v13, %v3017_v16  ;;  %v6561_v3 = vld [vmem:[#allocation15_spill] sm:$0xff]  ;;  %v6563_v5 = vld [vmem:[#allocation18_spill] sm:$0xff] }
 0x1cc   : > { %2394 = vst [vmem:[#allocation3 + $0x4c] sm:$0xf] %v2385_v29  ;;  %2824 = vst [vmem:[#allocation4 + $0x78] sm:$0xf] %v2760_v49  ;;  %v3031_v56 = vsel %vm5602_vm4, %v6560_v23, %v6156_v11  ;;  %v2902_v42 = vsel %vm5628_vm7, %v6562_v28, %v6561_v3  ;;  %v2916_v13 = vsel %vm5628_vm7, %v6178_v62, %v6563_v5  ;;  %v6569_v62 = vld [vmem:[#allocation22_spill] sm:$0xff] }
 0x1cd   : > { %2529 = vst [vmem:[#allocation4 + $0x90] sm:$0xf] %v2477_v46  ;;  %2689 = vst [vmem:[#allocation4 + $0x98] sm:$0xf] %v2634_v4  ;;  %v3044_v11 = vsel %vm5602_vm4, %v6565_v26, %v6564_v63  ;;  %v3171_v51 = vsel %vm5628_vm7, %v3166_v6, %v6566_v0  ;;  %v3185_v39 = vsel %vm5628_vm7, %v6568_v45, %v6567_v59  ;;  %v6570_v47 = vshll.u32 %v6569_v62, 16 }
 0x1ce   : > { %2981 = vst [vmem:[#allocation4 + $0x14] sm:$0xf] %v2874_v40  ;;  %v2412_v60 = vld [vmem:[#allocation3 + $0x58] sm:$0xf]  ;;  %2982 = vst [vmem:[#allocation4 + $0x38] sm:$0xf] %v2888_v7 }
 0x1cf   : > { %v2540_v50 = vld [vmem:[#allocation3 + $0x58] sm:$0xf]  ;;  %3118 = vst [vmem:[#allocation4 + $0x18] sm:$0xf] %v3018_v33  ;;  %3119 = vst [vmem:[#allocation4 + $0x3c] sm:$0xf] %v3031_v56 }
 0x1d0   : > { %v2563_v61 = vld [vmem:[#allocation3 + $0x58] sm:$0xf]  ;;  %2983 = vst [vmem:[#allocation4 + $0x5c] sm:$0xf] %v2902_v42  ;;  %v2510_v55 = vshrl.u32 %v2412_v60, 16  ;;  %v6270_v10 = vrot.slane %v6570_v47, 5 }
 0x1d1   : > { %v2664_v1 = vshrl.u32 %v2563_v61, 16  ;;  %v2667_v48 = vshll.u32 %v2563_v61, 16  ;;  %v2706_v25 = vld [vmem:[#allocation3 + $0x58] sm:$0xf]  ;;  %2548 = vst [vmem:[#allocation4 + $0x100] sm:$0xf] %v2540_v50 }
 0x1d2   : > { %2984 = vst [vmem:[#allocation4 + $0x80] sm:$0xf] %v2916_v13  ;;  %3120 = vst [vmem:[#allocation4 + $0x60] sm:$0xf] %v3044_v11  ;;  %v2513_v21 = vshll.u32 %v2412_v60, 16  ;;  %v2793_v57 = vshrl.u32 %v2706_v25, 16 }
 0x1d3   : > { %3278 = vst [vmem:[#allocation4 + $0x20] sm:$0xf] %v3171_v51  ;;  %3279 = vst [vmem:[#allocation4 + $0x44] sm:$0xf] %v3185_v39  ;;  %v2835_v52 = vld [vmem:[#allocation3 + $0x58] sm:$0xf] }
 0x1d4   : > { %v2857_v27 = vld [vmem:[#allocation3 + $0x58] sm:$0xf]  ;;  %v2666_v2 = vrot.slane %v2664_v1, 4  ;;  %v2669_v41 = vrot.slane %v2667_v48, 5  ;;  %v2796_v58 = vshll.u32 %v2706_v25, 16  ;;  %v2512_v16 = vrot.slane %v2510_v55, 7 }
 0x1d5   : > { %v2946_v53 = vshrl.u32 %v2857_v27, 16  ;;  %v3001_v31 = vld [vmem:[#allocation3 + $0x58] sm:$0xf]  ;;  %2843 = vst [vmem:[#allocation4 + $0xe8] sm:$0xf] %v2835_v52  ;;  %v2795_v8 = vrot.slane %v2793_v57, 7 }
 0x1d6   : > { %v2949_v17 = vshll.u32 %v2857_v27, 16  ;;  %v3077_v24 = vshrl.u32 %v3001_v31, 16  ;;  %v3131_v22 = vld [vmem:[#allocation3 + $0x58] sm:$0xf]  ;;  %v2670_v32 = vor.u32 %v2669_v41, %v2666_v2  ;;  %v2408_v14 = vld [vmem:[#allocation3 + $0x40] sm:$0xf]  ;;  %v6274_v9 = vor.u32 %v2513_v21, %v2512_v16 }
 0x1d7   : > { %v2948_v30 = vrot.slane %v2946_v53, 4  ;;  %v3152_v54 = vld [vmem:[#allocation3 + $0x58] sm:$0xf]  ;;  %3139 = vst [vmem:[#allocation4 + $0xd0] sm:$0xf] %v3131_v22  ;;  %v3080_v12 = vshll.u32 %v3001_v31, 16  ;;  %v6278_v61 = vor.u32 %v2796_v58, %v2795_v8 }
 0x1d8   : > { %v2951_v15 = vrot.slane %v2949_v17, 5  ;;  %v3079_v36 = vrot.slane %v3077_v24, 7  ;;  %v3229_v20 = vshrl.u32 %v3152_v54, 16  ;;  %v2538_v34 = vld [vmem:[#allocation3 + $0x40] sm:$0xf]  ;;  %v6272_v18 = vrot.slane %v2670_v32, 4 }
 0x1d9   : > { %v3232_v35 = vshll.u32 %v3152_v54, 16  ;;  %v2484_v19 = vshrl.u32 %v2408_v14, 16  ;;  %v2487_v44 = vshll.u32 %v2408_v14, 16  ;;  %v2559_v6 = vld [vmem:[#allocation3 + $0x40] sm:$0xf]  ;;  %v3306_v37 = vld [vmem:[#allocation4 + $0x90] sm:$0xff] }
 0x1da   : > { %2546 = vst [vmem:[#allocation4 + $0xb8] sm:$0xf] %v2538_v34  ;;  %v2952_v29 = vor.u32 %v2951_v15, %v2948_v30  ;;  %v3231_v38 = vrot.slane %v3229_v20, 4  ;;  %v2636_v49 = vshrl.u32 %v2559_v6, 16  ;;  %v2702_v46 = vld [vmem:[#allocation3 + $0x40] sm:$0xf]  ;;  %v6282_v55 = vor.u32 %v3080_v12, %v3079_v36 }
 0x1db   : > { %v2833_v4 = vld [vmem:[#allocation3 + $0x40] sm:$0xf]  ;;  %v3234_v40 = vrot.slane %v3232_v35, 5  ;;  %v2486_v7 = vrot.slane %v2484_v19, 7  ;;  %v2639_v33 = vshll.u32 %v2559_v6, 16  ;;  %v2767_v23 = vshrl.u32 %v2702_v46, 16 }
 0x1dc   : > { %v2853_v56 = vld [vmem:[#allocation3 + $0x40] sm:$0xf]  ;;  %2841 = vst [vmem:[#allocation4 + $0xa0] sm:$0xf] %v2833_v4  ;;  %v6276_v3 = vrot.slane %v2952_v29, 4  ;;  %v2638_v28 = vrot.slane %v2636_v49, 4 }
 0x1dd   : > { %v2770_v42 = vshll.u32 %v2702_v46, 16  ;;  %v2918_v60 = vshrl.u32 %v2853_v56, 16  ;;  %v2997_v50 = vld [vmem:[#allocation3 + $0x40] sm:$0xf]  ;;  %v3235_v5 = vor.u32 %v3234_v40, %v3231_v38  ;;  %v2641_v13 = vrot.slane %v2639_v33, 5 }
 0x1de   : > { %v2769_v63 = vrot.slane %v2767_v23, 7  ;;  %v3129_v26 = vld [vmem:[#allocation3 + $0x40] sm:$0xf]  ;;  %v2921_v51 = vshll.u32 %v2853_v56, 16  ;;  %v3051_v59 = vshrl.u32 %v2997_v50, 16  ;;  %v3054_v45 = vshll.u32 %v2997_v50, 16 }
 0x1df   : > { %v3148_v11 = vld [vmem:[#allocation3 + $0x40] sm:$0xf]  ;;  %v2920_v0 = vrot.slane %v2918_v60, 4  ;;  %3137 = vst [vmem:[#allocation4 + $0x88] sm:$0xf] %v3129_v26  ;;  %v6284_v1 = vrot.slane %v3235_v5, 4  ;;  %v2642_v48 = vor.u32 %v2641_v13, %v2638_v28  ;;  %v6290_v8 = vor.u32 %v2487_v44, %v2486_v7 }
 0x1e0   : > { %v6280_v39 = vld [vmem:[#allocation3 + $0x64] sm:$0xf]  ;;  %v3201_v25 = vshrl.u32 %v3148_v11, 16  ;;  %v2923_v21 = vrot.slane %v2921_v51, 5  ;;  %v3053_v57 = vrot.slane %v3051_v59, 7  ;;  %v3204_v52 = vshll.u32 %v3148_v11, 16 }
 0x1e1   : > { %v2836_v62 = vld [vmem:[#allocation3 + $0x64] sm:$0xf]  ;;  %v2806_v27 = vshrl.u32 %v6280_v39, 16  ;;  %v6287_v41 = vrot.slane %v2642_v48, 4  ;;  %v2809_v53 = vshll.u32 %v6280_v39, 16  ;;  %v6292_v20 = vor.u32 %v2770_v42, %v2769_v63  ;;  %v5362_v63 = vld [vmem:[%s6518_s3 + $0x100] sm:$0xff]  }
 0x1e2   : > { %v2859_v47 = vld [vmem:[#allocation3 + $0x64] sm:$0xf]  ;;  %2844 = vst [vmem:[#allocation4 + $0x10c] sm:$0xf] %v2836_v62  ;;  %v3203_v58 = vrot.slane %v3201_v25, 4  ;;  %v2924_v17 = vor.u32 %v2923_v21, %v2920_v0  ;;  %v3206_v24 = vrot.slane %v3204_v52, 5  ;;  %v6298_v28 = vor.u32 %v3054_v45, %v3053_v57 }
 0x1e3   : > { %v3003_v2 = vld [vmem:[#allocation3 + $0x64] sm:$0xf]  ;;  %v2960_v31 = vshrl.u32 %v2859_v47, 16  ;;  %v2808_v22 = vrot.slane %v2806_v27, 7  ;;  %v2410_v30 = vld [vmem:[#allocation3 + $0x4c] sm:$0xf] }
 0x1e4   : > { %v3132_v16 = vld [vmem:[#allocation3 + $0x64] sm:$0xf]  ;;  %v2963_v14 = vshll.u32 %v2859_v47, 16  ;;  %v3090_v15 = vshrl.u32 %v3003_v2, 16  ;;  %v3093_v36 = vshll.u32 %v3003_v2, 16  ;;  %v6294_v34 = vrot.slane %v2924_v17, 4 }
 0x1e5   : > { %v3154_v32 = vld [vmem:[#allocation3 + $0x64] sm:$0xf]  ;;  %3140 = vst [vmem:[#allocation4 + $0xf4] sm:$0xf] %v3132_v16  ;;  %v2962_v54 = vrot.slane %v2960_v31, 4  ;;  %v3207_v35 = vor.u32 %v3206_v24, %v3203_v58  ;;  %v2497_v46 = vshrl.u32 %v2410_v30, 16  ;;  %v6311_v48 = vor.u32 %v2809_v53, %v2808_v22 }
 0x1e6   : > { %v2539_v12 = vld [vmem:[#allocation3 + $0x4c] sm:$0xf]  ;;  %v3243_v19 = vshrl.u32 %v3154_v32, 16  ;;  %v2965_v29 = vrot.slane %v2963_v14, 5  ;;  %v3092_v38 = vrot.slane %v3090_v15, 7  ;;  %v3246_v49 = vshll.u32 %v3154_v32, 16 }
 0x1e7   : > { %v2561_v6 = vld [vmem:[#allocation3 + $0x4c] sm:$0xf]  ;;  %2547 = vst [vmem:[#allocation4 + $0xdc] sm:$0xf] %v2539_v12  ;;  %v3208_v40 = vrot.slane %v3207_v35, 4  ;;  %v2500_v33 = vshll.u32 %v2410_v30, 16 }
 0x1e8   : > { %v2704_v44 = vld [vmem:[#allocation3 + $0x4c] sm:$0xf]  ;;  %v6296_v7 = vrot.slane %v3243_v19, 4  ;;  %v2650_v23 = vshrl.u32 %v2561_v6, 16  ;;  %v2966_v42 = vor.u32 %v2965_v29, %v2962_v54  ;;  %v6300_v60 = vrot.slane %v3246_v49, 5  ;;  %v6571_v26 = vld [vmem:[#allocation5_spill] sm:$0xff] }
 0x1e9   : > { %v2834_v4 = vld [vmem:[#allocation3 + $0x4c] sm:$0xf]  ;;  %v2499_v50 = vrot.slane %v2497_v46, 7  ;;  %v3213_v11 = vsel %vm5628_vm7, %v3208_v40, %v6571_v26  ;;  %v2653_v51 = vshll.u32 %v2561_v6, 16  ;;  %v2780_v59 = vshrl.u32 %v2704_v44, 16  ;;  %v5367_v45 = vld [vmem:[%s6518_s3 + $0x148] sm:$0xff]  }
 0x1ea   : > { %v2855_v56 = vld [vmem:[#allocation3 + $0x4c] sm:$0xf]  ;;  %2842 = vst [vmem:[#allocation4 + $0xc4] sm:$0xf] %v2834_v4  ;;  %v2652_v0 = vrot.slane %v2650_v23, 4  ;;  %v6313_v25 = vrot.slane %v2966_v42, 4  ;;  %v6315_v62 = vor.u32 %v3093_v36, %v3092_v38  ;;  %v3249_v53 = vor.u32 %v6300_v60, %v6296_v7 }
 0x1eb   : > { %v2999_v5 = vld [vmem:[#allocation3 + $0x4c] sm:$0xf]  ;;  %3281 = vst [vmem:[#allocation4 + $0x8c] sm:$0xf] %v3213_v11  ;;  %v2783_v47 = vshll.u32 %v2704_v44, 16  ;;  %v2655_v52 = vrot.slane %v2653_v51, 5  ;;  %v2502_v17 = vor.u32 %v2500_v33, %v2499_v50 }
 0x1ec   : > { %v3130_v13 = vld [vmem:[#allocation3 + $0x4c] sm:$0xf]  ;;  %v5352_v21 = vld [vmem:[#allocation4] ss:$36 sps:$4 sm:$0xff]   ;;  %v2782_v27 = vrot.slane %v2780_v59, 7  ;;  %v2932_v2 = vshrl.u32 %v2855_v56, 16 }
 0x1ed   : > { %v3150_v39 = vld [vmem:[#allocation3 + $0x4c] sm:$0xf]  ;;  %3138 = vst [vmem:[#allocation4 + $0xac] sm:$0xf] %v3130_v13  ;;  %v5354_v57 = vld [vmem:[#allocation4 + $0x4] ss:$36 sps:$4 sm:$0xff]   ;;  %v2656_v54 = vor.u32 %v2655_v52, %v2652_v0 }
 0x1ee   : > { %v2935_v58 = vshll.u32 %v2855_v56, 16  ;;  %v5357_v31 = vld [vmem:[#allocation4 + $0x4c] ss:$36 sps:$4 sm:$0xff]   ;;  %v3064_v24 = vshrl.u32 %v2999_v5, 16  ;;  %v3215_v22 = vshrl.u32 %v3150_v39, 16  ;;  %4125 = vmatprep.mubr.bf16.mxu1 %v5354_v57  ;;  %v5368_v32 = vld [vmem:[%s6518_s3 + $0x108] sm:$0xff]   ;;  %v2785_v14 = vor.u32 %v2783_v47, %v2782_v27 }
 0x1ef   : > { %v5366_v16 = vld [vmem:[%s6518_s3 + $0x180] sm:$0xff]   ;;  %v5369_v30 = vld [vmem:[%s6518_s3 + $0x1c8] sm:$0xff]   ;;  %v2934_v15 = vrot.slane %v2932_v2, 4  ;;  %4126 = vmatmul.mubr.bf16.vlgmr.msra.gmra.mrb[32].mxu1 %v5352_v21  ;;  %v5359_v12 = vld [vmem:[#allocation4 + $0x8] ss:$36 sps:$4 sm:$0xff]   ;;  %v3067_v6 = vshll.u32 %v2999_v5, 16 }
 0x1f0   : > { %v2937_v36 = vrot.slane %v2935_v58, 5  ;;  %v5361_v35 = vld [vmem:[#allocation4 + $0xc] ss:$36 sps:$4 sm:$0xff]   ;;  %v3066_v19 = vrot.slane %v3064_v24, 7  ;;  %v3217_v44 = vrot.slane %v3215_v22, 4  ;;  %v3218_v29 = vshll.u32 %v3150_v39, 16  ;;  %4133 = vmatprep.mubr.bf16.mxu1 %v5357_v31  ;;  %5052 = vmatpush3.bf16.msra.mxu1 %v5362_v63 }
 0x1f1   : > { %v2657_v38 = vrot.slane %v2656_v54, 4  ;;  %4190 = vmatprep.mubr.bf16.mxu0 %v5361_v35  ;;  %v5364_v46 = vld [vmem:[#allocation4 + $0x54] ss:$36 sps:$4 sm:$0xff]   ;;  %5053 = vmatprep.subr.bf16.mxu1 %v5367_v45  ;;  %v5371_v4 = vld [vmem:[%s6518_s3 + $0x150] sm:$0xff]   ;;  %v6572_v40 = vld [vmem:[#allocation6_spill] sm:$0xff]  ;;  %v3250_v39 = vrot.slane %v3249_v53, 4 }
 0x1f2   : > { %v2938_v49 = vor.u32 %v2937_v36, %v2934_v15  ;;  %v2490_v7 = vsel %vm5602_vm4, %v6572_v40, %v6290_v8  ;;  %v6573_v33 = vld [vmem:[#allocation7_spill] sm:$0xff]  ;;  %v3069_v56 = vor.u32 %v3067_v6, %v3066_v19  ;;  %v3220_v42 = vrot.slane %v3218_v29, 5  ;;  %v3296_v60 = vld [vmem:[#allocation4 + $0x48] sm:$0xff]  ;;  %4191 = vmatmul.mubr.bf16.vlgmr.msra.gmra.mrb[40].mxu0 %v5359_v12  ;;  %v6574_v50 = vld [vmem:[#allocation8_spill] sm:$0xff] }
 0x1f3   : > { %v2648_v23 = vsel %vm5628_vm7, %v6287_v41, %v6573_v33  ;;  %2530 = vst [vmem:[#allocation4 + $0xb4] sm:$0xf] %v2490_v7  ;;  %v2773_v5 = vsel %vm5602_vm4, %v6574_v50, %v6292_v20  ;;  %v6575_v13 = vld [vmem:[#allocation9_spill] sm:$0xff]  ;;  %4198 = vmatprep.mubr.bf16.mxu0 %v5364_v46  ;;  %5092 = vmatpush3.bf16.msra.mxu0 %v5366_v16  ;;  %v5370_v41 = vld [vmem:[%s6518_s3 + $0x188] sm:$0xff]   ;;  %v6576_v26 = vld [vmem:[#allocation10_spill] sm:$0xff] }
 0x1f4   : > { %2690 = vst [vmem:[#allocation4 + $0xbc] sm:$0xf] %v2648_v23  ;;  %v2786_v8 = vsel %vm5602_vm4, %v6575_v13, %v2785_v14  ;;  %v2939_v63 = vrot.slane %v2938_v49, 4  ;;  %2825 = vst [vmem:[#allocation4 + $0x9c] sm:$0xf] %v2773_v5  ;;  %v2503_v11 = vsel %vm5602_vm4, %v6576_v26, %v2502_v17  ;;  %v6577_v0 = vld [vmem:[#allocation11_spill] sm:$0xff]  ;;  %v3221_v45 = vor.u32 %v3220_v42, %v3217_v44 }
 0x1f5   : > { %2826 = vst [vmem:[#allocation4 + $0xc0] sm:$0xf] %v2786_v8  ;;  %v2516_v20 = vsel %vm5602_vm4, %v6577_v0, %v6274_v9  ;;  %v6578_v51 = vld [vmem:[#allocation16_spill] sm:$0xff]  ;;  %v3301_v47 = vld [vmem:[#allocation4 + $0x6c] sm:$0xff]  ;;  %5054 = vmatpush3.bf16.msra.mxu1 %v5368_v32  ;;  %5093 = vmatprep.subr.bf16.mxu0 %v5369_v30  ;;  %v5374_v21 = vld [vmem:[%s6518_s3 + $0x110] sm:$0xff]  }
 0x1f6   : > { %v2662_v59 = vsel %vm5628_vm7, %v2657_v38, %v6578_v51  ;;  %v5376_v57 = vld [vmem:[%s6518_s3 + $0x1d0] sm:$0xff]   ;;  %2531 = vst [vmem:[#allocation4 + $0xd8] sm:$0xf] %v2503_v11  ;;  %2532 = vst [vmem:[#allocation4 + $0xfc] sm:$0xf] %v2516_v20  ;;  %v6580_v27 = vld [vmem:[#allocation12_spill] sm:$0xff]  ;;  %v4673_v58 = vcombine.low %v3296_v60, %v3301_v47  ;;  %5055 = vmatprep.subr.bf16.mxu1 %v5371_v4  ;;  %v3255_v38 = vsel %vm5628_vm7, %v3250_v39, %v6270_v10 }
 0x1f7   : > { %v6579_v9 = vld [vmem:[#allocation17_spill] sm:$0xff]  ;;  %2691 = vst [vmem:[#allocation4 + $0xe0] sm:$0xf] %v2662_v59  ;;  %v2799_v2 = vsel %vm5602_vm4, %v6580_v27, %v6278_v61  ;;  %v5380_v31 = vld [vmem:[%s6518_s3 + $0x158] sm:$0xff]   ;;  %v3222_v22 = vrot.slane %v3221_v45, 4  ;;  %v6584_v32 = vld [vmem:[#allocation23_spill] sm:$0xff]  ;;  %5094 = vmatpush3.bf16.msra.mxu0 %v5370_v41 }
 0x1f8   : > { %v2676_v52 = vsel %vm5628_vm7, %v6272_v18, %v6579_v9  ;;  %v6581_v16 = vld [vmem:[#allocation13_spill] sm:$0xff]  ;;  %2827 = vst [vmem:[#allocation4 + $0xe4] sm:$0xf] %v2799_v2  ;;  %v6582_v18 = vld [vmem:[#allocation20_spill] sm:$0xff]  ;;  %v2944_v30 = vsel %vm5628_vm7, %v2939_v63, %v6584_v32  ;;  %4134 = vmatmul.mubr.bf16.gmra.mrb[36].mxu1 %v4673_v58  ;;  %v6587_v15 = vld [vmem:[#allocation26_spill] sm:$0xff]  ;;  %5095 = vmatprep.subr.bf16.mxu0 %v5376_v57 }
 0x1f9   : > { %2692 = vst [vmem:[#allocation4 + $0x104] sm:$0xf] %v2676_v52  ;;  %v2812_v53 = vsel %vm5602_vm4, %v6581_v16, %v6311_v48  ;;  %v3057_v17 = vsel %vm5602_vm4, %v6582_v18, %v6298_v28  ;;  %v6583_v24 = vld [vmem:[#allocation21_spill] sm:$0xff]  ;;  %v6585_v48 = vld [vmem:[#allocation24_spill] sm:$0xff]  ;;  %2986 = vst [vmem:[#allocation4 + $0xc8] sm:$0xf] %v2944_v30  ;;  %v2958_v36 = vsel %vm5628_vm7, %v6276_v3, %v6587_v15  ;;  %5056 = vmatpush3.bf16.msra.mxu1 %v5374_v21 }
 0x1fa   : > { %v2930_v61 = vsel %vm5628_vm7, %v6294_v34, %v6583_v24  ;;  %2828 = vst [vmem:[#allocation4 + $0x108] sm:$0xf] %v2812_v53  ;;  %3121 = vst [vmem:[#allocation4 + $0x84] sm:$0xf] %v3057_v17  ;;  %v3070_v54 = vsel %vm5602_vm4, %v6585_v48, %v3069_v56  ;;  %v6586_v14 = vld [vmem:[#allocation25_spill] sm:$0xff]  ;;  %v6588_v12 = vld [vmem:[#allocation31_spill] sm:$0xff]  ;;  %5057 = vmatprep.subr.bf16.mxu1 %v5380_v31 }
 0x1fb   : > { %2985 = vst [vmem:[#allocation4 + $0xa4] sm:$0xf] %v2930_v61  ;;  %v3083_v28 = vsel %vm5602_vm4, %v6586_v14, %v6282_v55  ;;  %v5379_v34 = vld [vmem:[%s6518_s3 + $0x190] sm:$0xff]   ;;  %3122 = vst [vmem:[#allocation4 + $0xa8] sm:$0xf] %v3070_v54  ;;  %v2972_v35 = vsel %vm5628_vm7, %v6313_v25, %v6588_v12  ;;  %v6589_v55 = vld [vmem:[#allocation27_spill] sm:$0xff] }
 0x1fc   : > { %3123 = vst [vmem:[#allocation4 + $0xcc] sm:$0xf] %v3083_v28  ;;  %v3096_v19 = vsel %vm5602_vm4, %v6589_v55, %v6315_v62  ;;  %v5375_v6 = vld [vmem:[#allocation4 + $0x50] ss:$36 sps:$4 sm:$0xff]   ;;  %v5381_v44 = vld [vmem:[%s6518_s3 + $0x118] sm:$0xff]   ;;  %v3241_v62 = vsel %vm5628_vm7, %v6284_v1, %v6591_v43  ;;  %5096 = vmatpush3.bf16.msra.mxu0 %v5379_v34  ;;  %v5393_v23 = vld [vmem:[%s6518_s3 + $0x168] sm:$0xff]  }
 0x1fd   : > { %v5382_v3 = vld [vmem:[%s6518_s3 + $0x1d8] sm:$0xff]   ;;  %2987 = vst [vmem:[#allocation4 + $0xec] sm:$0xf] %v2958_v36  ;;  %2988 = vst [vmem:[#allocation4 + $0x110] sm:$0xf] %v2972_v35  ;;  %v3311_v49 = vld [vmem:[#allocation4 + $0xb4] sm:$0xff]  ;;  %4199 = vmatmul.mubr.bf16.gmra.mrb[44].mxu0 %v5375_v6  ;;  %5058 = vmatpush3.bf16.msra.mxu1 %v5381_v44 }
 0x1fe   : > { %3124 = vst [vmem:[#allocation4 + $0xf0] sm:$0xf] %v3096_v19  ;;  %v6590_v25 = vld [vmem:[#allocation30_spill] sm:$0xff]  ;;  %v5372_v46 = vld [vmem:[#allocation4 + $0x94] ss:$36 sps:$4 sm:$0xff]   ;;  %5097 = vmatprep.subr.bf16.mxu0 %v5382_v3  ;;  %v4682_v7 = vcombine.low %v3306_v37, %v3311_v49  ;;  %v5397_v5 = vld [vmem:[%s6518_s3 + $0x170] sm:$0xff]  }
 0x1ff   : > { %v3227_v29 = vsel %vm5628_vm7, %v3222_v22, %v6590_v25  ;;  %v5384_v4 = vld [vmem:[%s6518_s3 + $0x160] sm:$0xff]   ;;  %3283 = vst [vmem:[#allocation4 + $0xd4] sm:$0xf] %v3241_v62  ;;  %3284 = vst [vmem:[#allocation4 + $0xf8] sm:$0xf] %v3255_v38  ;;  %4141 = vmatprep.mubr.bf16.mxu1 %v5372_v46  ;;  %v5383_v1 = vld [vmem:[%s6518_s3 + $0x198] sm:$0xff]  }
 0x200   : > { %3282 = vst [vmem:[#allocation4 + $0xb0] sm:$0xf] %v3227_v29  ;;  %v5377_v40 = vld [vmem:[#allocation4 + $0x9c] ss:$36 sps:$4 sm:$0xff]   ;;  %v5387_v10 = vld [vmem:[%s6518_s3 + $0x120] sm:$0xff]   ;;  %5059 = vmatprep.subr.bf16.mxu1 %v5384_v4  ;;  %5098 = vmatpush3.bf16.msra.mxu0 %v5383_v1  ;;  %v5408_v51 = vld [vmem:[%s6518_s3 + $0x178] sm:$0xff]  }
 0x201   : > { %4206 = vmatprep.mubr.bf16.mxu0 %v5377_v40  ;;  %v5389_v33 = vld [vmem:[%s6518_s3 + $0x1e0] sm:$0xff]   ;;  %v5385_v56 = vld [vmem:[#allocation4 + $0xdc] ss:$36 sps:$4 sm:$0xff]   ;;  %4142 = vmatmul.mubr.bf16.gmra.mrb[40].mxu1 %v4682_v7  ;;  %v5390_v8 = vld [vmem:[#allocation4 + $0xe4] ss:$36 sps:$4 sm:$0xff]  }
 0x202   : > { %v5392_v42 = vld [vmem:[%s6518_s3 + $0x1a0] sm:$0xff]   ;;  %v5394_v60 = vld [vmem:[%s6518_s3 + $0x128] sm:$0xff]   ;;  %4149 = vmatprep.mubr.bf16.mxu1 %v5385_v56  ;;  %5060 = vmatpush3.bf16.msra.mxu1 %v5387_v10  ;;  %v5398_v26 = vld [vmem:[%s6518_s3 + $0x130] sm:$0xff]  }
 0x203   : > { %v5395_v50 = vld [vmem:[%s6518_s3 + $0x1e8] sm:$0xff]   ;;  %5099 = vmatprep.subr.bf16.mxu0 %v5389_v33  ;;  %5061 = vmatprep.subr.bf16.mxu1 %v5393_v23  ;;  %v5403_v20 = vld [vmem:[%s6518_s3 + $0x1f0] sm:$0xff]   ;;  %v5409_v47 = vld [vmem:[%s6518_s3 + $0x138] sm:$0xff]  }
 0x204   : > { %v5388_v13 = vld [vmem:[#allocation4 + $0x98] ss:$36 sps:$4 sm:$0xff]   ;;  %5100 = vmatpush3.bf16.msra.mxu0 %v5392_v42  ;;  %v5404_v39 = vld [vmem:[%s6518_s3 + $0x1b0] sm:$0xff]   ;;  %v5410_v21 = vld [vmem:[%s6518_s3 + $0x1f8] sm:$0xff]  }
 0x205   : > { %v3316_v63 = vld [vmem:[#allocation4 + $0xd8] sm:$0xff]  ;;  %4207 = vmatmul.mubr.bf16.gmra.mrb[48].mxu0 %v5388_v13  ;;  %5101 = vmatprep.subr.bf16.mxu0 %v5395_v50  ;;  %v5402_v45 = vld [vmem:[#allocation4 + $0xe0] ss:$36 sps:$4 sm:$0xff]   ;;  %v5412_v9 = vld [vmem:[%s6518_s3 + $0x200] sm:$0xff]  }
 0x206   : > { %4214 = vmatprep.mubr.bf16.mxu0 %v5390_v8  ;;  %v5396_v41 = vld [vmem:[%s6518_s3 + $0x1a8] sm:$0xff]   ;;  %5062 = vmatpush3.bf16.msra.mxu1 %v5394_v60  ;;  %v5411_v52 = vld [vmem:[%s6518_s3 + $0x1b8] sm:$0xff]   ;;  %v5399_v27 = vld [vmem:[#allocation4 + $0x10] ss:$36 sps:$4 sm:$0xff]  }
 0x207   : > { %v3321_v11 = vld [vmem:[#allocation4 + $0xfc] sm:$0xff]  ;;  %5063 = vmatprep.subr.bf16.mxu1 %v5397_v5  ;;  %v5401_v59 = vld [vmem:[#allocation4 + $0x14] ss:$36 sps:$4 sm:$0xff]   ;;  %v5415_v16 = vld [vmem:[#allocation4 + $0x64] ss:$36 sps:$4 sm:$0xff]  }
 0x208   : > { %v4691_v0 = vcombine.low %v3316_v63, %v3321_v11  ;;  %5102 = vmatpush3.bf16.msra.mxu0 %v5396_v41  ;;  %v5407_v57 = vld [vmem:[#allocation4 + $0x1c] ss:$36 sps:$4 sm:$0xff]   ;;  %v5424_v61 = vld [vmem:[%s6518_s3 + $0x218] sm:$0xff]   ;;  %v5425_v48 = vld [vmem:[%s6518_s3 + $0x220] sm:$0xff]  }
 0x209   : > { %5103 = vmatprep.subr.bf16.mxu0 %v5403_v20  ;;  %v5417_v2 = vld [vmem:[%s6518_s3 + $0x208] sm:$0xff]   ;;  %v5418_v53 = vld [vmem:[%s6518_s3 + $0x210] sm:$0xff]   ;;  %v5422_v30 = vld [vmem:[#allocation4 + $0xac] ss:$36 sps:$4 sm:$0xff]  }
 0x20a   : > { %4150 = vmatmul.mubr.bf16.gmra.mrb[44].mxu1 %v4691_v0  ;;  %v5413_v58 = vld [vmem:[#allocation4 + $0x5c] ss:$36 sps:$4 sm:$0xff]   ;;  %v5419_v22 = vld [vmem:[#allocation4 + $0xa4] ss:$36 sps:$4 sm:$0xff]   ;;  %v5426_v15 = vld [vmem:[#allocation4 + $0xec] ss:$36 sps:$4 sm:$0xff]  }
 0x20b   : > { %5064 = vmatpush3.bf16.msra.mxu1 %v5398_v26  ;;  %4255 = vmatprep.mubr.bf16.mxu1 %v5401_v59  ;;  %v5405_v31 = vld [vmem:[#allocation4 + $0x18] ss:$36 sps:$4 sm:$0xff]   ;;  %v5421_v32 = vld [vmem:[#allocation4 + $0x60] ss:$36 sps:$4 sm:$0xff]   ;;  %v5428_v36 = vld [vmem:[#allocation4 + $0xa8] ss:$36 sps:$4 sm:$0xff]  }
 0x20c   : > { %5065 = vmatprep.subr.bf16.mxu1 %v5408_v51  ;;  %5104 = vmatpush3.bf16.msra.mxu0 %v5404_v39  ;;  %v3303_v18 = vld [vmem:[#allocation4 + $0x7c] sm:$0xff]  ;;  %v3313_v54 = vld [vmem:[#allocation4 + $0xc4] sm:$0xff]  ;;  %v5429_v12 = vld [vmem:[#allocation4 + $0xf4] ss:$36 sps:$4 sm:$0xff]  }
 0x20d   : > { %4215 = vmatmul.mubr.bf16.gmra.mrb[52].mxu0 %v5402_v45  ;;  %5105 = vmatprep.subr.bf16.mxu0 %v5410_v21  ;;  %v3298_v17 = vld [vmem:[#allocation4 + $0x58] sm:$0xff]  ;;  %v3308_v14 = vld [vmem:[#allocation4 + $0xa0] sm:$0xff]  ;;  %v5432_v55 = vld [vmem:[#allocation4 + $0xe8] ss:$36 sps:$4 sm:$0xff]  }
 0x20e   : > { %4320 = vmatprep.mubr.bf16.mxu0 %v5407_v57  ;;  %v4677_v24 = vcombine.low %v3298_v17, %v3303_v18  ;;  %v4686_v28 = vcombine.low %v3308_v14, %v3313_v54  ;;  %v5431_v34 = vld [vmem:[%s6518_s3 + $0x228] sm:$0xff]   ;;  %v5433_v35 = vld [vmem:[%s6518_s3 + $0x230] sm:$0xff]   ;;  %v5436_v19 = vld [vmem:[%s6518_s3 + $0x238] sm:$0xff]  }
 0x20f   : > { %5066 = vmatpush3.bf16.msra.mxu1 %v5409_v47  ;;  %v5434_v6 = vld [vmem:[#allocation4 + $0x20] ss:$36 sps:$4 sm:$0xff]   ;;  %v5435_v44 = vld [vmem:[#allocation4 + $0xf0] ss:$36 sps:$4 sm:$0xff]   ;;  %v5437_v3 = vld [vmem:[#allocation4 + $0x68] ss:$36 sps:$4 sm:$0xff]  }
 0x210   : > { %5167 = vmatprep.subr.bf16.mxu1 %v5412_v9  ;;  %5106 = vmatpush3.bf16.msra.mxu0 %v5411_v52  ;;  %v5438_v25 = vld [vmem:[#allocation4 + $0xb0] ss:$36 sps:$4 sm:$0xff]   ;;  %v5439_v29 = vld [vmem:[#allocation4 + $0xf8] ss:$36 sps:$4 sm:$0xff]  }
 0x211   : > { %v4663_v62 = vld [vmem:[%s6519_s4] ss:$0 sm:$0xff] }
 0x212   : > { %4256 = vmatmul.mubr.bf16.vlgmr.msra.gmra.mrb[48].mxu1 %v5399_v27 }
 0x213   : > { %4263 = vmatprep.mubr.bf16.mxu1 %v5413_v58  ;;  %5168 = vmatpush3.bf16.msra.mxu1 %v5412_v9 }
 0x214   : > { %5169 = vmatprep.subr.bf16.mxu1 %v5417_v2 }
 0x215   : > { %4321 = vmatmul.mubr.bf16.vlgmr.msra.gmra.mrb[56].mxu0 %v5405_v31 }
 0x216   : > { %4328 = vmatprep.mubr.bf16.mxu0 %v5415_v16 }
 0x217   : > { %5170 = vmatpush3.bf16.msra.mxu1 %v5417_v2 }
 0x218   : > { %5171 = vmatprep.subr.bf16.mxu1 %v5418_v53 }
 0x21a   : > { %4264 = vmatmul.mubr.bf16.gmra.mrb[52].mxu1 %v4677_v24 }
 0x21b   : > { %4271 = vmatprep.mubr.bf16.mxu1 %v5419_v22  ;;  %5172 = vmatpush3.bf16.msra.mxu1 %v5418_v53 }
 0x21c   : > { %5173 = vmatprep.subr.bf16.mxu1 %v5424_v61 }
 0x21d   : > { %4329 = vmatmul.mubr.bf16.gmra.mrb[60].mxu0 %v5421_v32 }
 0x21e   : > { %4336 = vmatprep.mubr.bf16.mxu0 %v5422_v30 }
 0x21f   : > { %5174 = vmatpush3.bf16.msra.mxu1 %v5424_v61 }
 0x220   : > { %5175 = vmatprep.subr.bf16.mxu1 %v5425_v48 }
 0x222   : > { %4272 = vmatmul.mubr.bf16.gmra.mrb[56].mxu1 %v4686_v28 }
 0x223   : > { %4279 = vmatprep.mubr.bf16.mxu1 %v5426_v15  ;;  %5176 = vmatpush3.bf16.msra.mxu1 %v5425_v48 }
 0x224   : > { %5177 = vmatprep.subr.bf16.mxu1 %v5431_v34 }
 0x225   : > { %4337 = vmatmul.mubr.bf16.gmra.mrb[64].mxu0 %v5428_v36 }
 0x226   : > { %4344 = vmatprep.mubr.bf16.mxu0 %v5429_v12 }
 0x227   : > { %5178 = vmatpush3.bf16.msra.mxu1 %v5431_v34 }
 0x228   : > { %5179 = vmatprep.subr.bf16.mxu1 %v5433_v35 }
 0x22a   : > { %4280 = vmatmul.mubr.bf16.gmra.mrb[60].mxu1 %v5432_v55 }
 0x22b   : > { %5180 = vmatpush3.bf16.msra.mxu1 %v5433_v35  ;;  %5183 = vmatprep.mubr.bf16.mxu1 %v5434_v6 }
 0x22c   : > { %5181 = vmatprep.subr.bf16.mxu1 %v5436_v19 }
 0x22d   : > { %4345 = vmatmul.mubr.bf16.gmra.mrb[68].mxu0 %v5435_v44 }
 0x22f   : > { %5182 = vmatpush3.bf16.msra.mxu1 %v5436_v19 }
 0x232   : > { %5184 = vmatmul.mubr.bf16.vlgmr.msra.gmra.mrb[64].mxu1 %v5437_v3 }
 0x233   : > { %5187 = vmatprep.mubr.bf16.mxu1 %v5438_v25 }
 0x23a   : > { %5188 = vmatmul.mubr.bf16.gmra.mrb[68].mxu1 %v5439_v29 }
 0x2c2   : > { %v4987_v43 = vpop.f32.mrb[32].mxu1 }
 0x2c3   : > { %v4988_v38 = vpop.f32.mrb[33].mxu1 }
 0x2c4   : > { %v4989_v49 = vadd.f32 %v4988_v38, %v4987_v43  ;;  %v4990_v46 = vpop.f32.mrb[34].mxu1 }
 0x2c5   : > { %v5027_v4 = vpop.f32.mrb[40].mxu0  ;;  %v4991_v40 = vpop.f32.mrb[35].mxu1 }
 0x2c6   : > { %v4128_v1 = vadd.f32 %v4989_v49, %v4663_v62  ;;  %v4992_v37 = vadd.f32 %v4991_v40, %v4990_v46  ;;  %v5028_v10 = vpop.f32.mrb[41].mxu0 }
 0x2c7   : > { %v5029_v7 = vadd.f32 %v5028_v10, %v5027_v4  ;;  %v5030_v33 = vpop.f32.mrb[42].mxu0 }
 0x2c8   : > { %v4131_v23 = vadd.f32 %v4992_v37, %v4663_v62  ;;  %v5031_v56 = vpop.f32.mrb[43].mxu0 }
 0x2c9   : > { %v4193_v42 = vadd.f32 %v5029_v7, %v4128_v1  ;;  %v5032_v60 = vadd.f32 %v5031_v56, %v5030_v33 }
 0x2cb   : > { %v4993_v50 = vpop.f32.mrb[36].mxu1  ;;  %v4196_v5 = vadd.f32 %v5032_v60, %v4131_v23 }
 0x2cc   : > { %v4994_v13 = vpop.f32.mrb[37].mxu1 }
 0x2cd   : > { %v4995_v8 = vadd.f32 %v4994_v13, %v4993_v50  ;;  %v4996_v63 = vpop.f32.mrb[38].mxu1 }
 0x2ce   : > { %v4997_v26 = vpop.f32.mrb[39].mxu1 }
 0x2cf   : > { %v4136_v11 = vadd.f32 %v4995_v8, %v4663_v62  ;;  %v4998_v0 = vadd.f32 %v4997_v26, %v4996_v63 }
 0x2d0   : > { %v5033_v41 = vpop.f32.mrb[44].mxu0 }
 0x2d1   : > { %v5034_v20 = vpop.f32.mrb[45].mxu0  ;;  %v4139_v39 = vadd.f32 %v4998_v0, %v4663_v62 }
 0x2d2   : > { %v5035_v51 = vadd.f32 %v5034_v20, %v5033_v41  ;;  %v5036_v59 = vpop.f32.mrb[46].mxu0 }
 0x2d3   : > { %v5037_v45 = vpop.f32.mrb[47].mxu0 }
 0x2d4   : > { %v4201_v47 = vadd.f32 %v5035_v51, %v4136_v11  ;;  %v5038_v21 = vadd.f32 %v5037_v45, %v5036_v59  ;;  %v4999_v57 = vpop.f32.mrb[40].mxu1 }
 0x2d5   : > { %v5000_v52 = vpop.f32.mrb[41].mxu1 }
 0x2d6   : > { %v4204_v9 = vadd.f32 %v5038_v21, %v4139_v39  ;;  %v5001_v27 = vadd.f32 %v5000_v52, %v4999_v57  ;;  %v5002_v2 = vpop.f32.mrb[42].mxu1 }
 0x2d7   : > { %v5003_v31 = vpop.f32.mrb[43].mxu1 }
 0x2d8   : > { %v5039_v58 = vpop.f32.mrb[48].mxu0  ;;  %v4144_v16 = vadd.f32 %v5001_v27, %v4663_v62  ;;  %v5004_v53 = vadd.f32 %v5003_v31, %v5002_v2 }
 0x2d9   : > { %v5040_v18 = vpop.f32.mrb[49].mxu0 }
 0x2da   : > { %v5041_v17 = vadd.f32 %v5040_v18, %v5039_v58  ;;  %v5042_v24 = vpop.f32.mrb[50].mxu0  ;;  %v4147_v61 = vadd.f32 %v5004_v53, %v4663_v62 }
 0x2db   : > { %v5043_v22 = vpop.f32.mrb[51].mxu0 }
 0x2dc   : > { %v4209_v32 = vadd.f32 %v5041_v17, %v4144_v16  ;;  %v5044_v30 = vadd.f32 %v5043_v22, %v5042_v24 }
 0x2dd   : > { %v5005_v48 = vpop.f32.mrb[44].mxu1 }
 0x2de   : > { %v4212_v54 = vadd.f32 %v5044_v30, %v4147_v61  ;;  %v5006_v14 = vpop.f32.mrb[45].mxu1 }
 0x2df   : > { %v5007_v28 = vadd.f32 %v5006_v14, %v5005_v48  ;;  %v5008_v34 = vpop.f32.mrb[46].mxu1 }
 0x2e0   : > { %v5045_v15 = vpop.f32.mrb[52].mxu0  ;;  %v5009_v36 = vpop.f32.mrb[47].mxu1 }
 0x2e1   : > { %v4152_v12 = vadd.f32 %v5007_v28, %v4663_v62  ;;  %v5010_v35 = vadd.f32 %v5009_v36, %v5008_v34  ;;  %v5046_v55 = vpop.f32.mrb[53].mxu0 }
 0x2e2   : > { %v5047_v19 = vadd.f32 %v5046_v55, %v5045_v15  ;;  %v5048_v6 = vpop.f32.mrb[54].mxu0 }
 0x2e3   : > { %v4155_v44 = vadd.f32 %v5010_v35, %v4663_v62  ;;  %v5049_v3 = vpop.f32.mrb[55].mxu0 }
 0x2e4   : > { %v4217_v25 = vadd.f32 %v5047_v19, %v4152_v12  ;;  %v5050_v29 = vadd.f32 %v5049_v3, %v5048_v6 }
 0x2e5   : > { %v5067_v43 = vpop.f32.mrb[48].mxu1 }
 0x2e6   : > { %v4220_v38 = vadd.f32 %v5050_v29, %v4155_v44  ;;  %v5068_v49 = vpop.f32.mrb[49].mxu1 }
 0x2e7   : > { %v5069_v46 = vadd.f32 %v5068_v49, %v5067_v43  ;;  %v5070_v4 = vpop.f32.mrb[50].mxu1 }
 0x2e8   : > { %v5107_v40 = vpop.f32.mrb[56].mxu0  ;;  %v5071_v1 = vpop.f32.mrb[51].mxu1 }
 0x2e9   : > { %v4258_v37 = vadd.f32 %v5069_v46, %v4193_v42  ;;  %v5072_v10 = vadd.f32 %v5071_v1, %v5070_v4  ;;  %v5108_v7 = vpop.f32.mrb[57].mxu0 }
 0x2ea   : > { %v5109_v33 = vadd.f32 %v5108_v7, %v5107_v40  ;;  %v5110_v23 = vpop.f32.mrb[58].mxu0 }
 0x2eb   : > { %v4261_v56 = vadd.f32 %v5072_v10, %v4196_v5  ;;  %v5111_v60 = vpop.f32.mrb[59].mxu0 }
 0x2ec   : > { %v5112_v50 = vadd.f32 %v5111_v60, %v5110_v23  ;;  %v4323_v13 = vadd.f32 %v5109_v33, %v4258_v37 }
 0x2ed   : > { %v5073_v62 = vpop.f32.mrb[52].mxu1 }
 0x2ee   : > { %v5074_v8 = vpop.f32.mrb[53].mxu1  ;;  %v4326_v63 = vadd.f32 %v5112_v50, %v4261_v56 }
 0x2ef   : > { %v5075_v41 = vadd.f32 %v5074_v8, %v5073_v62  ;;  %v5076_v26 = vpop.f32.mrb[54].mxu1 }
 0x2f0   : > { %v5113_v11 = vpop.f32.mrb[60].mxu0  ;;  %v5077_v0 = vpop.f32.mrb[55].mxu1 }
 0x2f1   : > { %v4266_v20 = vadd.f32 %v5075_v41, %v4201_v47  ;;  %v5078_v51 = vadd.f32 %v5077_v0, %v5076_v26  ;;  %v5114_v59 = vpop.f32.mrb[61].mxu0 }
 0x2f2   : > { %v5115_v39 = vadd.f32 %v5114_v59, %v5113_v11  ;;  %v5116_v42 = vpop.f32.mrb[62].mxu0 }
 0x2f3   : > { %v4269_v45 = vadd.f32 %v5078_v51, %v4204_v9  ;;  %v5117_v21 = vpop.f32.mrb[63].mxu0 }
 0x2f4   : > { %v5118_v57 = vadd.f32 %v5117_v21, %v5116_v42  ;;  %v4331_v52 = vadd.f32 %v5115_v39, %v4266_v20 }
 0x2f5   : > { %v5079_v5 = vpop.f32.mrb[56].mxu1 }
 0x2f6   : > { %v5080_v27 = vpop.f32.mrb[57].mxu1  ;;  %v4334_v2 = vadd.f32 %v5118_v57, %v4269_v45 }
 0x2f7   : > { %v5081_v58 = vadd.f32 %v5080_v27, %v5079_v5  ;;  %v5082_v31 = vpop.f32.mrb[58].mxu1 }
 0x2f8   : > { %v5119_v16 = vpop.f32.mrb[64].mxu0  ;;  %v5083_v53 = vpop.f32.mrb[59].mxu1 }
 0x2f9   : > { %v4274_v18 = vadd.f32 %v5081_v58, %v4209_v32  ;;  %v5084_v17 = vadd.f32 %v5083_v53, %v5082_v31  ;;  %v5120_v24 = vpop.f32.mrb[65].mxu0 }
 0x2fa   : > { %v5121_v61 = vadd.f32 %v5120_v24, %v5119_v16  ;;  %v5122_v47 = vpop.f32.mrb[66].mxu0 }
 0x2fb   : > { %v4277_v22 = vadd.f32 %v5084_v17, %v4212_v54  ;;  %v5123_v30 = vpop.f32.mrb[67].mxu0 }
 0x2fc   : > { %v5124_v48 = vadd.f32 %v5123_v30, %v5122_v47  ;;  %v4339_v14 = vadd.f32 %v5121_v61, %v4274_v18 }
 0x2fd   : > { %v5085_v9 = vpop.f32.mrb[60].mxu1 }
 0x2fe   : > { %v5086_v28 = vpop.f32.mrb[61].mxu1  ;;  %v4342_v34 = vadd.f32 %v5124_v48, %v4277_v22 }
 0x2ff   : > { %v5087_v15 = vadd.f32 %v5086_v28, %v5085_v9  ;;  %v5088_v36 = vpop.f32.mrb[62].mxu1 }
 0x300   : > { %v5125_v12 = vpop.f32.mrb[68].mxu0  ;;  %v5089_v35 = vpop.f32.mrb[63].mxu1 }
 0x301   : > { %v4282_v55 = vadd.f32 %v5087_v15, %v4217_v25  ;;  %v5090_v19 = vadd.f32 %v5089_v35, %v5088_v36  ;;  %v5126_v6 = vpop.f32.mrb[69].mxu0 }
 0x302   : > { %v5127_v44 = vadd.f32 %v5126_v6, %v5125_v12  ;;  %v5128_v32 = vpop.f32.mrb[70].mxu0 }
 0x303   : > { %v4285_v3 = vadd.f32 %v5090_v19, %v4220_v38  ;;  %v5129_v29 = vpop.f32.mrb[71].mxu0 }
 0x304   : > { %v5130_v43 = vadd.f32 %v5129_v29, %v5128_v32  ;;  %v4347_v54 = vadd.f32 %v5127_v44, %v4282_v55 }
 0x305   : > { %v5185_v49 = vpop.f32.mrb[64].mxu1 }
 0x306   : > { %v4396_v46 = vadd.f32 %v5185_v49, %v4331_v52  ;;  %v4387_v4 = vpop.f32.mrb[65].mxu1  ;;  %v4350_v40 = vadd.f32 %v5130_v43, %v4285_v3 }
 0x307   : > { %v4388_v1 = vadd.f32 %v4387_v4, %v4323_v13  ;;  %v5186_v37 = vpop.f32.mrb[66].mxu1 }
 0x308   : > { %v4399_v10 = vadd.f32 %v5186_v37, %v4334_v2  ;;  %v4390_v7 = vpop.f32.mrb[67].mxu1  ;;  %v4420_v23 = vmax.f32 %v4396_v46, 0.0 }
 0x309   : > { %v4391_v33 = vadd.f32 %v4390_v7, %v4326_v63  ;;  %v4418_v56 = vmax.f32 %v4388_v1, 0.0 }
 0x30a   : > { %v4421_v25 = vmax.f32 %v4399_v10, 0.0 }
 0x30b   : > { %v4419_v38 = vmax.f32 %v4391_v33, 0.0 }
 0x30c   : > { %v4784_v60 = vpack.c.bf16 %v4421_v25, %v4420_v23 }
 0x30d   : > { %v4779_v50 = vpack.c.bf16 %v4419_v38, %v4418_v56  ;;  %v5189_v62 = vpop.f32.mrb[68].mxu1 }
 0x30e   : > { %4796 = vst [vmem:[%s224_s6 + $0x8] sm:$0xff] %v4784_v60   ;;  %v4412_v8 = vadd.f32 %v5189_v62, %v4347_v54  ;;  %v4403_v41 = vpop.f32.mrb[69].mxu1 }
 0x30f   : > { %4780 = vst [vmem:[%s224_s6] sm:$0xff] %v4779_v50   ;;  %v4404_v13 = vadd.f32 %v4403_v41, %v4339_v14  ;;  %v5190_v26 = vpop.f32.mrb[70].mxu1 }
 0x310   : > { %v4415_v11 = vadd.f32 %v5190_v26, %v4350_v40  ;;  %v4406_v63 = vpop.f32.mrb[71].mxu1  ;;  %v4424_v20 = vmax.f32 %v4412_v8, 0.0 }
 0x311   : > { %v4407_v0 = vadd.f32 %v4406_v63, %v4342_v34  ;;  %v4422_v59 = vmax.f32 %v4404_v13, 0.0 }
 0x312   : > { %v4425_v51 = vmax.f32 %v4415_v11, 0.0 }
 0x313   : > { %v4423_v39 = vmax.f32 %v4407_v0, 0.0 }
 0x314   : > { %v4794_v42 = vpack.c.bf16 %v4425_v51, %v4424_v20 }
 0x315   : > { %v4789_v45 = vpack.c.bf16 %v4423_v39, %v4422_v59 }
 0x316   : > { %4798 = vst [vmem:[%s224_s6 + $0x18] sm:$0xff] %v4794_v42  }
 0x317   : > { %4797 = vst [vmem:[%s224_s6 + $0x10] sm:$0xff] %v4789_v45  }
 0x318 PF: > { %s15_s18 = sadd.s32 1, %s5446_s18  }
 0x319   : > { %p12_p4 = scmp.ge.s32.totalorder %s15_s18, 4  }
 0x31b   :  { %14 = sbr.rel (!%p12_p4) target bundleno = 1 (0x1), region = 74 }

</bundles_post_ra>
